<compile_context>
chip_gen: v6e
topology: v6e:2x2x1
jax: 0.10.0
libtpu: 0.0.40
codegen_flags: <defaults>
</compile_context>

<pallas_src>
from functools import partial
from math import ceil

import jax
import jax.numpy as jnp
from jax import lax
from jax.experimental import pallas as pl
from jax.experimental.pallas import tpu as pltpu


# ----------------------------- Pallas kernel --------------------------------
def _fused_conv_kernel(w_ref, b_ref, x_ref, o_ref, xp_ref, *,
                       cin, cout, k, stride, pad, H, W, th, wout):
    """One (batch, row-tile) grid step: reflect-pad (once/batch) + conv + bias + ReLU.

    w_ref : (cout*cin*k*k,) f32, SMEM  -- PyTorch OIHW flattening order
    b_ref : (cout,)         f32, SMEM
    x_ref : (1, cin, H, W)  f32, VMEM  -- unpadded image, resident per batch
    o_ref : (1, cout, th, wout) f32, VMEM
    xp_ref: (cin, H+2p, W+2p) f32, VMEM scratch -- reflection-padded image
    """
    rt = pl.program_id(1)
    p = pad

    # --- Build the reflection-padded image in VMEM once per batch element ---
    @pl.when(rt == 0)
    def _():
        xp_ref[:, p:p + H, p:p + W] = x_ref[0]
        for j in range(p):                       # top / bottom reflected rows
            src_t = p - j
            src_b = H - 2 - j
            xp_ref[:, j:j + 1, p:p + W] = x_ref[0, :, src_t:src_t + 1, :]
            xp_ref[:, H + p + j:H + p + j + 1, p:p + W] = \
                x_ref[0, :, src_b:src_b + 1, :]
        for j in range(p):                       # left / right reflected cols
            src_l = 2 * p - j
            src_r = W + p - 2 - j
            xp_ref[:, :, j:j + 1] = xp_ref[:, :, src_l:src_l + 1]
            xp_ref[:, :, W + p + j:W + p + j + 1] = \
                xp_ref[:, :, src_r:src_r + 1]

    # --- Direct conv: one VMEM load per tap, cout register accumulators -----
    step = th * stride
    align = step & -step                          # largest pow-2 divisor
    row0 = pl.multiple_of(rt * step, align)

    accs = [None] * cout
    for ci in range(cin):
        for ki in range(k):
            for kj in range(k):
                if stride == 1:
                    tap = xp_ref[ci, pl.ds(row0 + ki, th), pl.ds(kj, wout)]
                else:
                    # TODO(synk): stride > 1 loads a contiguous window and
                    # subsamples; correctness-first path (module default is 1).
                    win = xp_ref[ci,
                                 pl.ds(row0 + ki, (th - 1) * stride + 1),
                                 pl.ds(kj, (wout - 1) * stride + 1)]
                    tap = win[::stride, ::stride]
                base = (ci * k + ki) * k + kj
                for co in range(cout):
                    w = w_ref[co * (cin * k * k) + base]
                    contrib = w * tap
                    accs[co] = contrib if accs[co] is None else accs[co] + contrib

    for co in range(cout):
        # bias + ReLU fused; output already NCHW with W in lanes.
        o_ref[0, co, :, :] = jnp.maximum(accs[co] + b_ref[co], 0.0)


# ------------------------------ Tiling helpers -------------------------------
def _pick_row_tile(hout, wout, cout):
    # Keep cout simultaneous (th, wout) accumulators comfortably inside the
    # 64-vreg file / VMEM spill budget.
    max_acc_elems = max(1024, 32768 // max(cout, 1))
    for cand in (256, 128, 64, 32, 16, 8):
        if hout % cand == 0 and cand * wout <= max_acc_elems:
            return cand
    if hout % 8 == 0:
        return 8
    return hout


def _vmem_budget_bytes(need_bytes):
    cap = 64 << 20                                # conservative (v7x per-TC)
    try:
        info = pltpu.get_tpu_info()
        cap = int(getattr(info, "vmem_capacity_bytes", cap))
    except Exception:
        pass
    hi = int(cap * 0.9)
    return int(min(max(need_bytes, 4 << 20), hi))


def _reflect_pad_amount(D, kernel, stride):
    Dout = ceil(D / stride)
    return max(int(ceil(((Dout - 1) * stride - D + kernel) / 2)), 0)


# ------------------------------ pallas_call glue ------------------------------
def _fused_conv_call(x, weight, bias, *, k, stride, pad, hout, wout, th):
    B, cin, H, W = x.shape
    cout = weight.shape[0]
    Hp, Wp = H + 2 * pad, W + 2 * pad
    w_flat = weight.reshape(-1)
    n_row_tiles = hout // th

    kernel = partial(_fused_conv_kernel, cin=cin, cout=cout, k=k,
                     stride=stride, pad=pad, H=H, W=W, th=th, wout=wout)

    # Working set: double-buffered unpadded-image block + padded scratch +
    # double-buffered output tile (+ headroom).
    need = (2 * cin * H * W + cin * Hp * Wp + 2 * cout * th * wout) * 4 + (2 << 20)
    vmem_bytes = _vmem_budget_bytes(need)

    flops = 2 * B * hout * wout * cout * cin * k * k
    bytes_accessed = (x.size + w_flat.size + bias.size
                      + B * cout * hout * wout) * 4

    return pl.pallas_call(
        kernel,
        out_shape=jax.ShapeDtypeStruct((B, cout, hout, wout), jnp.float32),
        grid=(B, n_row_tiles),
        in_specs=[
            pl.BlockSpec(memory_space=pltpu.MemorySpace.SMEM),          # weights
            pl.BlockSpec(memory_space=pltpu.MemorySpace.SMEM),          # bias
            pl.BlockSpec((1, cin, H, W), lambda b, r: (b, 0, 0, 0)),    # image
        ],
        out_specs=pl.BlockSpec((1, cout, th, wout), lambda b, r: (b, 0, r, 0)),
        scratch_shapes=[pltpu.VMEM((cin, Hp, Wp), jnp.float32)],
        compiler_params=pltpu.CompilerParams(
            dimension_semantics=("parallel", "arbitrary"),
            vmem_limit_bytes=vmem_bytes,
        ),
        cost_estimate=pl.CostEstimate(
            flops=flops, transcendentals=0, bytes_accessed=bytes_accessed),
    )(w_flat, bias, x)


# ------------------------------ Module forward --------------------------------
@partial(jax.jit, static_argnames=("kernel_size", "stride"))
def _same_pad_conv2d(x, weight, bias, kernel_size, stride):
    k = kernel_size
    B, cin, H, W = x.shape
    # Reference parity: pad amount derived from the last dim (W) only and
    # applied to both H and W, exactly like the PyTorch same_padding() helper
    # (square-image assumption of the original module).
    pad = _reflect_pad_amount(W, k, stride)
    Hp, Wp = H + 2 * pad, W + 2 * pad
    hout = (Hp - k) // stride + 1
    wout = (Wp - k) // stride + 1
    cout = weight.shape[0]
    th = _pick_row_tile(hout, wout, cout)
    return _fused_conv_call(x, weight, bias, k=k, stride=stride, pad=pad,
                            hout=hout, wout=wout, th=th)


def same_pad_conv2d_forward(in_data, weight, bias, kernel_size, stride=1):
    """
    Forward pass of SamePadConv2d (activation=ReLU, num_styles=0).

    in_data: dict with 'x': (B, Cin, H, W) float32 (NCHW), 'num_style': int.
    weight : (Cout, Cin, k, k) PyTorch Conv2d weight layout.  bias: (Cout,)
    Returns dict with 'x': (B, Cout, Hout, Wout) NCHW and 'num_style' unchanged.
    """
    out = _same_pad_conv2d(in_data["x"], weight, bias, kernel_size, stride)
    return {"x": out, "num_style": in_data["num_style"]}


# --------------------------------- Main --------------------------------------
if __name__ == "__main__":
    in_channels, out_channels = 4, 8
    kernel_size, stride = 3, 1

    key = jax.random.PRNGKey(0)
    kx, kw, kb = jax.random.split(key, 3)

    fan_in = in_channels * kernel_size * kernel_size
    bound = 1.0 / (fan_in ** 0.5)
    weight = jax.random.uniform(
        kw, (out_channels, in_channels, kernel_size, kernel_size),
        minval=-bound, maxval=bound, dtype=jnp.float32,
    )
    bias = jax.random.uniform(
        kb, (out_channels,), minval=-bound, maxval=bound, dtype=jnp.float32
    )

    x = jax.random.normal(kx, (2, in_channels, 16, 16), dtype=jnp.float32)
    in_data = {"x": x, "num_style": 0}

    out = same_pad_conv2d_forward(in_data, weight, bias, kernel_size, stride)
    y = jax.block_until_ready(out["x"])

    # Reference check (reflection pad + VALID conv + bias + ReLU) in pure JAX.
    p_ref = _reflect_pad_amount(x.shape[-1], kernel_size, stride)
    xp_ref = jnp.pad(
        x, ((0, 0), (0, 0), (p_ref, p_ref), (p_ref, p_ref)), mode="reflect")
    ref = lax.conv_general_dilated(
        xp_ref, weight, window_strides=(stride, stride), padding="VALID",
        dimension_numbers=("NCHW", "OIHW", "NCHW"),
        precision=lax.Precision.HIGHEST,
    )
    ref = jnp.maximum(ref + bias[None, :, None, None], 0.0)

    assert y.shape == (2, out_channels, 16, 16), y.shape
    assert bool(jnp.all(y >= 0.0))                       # ReLU applied
    assert bool(jnp.allclose(y, ref, atol=1e-4, rtol=1e-4))
    print("KERNEL_OK")
</pallas_src>

<mosaic_0001>
module attributes {stable_mosaic.version = 11 : i64} {
  func.func @_fused_conv_kernel(%arg0: i32, %arg1: i32, %arg2: memref<288xf32, #tpu.memory_space<smem>>, %arg3: memref<8xf32, #tpu.memory_space<smem>>, %arg4: memref<1x4x16x16xf32, #tpu.memory_space<vmem>>, %arg5: memref<1x8x16x16xf32, #tpu.memory_space<vmem>>, %arg6: memref<4x18x18xf32, #tpu.memory_space<vmem>>) attributes {dimension_semantics = [#tpu.dimension_semantics<parallel>, #tpu.dimension_semantics<arbitrary>], iteration_bounds = array<i64: 2, 1>, scalar_prefetch = 0 : i64, scratch_operands = 1 : i64, tpu.core_type = #tpu.core_type<tc>, window_params = [{transform_indices = @transform_0, window_bounds = array<i64: 288>}, {transform_indices = @transform_1, window_bounds = array<i64: 8>}, {transform_indices = @transform_2, window_bounds = array<i64: 1, 4, 16, 16>}, {transform_indices = @transform_3, window_bounds = array<i64: 1, 8, 16, 16>}]} {
    %c0_i32 = arith.constant 0 : i32
    %0 = arith.cmpi eq, %arg1, %c0_i32 : i32
    %1 = arith.extui %0 : i1 to i32
    %c0_i32_0 = arith.constant 0 : i32
    %2 = arith.cmpi ne, %1, %c0_i32_0 : i32
    scf.if %2 {
      %c0_154 = arith.constant 0 : index
      %c0_155 = arith.constant 0 : index
      %c0_156 = arith.constant 0 : index
      %c0_157 = arith.constant 0 : index
      %1357 = vector.load %arg4[%c0_154, %c0_155, %c0_156, %c0_157] : memref<1x4x16x16xf32, #tpu.memory_space<vmem>>, vector<1x4x16x16xf32>
      %1358 = vector.shape_cast %1357 : vector<1x4x16x16xf32> to vector<4x16x16xf32>
      %c0_158 = arith.constant 0 : index
      %c1_159 = arith.constant 1 : index
      %c1_160 = arith.constant 1 : index
      %1359 = vector.load %arg6[%c0_158, %c1_159, %c1_160] : memref<4x18x18xf32, #tpu.memory_space<vmem>>, vector<4x16x16xf32>
      tpu.vector_store %arg6[%c0_158, %c1_159, %c1_160], %1358 {strides = array<i32>} : memref<4x18x18xf32, #tpu.memory_space<vmem>>, vector<4x16x16xf32>,
      %c0_161 = arith.constant 0 : index
      %c0_162 = arith.constant 0 : index
      %c1_163 = arith.constant 1 : index
      %c0_164 = arith.constant 0 : index
      %1360 = vector.load %arg4[%c0_161, %c0_162, %c1_163, %c0_164] : memref<1x4x16x16xf32, #tpu.memory_space<vmem>>, vector<1x4x1x16xf32>
      %1361 = vector.shape_cast %1360 : vector<1x4x1x16xf32> to vector<4x1x16xf32>
      %c0_165 = arith.constant 0 : index
      %c0_166 = arith.constant 0 : index
      %c1_167 = arith.constant 1 : index
      %1362 = vector.load %arg6[%c0_165, %c0_166, %c1_167] : memref<4x18x18xf32, #tpu.memory_space<vmem>>, vector<4x1x16xf32>
      tpu.vector_store %arg6[%c0_165, %c0_166, %c1_167], %1361 {strides = array<i32>} : memref<4x18x18xf32, #tpu.memory_space<vmem>>, vector<4x1x16xf32>,
      %c0_168 = arith.constant 0 : index
      %c0_169 = arith.constant 0 : index
      %c14_170 = arith.constant 14 : index
      %c0_171 = arith.constant 0 : index
      %1363 = vector.load %arg4[%c0_168, %c0_169, %c14_170, %c0_171] : memref<1x4x16x16xf32, #tpu.memory_space<vmem>>, vector<1x4x1x16xf32>
      %1364 = vector.shape_cast %1363 : vector<1x4x1x16xf32> to vector<4x1x16xf32>
      %c0_172 = arith.constant 0 : index
      %c17_173 = arith.constant 17 : index
      %c1_174 = arith.constant 1 : index
      %1365 = vector.load %arg6[%c0_172, %c17_173, %c1_174] : memref<4x18x18xf32, #tpu.memory_space<vmem>>, vector<4x1x16xf32>
      tpu.vector_store %arg6[%c0_172, %c17_173, %c1_174], %1364 {strides = array<i32>} : memref<4x18x18xf32, #tpu.memory_space<vmem>>, vector<4x1x16xf32>,
      %c0_175 = arith.constant 0 : index
      %c0_176 = arith.constant 0 : index
      %c2_177 = arith.constant 2 : index
      %1366 = vector.load %arg6[%c0_175, %c0_176, %c2_177] : memref<4x18x18xf32, #tpu.memory_space<vmem>>, vector<4x18x1xf32>
      %c0_178 = arith.constant 0 : index
      %c0_179 = arith.constant 0 : index
      %c0_180 = arith.constant 0 : index
      %1367 = vector.load %arg6[%c0_178, %c0_179, %c0_180] : memref<4x18x18xf32, #tpu.memory_space<vmem>>, vector<4x18x1xf32>
      tpu.vector_store %arg6[%c0_178, %c0_179, %c0_180], %1366 {strides = array<i32>} : memref<4x18x18xf32, #tpu.memory_space<vmem>>, vector<4x18x1xf32>,
      %c0_181 = arith.constant 0 : index
      %c0_182 = arith.constant 0 : index
      %c15_183 = arith.constant 15 : index
      %1368 = vector.load %arg6[%c0_181, %c0_182, %c15_183] : memref<4x18x18xf32, #tpu.memory_space<vmem>>, vector<4x18x1xf32>
      %c0_184 = arith.constant 0 : index
      %c0_185 = arith.constant 0 : index
      %c17_186 = arith.constant 17 : index
      %1369 = vector.load %arg6[%c0_184, %c0_185, %c17_186] : memref<4x18x18xf32, #tpu.memory_space<vmem>>, vector<4x18x1xf32>
      tpu.vector_store %arg6[%c0_184, %c0_185, %c17_186], %1368 {strides = array<i32>} : memref<4x18x18xf32, #tpu.memory_space<vmem>>, vector<4x18x1xf32>,
    } else {
    }
    %c16_i32 = arith.constant 16 : i32
    %3 = arith.muli %arg1, %c16_i32 : i32
    %4 = tpu.assume_multiple %3, 16 : i32
    %c0_i32_1 = arith.constant 0 : i32
    %5 = arith.addi %4, %c0_i32_1 : i32
    %c0 = arith.constant 0 : index
    %6 = arith.index_cast %5 : i32 to index
    %c0_2 = arith.constant 0 : index
    %7 = vector.load %arg6[%c0, %6, %c0_2] : memref<4x18x18xf32, #tpu.memory_space<vmem>>, vector<1x16x16xf32>
    %8 = vector.shape_cast %7 : vector<1x16x16xf32> to vector<16x16xf32>
    %c0_3 = arith.constant 0 : index
    %9 = memref.load %arg2[%c0_3] : memref<288xf32, #tpu.memory_space<smem>>
    %10 = vector.broadcast %9 : f32 to vector<16x16xf32>
    %11 = arith.mulf %10, %8 : vector<16x16xf32>
    %c36 = arith.constant 36 : index
    %12 = memref.load %arg2[%c36] : memref<288xf32, #tpu.memory_space<smem>>
    %13 = vector.broadcast %12 : f32 to vector<16x16xf32>
    %14 = arith.mulf %13, %8 : vector<16x16xf32>
    %c72 = arith.constant 72 : index
    %15 = memref.load %arg2[%c72] : memref<288xf32, #tpu.memory_space<smem>>
    %16 = vector.broadcast %15 : f32 to vector<16x16xf32>
    %17 = arith.mulf %16, %8 : vector<16x16xf32>
    %c108 = arith.constant 108 : index
    %18 = memref.load %arg2[%c108] : memref<288xf32, #tpu.memory_space<smem>>
    %19 = vector.broadcast %18 : f32 to vector<16x16xf32>
    %20 = arith.mulf %19, %8 : vector<16x16xf32>
    %c144 = arith.constant 144 : index
    %21 = memref.load %arg2[%c144] : memref<288xf32, #tpu.memory_space<smem>>
    %22 = vector.broadcast %21 : f32 to vector<16x16xf32>
    %23 = arith.mulf %22, %8 : vector<16x16xf32>
    %c180 = arith.constant 180 : index
    %24 = memref.load %arg2[%c180] : memref<288xf32, #tpu.memory_space<smem>>
    %25 = vector.broadcast %24 : f32 to vector<16x16xf32>
    %26 = arith.mulf %25, %8 : vector<16x16xf32>
    %c216 = arith.constant 216 : index
    %27 = memref.load %arg2[%c216] : memref<288xf32, #tpu.memory_space<smem>>
    %28 = vector.broadcast %27 : f32 to vector<16x16xf32>
    %29 = arith.mulf %28, %8 : vector<16x16xf32>
    %c252 = arith.constant 252 : index
    %30 = memref.load %arg2[%c252] : memref<288xf32, #tpu.memory_space<smem>>
    %31 = vector.broadcast %30 : f32 to vector<16x16xf32>
    %32 = arith.mulf %31, %8 : vector<16x16xf32>
    %c0_i32_4 = arith.constant 0 : i32
    %33 = arith.addi %4, %c0_i32_4 : i32
    %c0_5 = arith.constant 0 : index
    %34 = arith.index_cast %33 : i32 to index
    %c1 = arith.constant 1 : index
    %35 = vector.load %arg6[%c0_5, %34, %c1] : memref<4x18x18xf32, #tpu.memory_space<vmem>>, vector<1x16x16xf32>
    %36 = vector.shape_cast %35 : vector<1x16x16xf32> to vector<16x16xf32>
    %c1_6 = arith.constant 1 : index
    %37 = memref.load %arg2[%c1_6] : memref<288xf32, #tpu.memory_space<smem>>
    %38 = vector.broadcast %37 : f32 to vector<16x16xf32>
    %39 = arith.mulf %38, %36 : vector<16x16xf32>
    %40 = arith.addf %11, %39 : vector<16x16xf32>
    %c37 = arith.constant 37 : index
    %41 = memref.load %arg2[%c37] : memref<288xf32, #tpu.memory_space<smem>>
    %42 = vector.broadcast %41 : f32 to vector<16x16xf32>
    %43 = arith.mulf %42, %36 : vector<16x16xf32>
    %44 = arith.addf %14, %43 : vector<16x16xf32>
    %c73 = arith.constant 73 : index
    %45 = memref.load %arg2[%c73] : memref<288xf32, #tpu.memory_space<smem>>
    %46 = vector.broadcast %45 : f32 to vector<16x16xf32>
    %47 = arith.mulf %46, %36 : vector<16x16xf32>
    %48 = arith.addf %17, %47 : vector<16x16xf32>
    %c109 = arith.constant 109 : index
    %49 = memref.load %arg2[%c109] : memref<288xf32, #tpu.memory_space<smem>>
    %50 = vector.broadcast %49 : f32 to vector<16x16xf32>
    %51 = arith.mulf %50, %36 : vector<16x16xf32>
    %52 = arith.addf %20, %51 : vector<16x16xf32>
    %c145 = arith.constant 145 : index
    %53 = memref.load %arg2[%c145] : memref<288xf32, #tpu.memory_space<smem>>
    %54 = vector.broadcast %53 : f32 to vector<16x16xf32>
    %55 = arith.mulf %54, %36 : vector<16x16xf32>
    %56 = arith.addf %23, %55 : vector<16x16xf32>
    %c181 = arith.constant 181 : index
    %57 = memref.load %arg2[%c181] : memref<288xf32, #tpu.memory_space<smem>>
    %58 = vector.broadcast %57 : f32 to vector<16x16xf32>
    %59 = arith.mulf %58, %36 : vector<16x16xf32>
    %60 = arith.addf %26, %59 : vector<16x16xf32>
    %c217 = arith.constant 217 : index
    %61 = memref.load %arg2[%c217] : memref<288xf32, #tpu.memory_space<smem>>
    %62 = vector.broadcast %61 : f32 to vector<16x16xf32>
    %63 = arith.mulf %62, %36 : vector<16x16xf32>
    %64 = arith.addf %29, %63 : vector<16x16xf32>
    %c253 = arith.constant 253 : index
    %65 = memref.load %arg2[%c253] : memref<288xf32, #tpu.memory_space<smem>>
    %66 = vector.broadcast %65 : f32 to vector<16x16xf32>
    %67 = arith.mulf %66, %36 : vector<16x16xf32>
    %68 = arith.addf %32, %67 : vector<16x16xf32>
    %c0_i32_7 = arith.constant 0 : i32
    %69 = arith.addi %4, %c0_i32_7 : i32
    %c0_8 = arith.constant 0 : index
    %70 = arith.index_cast %69 : i32 to index
    %c2 = arith.constant 2 : index
    %71 = vector.load %arg6[%c0_8, %70, %c2] : memref<4x18x18xf32, #tpu.memory_space<vmem>>, vector<1x16x16xf32>
    %72 = vector.shape_cast %71 : vector<1x16x16xf32> to vector<16x16xf32>
    %c2_9 = arith.constant 2 : index
    %73 = memref.load %arg2[%c2_9] : memref<288xf32, #tpu.memory_space<smem>>
    %74 = vector.broadcast %73 : f32 to vector<16x16xf32>
    %75 = arith.mulf %74, %72 : vector<16x16xf32>
    %76 = arith.addf %40, %75 : vector<16x16xf32>
    %c38 = arith.constant 38 : index
    %77 = memref.load %arg2[%c38] : memref<288xf32, #tpu.memory_space<smem>>
    %78 = vector.broadcast %77 : f32 to vector<16x16xf32>
    %79 = arith.mulf %78, %72 : vector<16x16xf32>
    %80 = arith.addf %44, %79 : vector<16x16xf32>
    %c74 = arith.constant 74 : index
    %81 = memref.load %arg2[%c74] : memref<288xf32, #tpu.memory_space<smem>>
    %82 = vector.broadcast %81 : f32 to vector<16x16xf32>
    %83 = arith.mulf %82, %72 : vector<16x16xf32>
    %84 = arith.addf %48, %83 : vector<16x16xf32>
    %c110 = arith.constant 110 : index
    %85 = memref.load %arg2[%c110] : memref<288xf32, #tpu.memory_space<smem>>
    %86 = vector.broadcast %85 : f32 to vector<16x16xf32>
    %87 = arith.mulf %86, %72 : vector<16x16xf32>
    %88 = arith.addf %52, %87 : vector<16x16xf32>
    %c146 = arith.constant 146 : index
    %89 = memref.load %arg2[%c146] : memref<288xf32, #tpu.memory_space<smem>>
    %90 = vector.broadcast %89 : f32 to vector<16x16xf32>
    %91 = arith.mulf %90, %72 : vector<16x16xf32>
    %92 = arith.addf %56, %91 : vector<16x16xf32>
    %c182 = arith.constant 182 : index
    %93 = memref.load %arg2[%c182] : memref<288xf32, #tpu.memory_space<smem>>
    %94 = vector.broadcast %93 : f32 to vector<16x16xf32>
    %95 = arith.mulf %94, %72 : vector<16x16xf32>
    %96 = arith.addf %60, %95 : vector<16x16xf32>
    %c218 = arith.constant 218 : index
    %97 = memref.load %arg2[%c218] : memref<288xf32, #tpu.memory_space<smem>>
    %98 = vector.broadcast %97 : f32 to vector<16x16xf32>
    %99 = arith.mulf %98, %72 : vector<16x16xf32>
    %100 = arith.addf %64, %99 : vector<16x16xf32>
    %c254 = arith.constant 254 : index
    %101 = memref.load %arg2[%c254] : memref<288xf32, #tpu.memory_space<smem>>
    %102 = vector.broadcast %101 : f32 to vector<16x16xf32>
    %103 = arith.mulf %102, %72 : vector<16x16xf32>
    %104 = arith.addf %68, %103 : vector<16x16xf32>
    %c1_i32 = arith.constant 1 : i32
    %105 = arith.addi %4, %c1_i32 : i32
    %c0_10 = arith.constant 0 : index
    %106 = arith.index_cast %105 : i32 to index
    %c0_11 = arith.constant 0 : index
    %107 = vector.load %arg6[%c0_10, %106, %c0_11] : memref<4x18x18xf32, #tpu.memory_space<vmem>>, vector<1x16x16xf32>
    %108 = vector.shape_cast %107 : vector<1x16x16xf32> to vector<16x16xf32>
    %c3 = arith.constant 3 : index
    %109 = memref.load %arg2[%c3] : memref<288xf32, #tpu.memory_space<smem>>
    %110 = vector.broadcast %109 : f32 to vector<16x16xf32>
    %111 = arith.mulf %110, %108 : vector<16x16xf32>
    %112 = arith.addf %76, %111 : vector<16x16xf32>
    %c39 = arith.constant 39 : index
    %113 = memref.load %arg2[%c39] : memref<288xf32, #tpu.memory_space<smem>>
    %114 = vector.broadcast %113 : f32 to vector<16x16xf32>
    %115 = arith.mulf %114, %108 : vector<16x16xf32>
    %116 = arith.addf %80, %115 : vector<16x16xf32>
    %c75 = arith.constant 75 : index
    %117 = memref.load %arg2[%c75] : memref<288xf32, #tpu.memory_space<smem>>
    %118 = vector.broadcast %117 : f32 to vector<16x16xf32>
    %119 = arith.mulf %118, %108 : vector<16x16xf32>
    %120 = arith.addf %84, %119 : vector<16x16xf32>
    %c111 = arith.constant 111 : index
    %121 = memref.load %arg2[%c111] : memref<288xf32, #tpu.memory_space<smem>>
    %122 = vector.broadcast %121 : f32 to vector<16x16xf32>
    %123 = arith.mulf %122, %108 : vector<16x16xf32>
    %124 = arith.addf %88, %123 : vector<16x16xf32>
    %c147 = arith.constant 147 : index
    %125 = memref.load %arg2[%c147] : memref<288xf32, #tpu.memory_space<smem>>
    %126 = vector.broadcast %125 : f32 to vector<16x16xf32>
    %127 = arith.mulf %126, %108 : vector<16x16xf32>
    %128 = arith.addf %92, %127 : vector<16x16xf32>
    %c183 = arith.constant 183 : index
    %129 = memref.load %arg2[%c183] : memref<288xf32, #tpu.memory_space<smem>>
    %130 = vector.broadcast %129 : f32 to vector<16x16xf32>
    %131 = arith.mulf %130, %108 : vector<16x16xf32>
    %132 = arith.addf %96, %131 : vector<16x16xf32>
    %c219 = arith.constant 219 : index
    %133 = memref.load %arg2[%c219] : memref<288xf32, #tpu.memory_space<smem>>
    %134 = vector.broadcast %133 : f32 to vector<16x16xf32>
    %135 = arith.mulf %134, %108 : vector<16x16xf32>
    %136 = arith.addf %100, %135 : vector<16x16xf32>
    %c255 = arith.constant 255 : index
    %137 = memref.load %arg2[%c255] : memref<288xf32, #tpu.memory_space<smem>>
    %138 = vector.broadcast %137 : f32 to vector<16x16xf32>
    %139 = arith.mulf %138, %108 : vector<16x16xf32>
    %140 = arith.addf %104, %139 : vector<16x16xf32>
    %c1_i32_12 = arith.constant 1 : i32
    %141 = arith.addi %4, %c1_i32_12 : i32
    %c0_13 = arith.constant 0 : index
    %142 = arith.index_cast %141 : i32 to index
    %c1_14 = arith.constant 1 : index
    %143 = vector.load %arg6[%c0_13, %142, %c1_14] : memref<4x18x18xf32, #tpu.memory_space<vmem>>, vector<1x16x16xf32>
    %144 = vector.shape_cast %143 : vector<1x16x16xf32> to vector<16x16xf32>
    %c4 = arith.constant 4 : index
    %145 = memref.load %arg2[%c4] : memref<288xf32, #tpu.memory_space<smem>>
    %146 = vector.broadcast %145 : f32 to vector<16x16xf32>
    %147 = arith.mulf %146, %144 : vector<16x16xf32>
    %148 = arith.addf %112, %147 : vector<16x16xf32>
    %c40 = arith.constant 40 : index
    %149 = memref.load %arg2[%c40] : memref<288xf32, #tpu.memory_space<smem>>
    %150 = vector.broadcast %149 : f32 to vector<16x16xf32>
    %151 = arith.mulf %150, %144 : vector<16x16xf32>
    %152 = arith.addf %116, %151 : vector<16x16xf32>
    %c76 = arith.constant 76 : index
    %153 = memref.load %arg2[%c76] : memref<288xf32, #tpu.memory_space<smem>>
    %154 = vector.broadcast %153 : f32 to vector<16x16xf32>
    %155 = arith.mulf %154, %144 : vector<16x16xf32>
    %156 = arith.addf %120, %155 : vector<16x16xf32>
    %c112 = arith.constant 112 : index
    %157 = memref.load %arg2[%c112] : memref<288xf32, #tpu.memory_space<smem>>
    %158 = vector.broadcast %157 : f32 to vector<16x16xf32>
    %159 = arith.mulf %158, %144 : vector<16x16xf32>
    %160 = arith.addf %124, %159 : vector<16x16xf32>
    %c148 = arith.constant 148 : index
    %161 = memref.load %arg2[%c148] : memref<288xf32, #tpu.memory_space<smem>>
    %162 = vector.broadcast %161 : f32 to vector<16x16xf32>
    %163 = arith.mulf %162, %144 : vector<16x16xf32>
    %164 = arith.addf %128, %163 : vector<16x16xf32>
    %c184 = arith.constant 184 : index
    %165 = memref.load %arg2[%c184] : memref<288xf32, #tpu.memory_space<smem>>
    %166 = vector.broadcast %165 : f32 to vector<16x16xf32>
    %167 = arith.mulf %166, %144 : vector<16x16xf32>
    %168 = arith.addf %132, %167 : vector<16x16xf32>
    %c220 = arith.constant 220 : index
    %169 = memref.load %arg2[%c220] : memref<288xf32, #tpu.memory_space<smem>>
    %170 = vector.broadcast %169 : f32 to vector<16x16xf32>
    %171 = arith.mulf %170, %144 : vector<16x16xf32>
    %172 = arith.addf %136, %171 : vector<16x16xf32>
    %c256 = arith.constant 256 : index
    %173 = memref.load %arg2[%c256] : memref<288xf32, #tpu.memory_space<smem>>
    %174 = vector.broadcast %173 : f32 to vector<16x16xf32>
    %175 = arith.mulf %174, %144 : vector<16x16xf32>
    %176 = arith.addf %140, %175 : vector<16x16xf32>
    %c1_i32_15 = arith.constant 1 : i32
    %177 = arith.addi %4, %c1_i32_15 : i32
    %c0_16 = arith.constant 0 : index
    %178 = arith.index_cast %177 : i32 to index
    %c2_17 = arith.constant 2 : index
    %179 = vector.load %arg6[%c0_16, %178, %c2_17] : memref<4x18x18xf32, #tpu.memory_space<vmem>>, vector<1x16x16xf32>
    %180 = vector.shape_cast %179 : vector<1x16x16xf32> to vector<16x16xf32>
    %c5 = arith.constant 5 : index
    %181 = memref.load %arg2[%c5] : memref<288xf32, #tpu.memory_space<smem>>
    %182 = vector.broadcast %181 : f32 to vector<16x16xf32>
    %183 = arith.mulf %182, %180 : vector<16x16xf32>
    %184 = arith.addf %148, %183 : vector<16x16xf32>
    %c41 = arith.constant 41 : index
    %185 = memref.load %arg2[%c41] : memref<288xf32, #tpu.memory_space<smem>>
    %186 = vector.broadcast %185 : f32 to vector<16x16xf32>
    %187 = arith.mulf %186, %180 : vector<16x16xf32>
    %188 = arith.addf %152, %187 : vector<16x16xf32>
    %c77 = arith.constant 77 : index
    %189 = memref.load %arg2[%c77] : memref<288xf32, #tpu.memory_space<smem>>
    %190 = vector.broadcast %189 : f32 to vector<16x16xf32>
    %191 = arith.mulf %190, %180 : vector<16x16xf32>
    %192 = arith.addf %156, %191 : vector<16x16xf32>
    %c113 = arith.constant 113 : index
    %193 = memref.load %arg2[%c113] : memref<288xf32, #tpu.memory_space<smem>>
    %194 = vector.broadcast %193 : f32 to vector<16x16xf32>
    %195 = arith.mulf %194, %180 : vector<16x16xf32>
    %196 = arith.addf %160, %195 : vector<16x16xf32>
    %c149 = arith.constant 149 : index
    %197 = memref.load %arg2[%c149] : memref<288xf32, #tpu.memory_space<smem>>
    %198 = vector.broadcast %197 : f32 to vector<16x16xf32>
    %199 = arith.mulf %198, %180 : vector<16x16xf32>
    %200 = arith.addf %164, %199 : vector<16x16xf32>
    %c185 = arith.constant 185 : index
    %201 = memref.load %arg2[%c185] : memref<288xf32, #tpu.memory_space<smem>>
    %202 = vector.broadcast %201 : f32 to vector<16x16xf32>
    %203 = arith.mulf %202, %180 : vector<16x16xf32>
    %204 = arith.addf %168, %203 : vector<16x16xf32>
    %c221 = arith.constant 221 : index
    %205 = memref.load %arg2[%c221] : memref<288xf32, #tpu.memory_space<smem>>
    %206 = vector.broadcast %205 : f32 to vector<16x16xf32>
    %207 = arith.mulf %206, %180 : vector<16x16xf32>
    %208 = arith.addf %172, %207 : vector<16x16xf32>
    %c257 = arith.constant 257 : index
    %209 = memref.load %arg2[%c257] : memref<288xf32, #tpu.memory_space<smem>>
    %210 = vector.broadcast %209 : f32 to vector<16x16xf32>
    %211 = arith.mulf %210, %180 : vector<16x16xf32>
    %212 = arith.addf %176, %211 : vector<16x16xf32>
    %c2_i32 = arith.constant 2 : i32
    %213 = arith.addi %4, %c2_i32 : i32
    %c0_18 = arith.constant 0 : index
    %214 = arith.index_cast %213 : i32 to index
    %c0_19 = arith.constant 0 : index
    %215 = vector.load %arg6[%c0_18, %214, %c0_19] : memref<4x18x18xf32, #tpu.memory_space<vmem>>, vector<1x16x16xf32>
    %216 = vector.shape_cast %215 : vector<1x16x16xf32> to vector<16x16xf32>
    %c6 = arith.constant 6 : index
    %217 = memref.load %arg2[%c6] : memref<288xf32, #tpu.memory_space<smem>>
    %218 = vector.broadcast %217 : f32 to vector<16x16xf32>
    %219 = arith.mulf %218, %216 : vector<16x16xf32>
    %220 = arith.addf %184, %219 : vector<16x16xf32>
    %c42 = arith.constant 42 : index
    %221 = memref.load %arg2[%c42] : memref<288xf32, #tpu.memory_space<smem>>
    %222 = vector.broadcast %221 : f32 to vector<16x16xf32>
    %223 = arith.mulf %222, %216 : vector<16x16xf32>
    %224 = arith.addf %188, %223 : vector<16x16xf32>
    %c78 = arith.constant 78 : index
    %225 = memref.load %arg2[%c78] : memref<288xf32, #tpu.memory_space<smem>>
    %226 = vector.broadcast %225 : f32 to vector<16x16xf32>
    %227 = arith.mulf %226, %216 : vector<16x16xf32>
    %228 = arith.addf %192, %227 : vector<16x16xf32>
    %c114 = arith.constant 114 : index
    %229 = memref.load %arg2[%c114] : memref<288xf32, #tpu.memory_space<smem>>
    %230 = vector.broadcast %229 : f32 to vector<16x16xf32>
    %231 = arith.mulf %230, %216 : vector<16x16xf32>
    %232 = arith.addf %196, %231 : vector<16x16xf32>
    %c150 = arith.constant 150 : index
    %233 = memref.load %arg2[%c150] : memref<288xf32, #tpu.memory_space<smem>>
    %234 = vector.broadcast %233 : f32 to vector<16x16xf32>
    %235 = arith.mulf %234, %216 : vector<16x16xf32>
    %236 = arith.addf %200, %235 : vector<16x16xf32>
    %c186 = arith.constant 186 : index
    %237 = memref.load %arg2[%c186] : memref<288xf32, #tpu.memory_space<smem>>
    %238 = vector.broadcast %237 : f32 to vector<16x16xf32>
    %239 = arith.mulf %238, %216 : vector<16x16xf32>
    %240 = arith.addf %204, %239 : vector<16x16xf32>
    %c222 = arith.constant 222 : index
    %241 = memref.load %arg2[%c222] : memref<288xf32, #tpu.memory_space<smem>>
    %242 = vector.broadcast %241 : f32 to vector<16x16xf32>
    %243 = arith.mulf %242, %216 : vector<16x16xf32>
    %244 = arith.addf %208, %243 : vector<16x16xf32>
    %c258 = arith.constant 258 : index
    %245 = memref.load %arg2[%c258] : memref<288xf32, #tpu.memory_space<smem>>
    %246 = vector.broadcast %245 : f32 to vector<16x16xf32>
    %247 = arith.mulf %246, %216 : vector<16x16xf32>
    %248 = arith.addf %212, %247 : vector<16x16xf32>
    %c2_i32_20 = arith.constant 2 : i32
    %249 = arith.addi %4, %c2_i32_20 : i32
    %c0_21 = arith.constant 0 : index
    %250 = arith.index_cast %249 : i32 to index
    %c1_22 = arith.constant 1 : index
    %251 = vector.load %arg6[%c0_21, %250, %c1_22] : memref<4x18x18xf32, #tpu.memory_space<vmem>>, vector<1x16x16xf32>
    %252 = vector.shape_cast %251 : vector<1x16x16xf32> to vector<16x16xf32>
    %c7 = arith.constant 7 : index
    %253 = memref.load %arg2[%c7] : memref<288xf32, #tpu.memory_space<smem>>
    %254 = vector.broadcast %253 : f32 to vector<16x16xf32>
    %255 = arith.mulf %254, %252 : vector<16x16xf32>
    %256 = arith.addf %220, %255 : vector<16x16xf32>
    %c43 = arith.constant 43 : index
    %257 = memref.load %arg2[%c43] : memref<288xf32, #tpu.memory_space<smem>>
    %258 = vector.broadcast %257 : f32 to vector<16x16xf32>
    %259 = arith.mulf %258, %252 : vector<16x16xf32>
    %260 = arith.addf %224, %259 : vector<16x16xf32>
    %c79 = arith.constant 79 : index
    %261 = memref.load %arg2[%c79] : memref<288xf32, #tpu.memory_space<smem>>
    %262 = vector.broadcast %261 : f32 to vector<16x16xf32>
    %263 = arith.mulf %262, %252 : vector<16x16xf32>
    %264 = arith.addf %228, %263 : vector<16x16xf32>
    %c115 = arith.constant 115 : index
    %265 = memref.load %arg2[%c115] : memref<288xf32, #tpu.memory_space<smem>>
    %266 = vector.broadcast %265 : f32 to vector<16x16xf32>
    %267 = arith.mulf %266, %252 : vector<16x16xf32>
    %268 = arith.addf %232, %267 : vector<16x16xf32>
    %c151 = arith.constant 151 : index
    %269 = memref.load %arg2[%c151] : memref<288xf32, #tpu.memory_space<smem>>
    %270 = vector.broadcast %269 : f32 to vector<16x16xf32>
    %271 = arith.mulf %270, %252 : vector<16x16xf32>
    %272 = arith.addf %236, %271 : vector<16x16xf32>
    %c187 = arith.constant 187 : index
    %273 = memref.load %arg2[%c187] : memref<288xf32, #tpu.memory_space<smem>>
    %274 = vector.broadcast %273 : f32 to vector<16x16xf32>
    %275 = arith.mulf %274, %252 : vector<16x16xf32>
    %276 = arith.addf %240, %275 : vector<16x16xf32>
    %c223 = arith.constant 223 : index
    %277 = memref.load %arg2[%c223] : memref<288xf32, #tpu.memory_space<smem>>
    %278 = vector.broadcast %277 : f32 to vector<16x16xf32>
    %279 = arith.mulf %278, %252 : vector<16x16xf32>
    %280 = arith.addf %244, %279 : vector<16x16xf32>
    %c259 = arith.constant 259 : index
    %281 = memref.load %arg2[%c259] : memref<288xf32, #tpu.memory_space<smem>>
    %282 = vector.broadcast %281 : f32 to vector<16x16xf32>
    %283 = arith.mulf %282, %252 : vector<16x16xf32>
    %284 = arith.addf %248, %283 : vector<16x16xf32>
    %c2_i32_23 = arith.constant 2 : i32
    %285 = arith.addi %4, %c2_i32_23 : i32
    %c0_24 = arith.constant 0 : index
    %286 = arith.index_cast %285 : i32 to index
    %c2_25 = arith.constant 2 : index
    %287 = vector.load %arg6[%c0_24, %286, %c2_25] : memref<4x18x18xf32, #tpu.memory_space<vmem>>, vector<1x16x16xf32>
    %288 = vector.shape_cast %287 : vector<1x16x16xf32> to vector<16x16xf32>
    %c8 = arith.constant 8 : index
    %289 = memref.load %arg2[%c8] : memref<288xf32, #tpu.memory_space<smem>>
    %290 = vector.broadcast %289 : f32 to vector<16x16xf32>
    %291 = arith.mulf %290, %288 : vector<16x16xf32>
    %292 = arith.addf %256, %291 : vector<16x16xf32>
    %c44 = arith.constant 44 : index
    %293 = memref.load %arg2[%c44] : memref<288xf32, #tpu.memory_space<smem>>
    %294 = vector.broadcast %293 : f32 to vector<16x16xf32>
    %295 = arith.mulf %294, %288 : vector<16x16xf32>
    %296 = arith.addf %260, %295 : vector<16x16xf32>
    %c80 = arith.constant 80 : index
    %297 = memref.load %arg2[%c80] : memref<288xf32, #tpu.memory_space<smem>>
    %298 = vector.broadcast %297 : f32 to vector<16x16xf32>
    %299 = arith.mulf %298, %288 : vector<16x16xf32>
    %300 = arith.addf %264, %299 : vector<16x16xf32>
    %c116 = arith.constant 116 : index
    %301 = memref.load %arg2[%c116] : memref<288xf32, #tpu.memory_space<smem>>
    %302 = vector.broadcast %301 : f32 to vector<16x16xf32>
    %303 = arith.mulf %302, %288 : vector<16x16xf32>
    %304 = arith.addf %268, %303 : vector<16x16xf32>
    %c152 = arith.constant 152 : index
    %305 = memref.load %arg2[%c152] : memref<288xf32, #tpu.memory_space<smem>>
    %306 = vector.broadcast %305 : f32 to vector<16x16xf32>
    %307 = arith.mulf %306, %288 : vector<16x16xf32>
    %308 = arith.addf %272, %307 : vector<16x16xf32>
    %c188 = arith.constant 188 : index
    %309 = memref.load %arg2[%c188] : memref<288xf32, #tpu.memory_space<smem>>
    %310 = vector.broadcast %309 : f32 to vector<16x16xf32>
    %311 = arith.mulf %310, %288 : vector<16x16xf32>
    %312 = arith.addf %276, %311 : vector<16x16xf32>
    %c224 = arith.constant 224 : index
    %313 = memref.load %arg2[%c224] : memref<288xf32, #tpu.memory_space<smem>>
    %314 = vector.broadcast %313 : f32 to vector<16x16xf32>
    %315 = arith.mulf %314, %288 : vector<16x16xf32>
    %316 = arith.addf %280, %315 : vector<16x16xf32>
    %c260 = arith.constant 260 : index
    %317 = memref.load %arg2[%c260] : memref<288xf32, #tpu.memory_space<smem>>
    %318 = vector.broadcast %317 : f32 to vector<16x16xf32>
    %319 = arith.mulf %318, %288 : vector<16x16xf32>
    %320 = arith.addf %284, %319 : vector<16x16xf32>
    %c0_i32_26 = arith.constant 0 : i32
    %321 = arith.addi %4, %c0_i32_26 : i32
    %c1_27 = arith.constant 1 : index
    %322 = arith.index_cast %321 : i32 to index
    %c0_28 = arith.constant 0 : index
    %323 = vector.load %arg6[%c1_27, %322, %c0_28] : memref<4x18x18xf32, #tpu.memory_space<vmem>>, vector<1x16x16xf32>
    %324 = vector.shape_cast %323 : vector<1x16x16xf32> to vector<16x16xf32>
    %c9 = arith.constant 9 : index
    %325 = memref.load %arg2[%c9] : memref<288xf32, #tpu.memory_space<smem>>
    %326 = vector.broadcast %325 : f32 to vector<16x16xf32>
    %327 = arith.mulf %326, %324 : vector<16x16xf32>
    %328 = arith.addf %292, %327 : vector<16x16xf32>
    %c45 = arith.constant 45 : index
    %329 = memref.load %arg2[%c45] : memref<288xf32, #tpu.memory_space<smem>>
    %330 = vector.broadcast %329 : f32 to vector<16x16xf32>
    %331 = arith.mulf %330, %324 : vector<16x16xf32>
    %332 = arith.addf %296, %331 : vector<16x16xf32>
    %c81 = arith.constant 81 : index
    %333 = memref.load %arg2[%c81] : memref<288xf32, #tpu.memory_space<smem>>
    %334 = vector.broadcast %333 : f32 to vector<16x16xf32>
    %335 = arith.mulf %334, %324 : vector<16x16xf32>
    %336 = arith.addf %300, %335 : vector<16x16xf32>
    %c117 = arith.constant 117 : index
    %337 = memref.load %arg2[%c117] : memref<288xf32, #tpu.memory_space<smem>>
    %338 = vector.broadcast %337 : f32 to vector<16x16xf32>
    %339 = arith.mulf %338, %324 : vector<16x16xf32>
    %340 = arith.addf %304, %339 : vector<16x16xf32>
    %c153 = arith.constant 153 : index
    %341 = memref.load %arg2[%c153] : memref<288xf32, #tpu.memory_space<smem>>
    %342 = vector.broadcast %341 : f32 to vector<16x16xf32>
    %343 = arith.mulf %342, %324 : vector<16x16xf32>
    %344 = arith.addf %308, %343 : vector<16x16xf32>
    %c189 = arith.constant 189 : index
    %345 = memref.load %arg2[%c189] : memref<288xf32, #tpu.memory_space<smem>>
    %346 = vector.broadcast %345 : f32 to vector<16x16xf32>
    %347 = arith.mulf %346, %324 : vector<16x16xf32>
    %348 = arith.addf %312, %347 : vector<16x16xf32>
    %c225 = arith.constant 225 : index
    %349 = memref.load %arg2[%c225] : memref<288xf32, #tpu.memory_space<smem>>
    %350 = vector.broadcast %349 : f32 to vector<16x16xf32>
    %351 = arith.mulf %350, %324 : vector<16x16xf32>
    %352 = arith.addf %316, %351 : vector<16x16xf32>
    %c261 = arith.constant 261 : index
    %353 = memref.load %arg2[%c261] : memref<288xf32, #tpu.memory_space<smem>>
    %354 = vector.broadcast %353 : f32 to vector<16x16xf32>
    %355 = arith.mulf %354, %324 : vector<16x16xf32>
    %356 = arith.addf %320, %355 : vector<16x16xf32>
    %c0_i32_29 = arith.constant 0 : i32
    %357 = arith.addi %4, %c0_i32_29 : i32
    %c1_30 = arith.constant 1 : index
    %358 = arith.index_cast %357 : i32 to index
    %c1_31 = arith.constant 1 : index
    %359 = vector.load %arg6[%c1_30, %358, %c1_31] : memref<4x18x18xf32, #tpu.memory_space<vmem>>, vector<1x16x16xf32>
    %360 = vector.shape_cast %359 : vector<1x16x16xf32> to vector<16x16xf32>
    %c10 = arith.constant 10 : index
    %361 = memref.load %arg2[%c10] : memref<288xf32, #tpu.memory_space<smem>>
    %362 = vector.broadcast %361 : f32 to vector<16x16xf32>
    %363 = arith.mulf %362, %360 : vector<16x16xf32>
    %364 = arith.addf %328, %363 : vector<16x16xf32>
    %c46 = arith.constant 46 : index
    %365 = memref.load %arg2[%c46] : memref<288xf32, #tpu.memory_space<smem>>
    %366 = vector.broadcast %365 : f32 to vector<16x16xf32>
    %367 = arith.mulf %366, %360 : vector<16x16xf32>
    %368 = arith.addf %332, %367 : vector<16x16xf32>
    %c82 = arith.constant 82 : index
    %369 = memref.load %arg2[%c82] : memref<288xf32, #tpu.memory_space<smem>>
    %370 = vector.broadcast %369 : f32 to vector<16x16xf32>
    %371 = arith.mulf %370, %360 : vector<16x16xf32>
    %372 = arith.addf %336, %371 : vector<16x16xf32>
    %c118 = arith.constant 118 : index
    %373 = memref.load %arg2[%c118] : memref<288xf32, #tpu.memory_space<smem>>
    %374 = vector.broadcast %373 : f32 to vector<16x16xf32>
    %375 = arith.mulf %374, %360 : vector<16x16xf32>
    %376 = arith.addf %340, %375 : vector<16x16xf32>
    %c154 = arith.constant 154 : index
    %377 = memref.load %arg2[%c154] : memref<288xf32, #tpu.memory_space<smem>>
    %378 = vector.broadcast %377 : f32 to vector<16x16xf32>
    %379 = arith.mulf %378, %360 : vector<16x16xf32>
    %380 = arith.addf %344, %379 : vector<16x16xf32>
    %c190 = arith.constant 190 : index
    %381 = memref.load %arg2[%c190] : memref<288xf32, #tpu.memory_space<smem>>
    %382 = vector.broadcast %381 : f32 to vector<16x16xf32>
    %383 = arith.mulf %382, %360 : vector<16x16xf32>
    %384 = arith.addf %348, %383 : vector<16x16xf32>
    %c226 = arith.constant 226 : index
    %385 = memref.load %arg2[%c226] : memref<288xf32, #tpu.memory_space<smem>>
    %386 = vector.broadcast %385 : f32 to vector<16x16xf32>
    %387 = arith.mulf %386, %360 : vector<16x16xf32>
    %388 = arith.addf %352, %387 : vector<16x16xf32>
    %c262 = arith.constant 262 : index
    %389 = memref.load %arg2[%c262] : memref<288xf32, #tpu.memory_space<smem>>
    %390 = vector.broadcast %389 : f32 to vector<16x16xf32>
    %391 = arith.mulf %390, %360 : vector<16x16xf32>
    %392 = arith.addf %356, %391 : vector<16x16xf32>
    %c0_i32_32 = arith.constant 0 : i32
    %393 = arith.addi %4, %c0_i32_32 : i32
    %c1_33 = arith.constant 1 : index
    %394 = arith.index_cast %393 : i32 to index
    %c2_34 = arith.constant 2 : index
    %395 = vector.load %arg6[%c1_33, %394, %c2_34] : memref<4x18x18xf32, #tpu.memory_space<vmem>>, vector<1x16x16xf32>
    %396 = vector.shape_cast %395 : vector<1x16x16xf32> to vector<16x16xf32>
    %c11 = arith.constant 11 : index
    %397 = memref.load %arg2[%c11] : memref<288xf32, #tpu.memory_space<smem>>
    %398 = vector.broadcast %397 : f32 to vector<16x16xf32>
    %399 = arith.mulf %398, %396 : vector<16x16xf32>
    %400 = arith.addf %364, %399 : vector<16x16xf32>
    %c47 = arith.constant 47 : index
    %401 = memref.load %arg2[%c47] : memref<288xf32, #tpu.memory_space<smem>>
    %402 = vector.broadcast %401 : f32 to vector<16x16xf32>
    %403 = arith.mulf %402, %396 : vector<16x16xf32>
    %404 = arith.addf %368, %403 : vector<16x16xf32>
    %c83 = arith.constant 83 : index
    %405 = memref.load %arg2[%c83] : memref<288xf32, #tpu.memory_space<smem>>
    %406 = vector.broadcast %405 : f32 to vector<16x16xf32>
    %407 = arith.mulf %406, %396 : vector<16x16xf32>
    %408 = arith.addf %372, %407 : vector<16x16xf32>
    %c119 = arith.constant 119 : index
    %409 = memref.load %arg2[%c119] : memref<288xf32, #tpu.memory_space<smem>>
    %410 = vector.broadcast %409 : f32 to vector<16x16xf32>
    %411 = arith.mulf %410, %396 : vector<16x16xf32>
    %412 = arith.addf %376, %411 : vector<16x16xf32>
    %c155 = arith.constant 155 : index
    %413 = memref.load %arg2[%c155] : memref<288xf32, #tpu.memory_space<smem>>
    %414 = vector.broadcast %413 : f32 to vector<16x16xf32>
    %415 = arith.mulf %414, %396 : vector<16x16xf32>
    %416 = arith.addf %380, %415 : vector<16x16xf32>
    %c191 = arith.constant 191 : index
    %417 = memref.load %arg2[%c191] : memref<288xf32, #tpu.memory_space<smem>>
    %418 = vector.broadcast %417 : f32 to vector<16x16xf32>
    %419 = arith.mulf %418, %396 : vector<16x16xf32>
    %420 = arith.addf %384, %419 : vector<16x16xf32>
    %c227 = arith.constant 227 : index
    %421 = memref.load %arg2[%c227] : memref<288xf32, #tpu.memory_space<smem>>
    %422 = vector.broadcast %421 : f32 to vector<16x16xf32>
    %423 = arith.mulf %422, %396 : vector<16x16xf32>
    %424 = arith.addf %388, %423 : vector<16x16xf32>
    %c263 = arith.constant 263 : index
    %425 = memref.load %arg2[%c263] : memref<288xf32, #tpu.memory_space<smem>>
    %426 = vector.broadcast %425 : f32 to vector<16x16xf32>
    %427 = arith.mulf %426, %396 : vector<16x16xf32>
    %428 = arith.addf %392, %427 : vector<16x16xf32>
    %c1_i32_35 = arith.constant 1 : i32
    %429 = arith.addi %4, %c1_i32_35 : i32
    %c1_36 = arith.constant 1 : index
    %430 = arith.index_cast %429 : i32 to index
    %c0_37 = arith.constant 0 : index
    %431 = vector.load %arg6[%c1_36, %430, %c0_37] : memref<4x18x18xf32, #tpu.memory_space<vmem>>, vector<1x16x16xf32>
    %432 = vector.shape_cast %431 : vector<1x16x16xf32> to vector<16x16xf32>
    %c12 = arith.constant 12 : index
    %433 = memref.load %arg2[%c12] : memref<288xf32, #tpu.memory_space<smem>>
    %434 = vector.broadcast %433 : f32 to vector<16x16xf32>
    %435 = arith.mulf %434, %432 : vector<16x16xf32>
    %436 = arith.addf %400, %435 : vector<16x16xf32>
    %c48 = arith.constant 48 : index
    %437 = memref.load %arg2[%c48] : memref<288xf32, #tpu.memory_space<smem>>
    %438 = vector.broadcast %437 : f32 to vector<16x16xf32>
    %439 = arith.mulf %438, %432 : vector<16x16xf32>
    %440 = arith.addf %404, %439 : vector<16x16xf32>
    %c84 = arith.constant 84 : index
    %441 = memref.load %arg2[%c84] : memref<288xf32, #tpu.memory_space<smem>>
    %442 = vector.broadcast %441 : f32 to vector<16x16xf32>
    %443 = arith.mulf %442, %432 : vector<16x16xf32>
    %444 = arith.addf %408, %443 : vector<16x16xf32>
    %c120 = arith.constant 120 : index
    %445 = memref.load %arg2[%c120] : memref<288xf32, #tpu.memory_space<smem>>
    %446 = vector.broadcast %445 : f32 to vector<16x16xf32>
    %447 = arith.mulf %446, %432 : vector<16x16xf32>
    %448 = arith.addf %412, %447 : vector<16x16xf32>
    %c156 = arith.constant 156 : index
    %449 = memref.load %arg2[%c156] : memref<288xf32, #tpu.memory_space<smem>>
    %450 = vector.broadcast %449 : f32 to vector<16x16xf32>
    %451 = arith.mulf %450, %432 : vector<16x16xf32>
    %452 = arith.addf %416, %451 : vector<16x16xf32>
    %c192 = arith.constant 192 : index
    %453 = memref.load %arg2[%c192] : memref<288xf32, #tpu.memory_space<smem>>
    %454 = vector.broadcast %453 : f32 to vector<16x16xf32>
    %455 = arith.mulf %454, %432 : vector<16x16xf32>
    %456 = arith.addf %420, %455 : vector<16x16xf32>
    %c228 = arith.constant 228 : index
    %457 = memref.load %arg2[%c228] : memref<288xf32, #tpu.memory_space<smem>>
    %458 = vector.broadcast %457 : f32 to vector<16x16xf32>
    %459 = arith.mulf %458, %432 : vector<16x16xf32>
    %460 = arith.addf %424, %459 : vector<16x16xf32>
    %c264 = arith.constant 264 : index
    %461 = memref.load %arg2[%c264] : memref<288xf32, #tpu.memory_space<smem>>
    %462 = vector.broadcast %461 : f32 to vector<16x16xf32>
    %463 = arith.mulf %462, %432 : vector<16x16xf32>
    %464 = arith.addf %428, %463 : vector<16x16xf32>
    %c1_i32_38 = arith.constant 1 : i32
    %465 = arith.addi %4, %c1_i32_38 : i32
    %c1_39 = arith.constant 1 : index
    %466 = arith.index_cast %465 : i32 to index
    %c1_40 = arith.constant 1 : index
    %467 = vector.load %arg6[%c1_39, %466, %c1_40] : memref<4x18x18xf32, #tpu.memory_space<vmem>>, vector<1x16x16xf32>
    %468 = vector.shape_cast %467 : vector<1x16x16xf32> to vector<16x16xf32>
    %c13 = arith.constant 13 : index
    %469 = memref.load %arg2[%c13] : memref<288xf32, #tpu.memory_space<smem>>
    %470 = vector.broadcast %469 : f32 to vector<16x16xf32>
    %471 = arith.mulf %470, %468 : vector<16x16xf32>
    %472 = arith.addf %436, %471 : vector<16x16xf32>
    %c49 = arith.constant 49 : index
    %473 = memref.load %arg2[%c49] : memref<288xf32, #tpu.memory_space<smem>>
    %474 = vector.broadcast %473 : f32 to vector<16x16xf32>
    %475 = arith.mulf %474, %468 : vector<16x16xf32>
    %476 = arith.addf %440, %475 : vector<16x16xf32>
    %c85 = arith.constant 85 : index
    %477 = memref.load %arg2[%c85] : memref<288xf32, #tpu.memory_space<smem>>
    %478 = vector.broadcast %477 : f32 to vector<16x16xf32>
    %479 = arith.mulf %478, %468 : vector<16x16xf32>
    %480 = arith.addf %444, %479 : vector<16x16xf32>
    %c121 = arith.constant 121 : index
    %481 = memref.load %arg2[%c121] : memref<288xf32, #tpu.memory_space<smem>>
    %482 = vector.broadcast %481 : f32 to vector<16x16xf32>
    %483 = arith.mulf %482, %468 : vector<16x16xf32>
    %484 = arith.addf %448, %483 : vector<16x16xf32>
    %c157 = arith.constant 157 : index
    %485 = memref.load %arg2[%c157] : memref<288xf32, #tpu.memory_space<smem>>
    %486 = vector.broadcast %485 : f32 to vector<16x16xf32>
    %487 = arith.mulf %486, %468 : vector<16x16xf32>
    %488 = arith.addf %452, %487 : vector<16x16xf32>
    %c193 = arith.constant 193 : index
    %489 = memref.load %arg2[%c193] : memref<288xf32, #tpu.memory_space<smem>>
    %490 = vector.broadcast %489 : f32 to vector<16x16xf32>
    %491 = arith.mulf %490, %468 : vector<16x16xf32>
    %492 = arith.addf %456, %491 : vector<16x16xf32>
    %c229 = arith.constant 229 : index
    %493 = memref.load %arg2[%c229] : memref<288xf32, #tpu.memory_space<smem>>
    %494 = vector.broadcast %493 : f32 to vector<16x16xf32>
    %495 = arith.mulf %494, %468 : vector<16x16xf32>
    %496 = arith.addf %460, %495 : vector<16x16xf32>
    %c265 = arith.constant 265 : index
    %497 = memref.load %arg2[%c265] : memref<288xf32, #tpu.memory_space<smem>>
    %498 = vector.broadcast %497 : f32 to vector<16x16xf32>
    %499 = arith.mulf %498, %468 : vector<16x16xf32>
    %500 = arith.addf %464, %499 : vector<16x16xf32>
    %c1_i32_41 = arith.constant 1 : i32
    %501 = arith.addi %4, %c1_i32_41 : i32
    %c1_42 = arith.constant 1 : index
    %502 = arith.index_cast %501 : i32 to index
    %c2_43 = arith.constant 2 : index
    %503 = vector.load %arg6[%c1_42, %502, %c2_43] : memref<4x18x18xf32, #tpu.memory_space<vmem>>, vector<1x16x16xf32>
    %504 = vector.shape_cast %503 : vector<1x16x16xf32> to vector<16x16xf32>
    %c14 = arith.constant 14 : index
    %505 = memref.load %arg2[%c14] : memref<288xf32, #tpu.memory_space<smem>>
    %506 = vector.broadcast %505 : f32 to vector<16x16xf32>
    %507 = arith.mulf %506, %504 : vector<16x16xf32>
    %508 = arith.addf %472, %507 : vector<16x16xf32>
    %c50 = arith.constant 50 : index
    %509 = memref.load %arg2[%c50] : memref<288xf32, #tpu.memory_space<smem>>
    %510 = vector.broadcast %509 : f32 to vector<16x16xf32>
    %511 = arith.mulf %510, %504 : vector<16x16xf32>
    %512 = arith.addf %476, %511 : vector<16x16xf32>
    %c86 = arith.constant 86 : index
    %513 = memref.load %arg2[%c86] : memref<288xf32, #tpu.memory_space<smem>>
    %514 = vector.broadcast %513 : f32 to vector<16x16xf32>
    %515 = arith.mulf %514, %504 : vector<16x16xf32>
    %516 = arith.addf %480, %515 : vector<16x16xf32>
    %c122 = arith.constant 122 : index
    %517 = memref.load %arg2[%c122] : memref<288xf32, #tpu.memory_space<smem>>
    %518 = vector.broadcast %517 : f32 to vector<16x16xf32>
    %519 = arith.mulf %518, %504 : vector<16x16xf32>
    %520 = arith.addf %484, %519 : vector<16x16xf32>
    %c158 = arith.constant 158 : index
    %521 = memref.load %arg2[%c158] : memref<288xf32, #tpu.memory_space<smem>>
    %522 = vector.broadcast %521 : f32 to vector<16x16xf32>
    %523 = arith.mulf %522, %504 : vector<16x16xf32>
    %524 = arith.addf %488, %523 : vector<16x16xf32>
    %c194 = arith.constant 194 : index
    %525 = memref.load %arg2[%c194] : memref<288xf32, #tpu.memory_space<smem>>
    %526 = vector.broadcast %525 : f32 to vector<16x16xf32>
    %527 = arith.mulf %526, %504 : vector<16x16xf32>
    %528 = arith.addf %492, %527 : vector<16x16xf32>
    %c230 = arith.constant 230 : index
    %529 = memref.load %arg2[%c230] : memref<288xf32, #tpu.memory_space<smem>>
    %530 = vector.broadcast %529 : f32 to vector<16x16xf32>
    %531 = arith.mulf %530, %504 : vector<16x16xf32>
    %532 = arith.addf %496, %531 : vector<16x16xf32>
    %c266 = arith.constant 266 : index
    %533 = memref.load %arg2[%c266] : memref<288xf32, #tpu.memory_space<smem>>
    %534 = vector.broadcast %533 : f32 to vector<16x16xf32>
    %535 = arith.mulf %534, %504 : vector<16x16xf32>
    %536 = arith.addf %500, %535 : vector<16x16xf32>
    %c2_i32_44 = arith.constant 2 : i32
    %537 = arith.addi %4, %c2_i32_44 : i32
    %c1_45 = arith.constant 1 : index
    %538 = arith.index_cast %537 : i32 to index
    %c0_46 = arith.constant 0 : index
    %539 = vector.load %arg6[%c1_45, %538, %c0_46] : memref<4x18x18xf32, #tpu.memory_space<vmem>>, vector<1x16x16xf32>
    %540 = vector.shape_cast %539 : vector<1x16x16xf32> to vector<16x16xf32>
    %c15 = arith.constant 15 : index
    %541 = memref.load %arg2[%c15] : memref<288xf32, #tpu.memory_space<smem>>
    %542 = vector.broadcast %541 : f32 to vector<16x16xf32>
    %543 = arith.mulf %542, %540 : vector<16x16xf32>
    %544 = arith.addf %508, %543 : vector<16x16xf32>
    %c51 = arith.constant 51 : index
    %545 = memref.load %arg2[%c51] : memref<288xf32, #tpu.memory_space<smem>>
    %546 = vector.broadcast %545 : f32 to vector<16x16xf32>
    %547 = arith.mulf %546, %540 : vector<16x16xf32>
    %548 = arith.addf %512, %547 : vector<16x16xf32>
    %c87 = arith.constant 87 : index
    %549 = memref.load %arg2[%c87] : memref<288xf32, #tpu.memory_space<smem>>
    %550 = vector.broadcast %549 : f32 to vector<16x16xf32>
    %551 = arith.mulf %550, %540 : vector<16x16xf32>
    %552 = arith.addf %516, %551 : vector<16x16xf32>
    %c123 = arith.constant 123 : index
    %553 = memref.load %arg2[%c123] : memref<288xf32, #tpu.memory_space<smem>>
    %554 = vector.broadcast %553 : f32 to vector<16x16xf32>
    %555 = arith.mulf %554, %540 : vector<16x16xf32>
    %556 = arith.addf %520, %555 : vector<16x16xf32>
    %c159 = arith.constant 159 : index
    %557 = memref.load %arg2[%c159] : memref<288xf32, #tpu.memory_space<smem>>
    %558 = vector.broadcast %557 : f32 to vector<16x16xf32>
    %559 = arith.mulf %558, %540 : vector<16x16xf32>
    %560 = arith.addf %524, %559 : vector<16x16xf32>
    %c195 = arith.constant 195 : index
    %561 = memref.load %arg2[%c195] : memref<288xf32, #tpu.memory_space<smem>>
    %562 = vector.broadcast %561 : f32 to vector<16x16xf32>
    %563 = arith.mulf %562, %540 : vector<16x16xf32>
    %564 = arith.addf %528, %563 : vector<16x16xf32>
    %c231 = arith.constant 231 : index
    %565 = memref.load %arg2[%c231] : memref<288xf32, #tpu.memory_space<smem>>
    %566 = vector.broadcast %565 : f32 to vector<16x16xf32>
    %567 = arith.mulf %566, %540 : vector<16x16xf32>
    %568 = arith.addf %532, %567 : vector<16x16xf32>
    %c267 = arith.constant 267 : index
    %569 = memref.load %arg2[%c267] : memref<288xf32, #tpu.memory_space<smem>>
    %570 = vector.broadcast %569 : f32 to vector<16x16xf32>
    %571 = arith.mulf %570, %540 : vector<16x16xf32>
    %572 = arith.addf %536, %571 : vector<16x16xf32>
    %c2_i32_47 = arith.constant 2 : i32
    %573 = arith.addi %4, %c2_i32_47 : i32
    %c1_48 = arith.constant 1 : index
    %574 = arith.index_cast %573 : i32 to index
    %c1_49 = arith.constant 1 : index
    %575 = vector.load %arg6[%c1_48, %574, %c1_49] : memref<4x18x18xf32, #tpu.memory_space<vmem>>, vector<1x16x16xf32>
    %576 = vector.shape_cast %575 : vector<1x16x16xf32> to vector<16x16xf32>
    %c16 = arith.constant 16 : index
    %577 = memref.load %arg2[%c16] : memref<288xf32, #tpu.memory_space<smem>>
    %578 = vector.broadcast %577 : f32 to vector<16x16xf32>
    %579 = arith.mulf %578, %576 : vector<16x16xf32>
    %580 = arith.addf %544, %579 : vector<16x16xf32>
    %c52 = arith.constant 52 : index
    %581 = memref.load %arg2[%c52] : memref<288xf32, #tpu.memory_space<smem>>
    %582 = vector.broadcast %581 : f32 to vector<16x16xf32>
    %583 = arith.mulf %582, %576 : vector<16x16xf32>
    %584 = arith.addf %548, %583 : vector<16x16xf32>
    %c88 = arith.constant 88 : index
    %585 = memref.load %arg2[%c88] : memref<288xf32, #tpu.memory_space<smem>>
    %586 = vector.broadcast %585 : f32 to vector<16x16xf32>
    %587 = arith.mulf %586, %576 : vector<16x16xf32>
    %588 = arith.addf %552, %587 : vector<16x16xf32>
    %c124 = arith.constant 124 : index
    %589 = memref.load %arg2[%c124] : memref<288xf32, #tpu.memory_space<smem>>
    %590 = vector.broadcast %589 : f32 to vector<16x16xf32>
    %591 = arith.mulf %590, %576 : vector<16x16xf32>
    %592 = arith.addf %556, %591 : vector<16x16xf32>
    %c160 = arith.constant 160 : index
    %593 = memref.load %arg2[%c160] : memref<288xf32, #tpu.memory_space<smem>>
    %594 = vector.broadcast %593 : f32 to vector<16x16xf32>
    %595 = arith.mulf %594, %576 : vector<16x16xf32>
    %596 = arith.addf %560, %595 : vector<16x16xf32>
    %c196 = arith.constant 196 : index
    %597 = memref.load %arg2[%c196] : memref<288xf32, #tpu.memory_space<smem>>
    %598 = vector.broadcast %597 : f32 to vector<16x16xf32>
    %599 = arith.mulf %598, %576 : vector<16x16xf32>
    %600 = arith.addf %564, %599 : vector<16x16xf32>
    %c232 = arith.constant 232 : index
    %601 = memref.load %arg2[%c232] : memref<288xf32, #tpu.memory_space<smem>>
    %602 = vector.broadcast %601 : f32 to vector<16x16xf32>
    %603 = arith.mulf %602, %576 : vector<16x16xf32>
    %604 = arith.addf %568, %603 : vector<16x16xf32>
    %c268 = arith.constant 268 : index
    %605 = memref.load %arg2[%c268] : memref<288xf32, #tpu.memory_space<smem>>
    %606 = vector.broadcast %605 : f32 to vector<16x16xf32>
    %607 = arith.mulf %606, %576 : vector<16x16xf32>
    %608 = arith.addf %572, %607 : vector<16x16xf32>
    %c2_i32_50 = arith.constant 2 : i32
    %609 = arith.addi %4, %c2_i32_50 : i32
    %c1_51 = arith.constant 1 : index
    %610 = arith.index_cast %609 : i32 to index
    %c2_52 = arith.constant 2 : index
    %611 = vector.load %arg6[%c1_51, %610, %c2_52] : memref<4x18x18xf32, #tpu.memory_space<vmem>>, vector<1x16x16xf32>
    %612 = vector.shape_cast %611 : vector<1x16x16xf32> to vector<16x16xf32>
    %c17 = arith.constant 17 : index
    %613 = memref.load %arg2[%c17] : memref<288xf32, #tpu.memory_space<smem>>
    %614 = vector.broadcast %613 : f32 to vector<16x16xf32>
    %615 = arith.mulf %614, %612 : vector<16x16xf32>
    %616 = arith.addf %580, %615 : vector<16x16xf32>
    %c53 = arith.constant 53 : index
    %617 = memref.load %arg2[%c53] : memref<288xf32, #tpu.memory_space<smem>>
    %618 = vector.broadcast %617 : f32 to vector<16x16xf32>
    %619 = arith.mulf %618, %612 : vector<16x16xf32>
    %620 = arith.addf %584, %619 : vector<16x16xf32>
    %c89 = arith.constant 89 : index
    %621 = memref.load %arg2[%c89] : memref<288xf32, #tpu.memory_space<smem>>
    %622 = vector.broadcast %621 : f32 to vector<16x16xf32>
    %623 = arith.mulf %622, %612 : vector<16x16xf32>
    %624 = arith.addf %588, %623 : vector<16x16xf32>
    %c125 = arith.constant 125 : index
    %625 = memref.load %arg2[%c125] : memref<288xf32, #tpu.memory_space<smem>>
    %626 = vector.broadcast %625 : f32 to vector<16x16xf32>
    %627 = arith.mulf %626, %612 : vector<16x16xf32>
    %628 = arith.addf %592, %627 : vector<16x16xf32>
    %c161 = arith.constant 161 : index
    %629 = memref.load %arg2[%c161] : memref<288xf32, #tpu.memory_space<smem>>
    %630 = vector.broadcast %629 : f32 to vector<16x16xf32>
    %631 = arith.mulf %630, %612 : vector<16x16xf32>
    %632 = arith.addf %596, %631 : vector<16x16xf32>
    %c197 = arith.constant 197 : index
    %633 = memref.load %arg2[%c197] : memref<288xf32, #tpu.memory_space<smem>>
    %634 = vector.broadcast %633 : f32 to vector<16x16xf32>
    %635 = arith.mulf %634, %612 : vector<16x16xf32>
    %636 = arith.addf %600, %635 : vector<16x16xf32>
    %c233 = arith.constant 233 : index
    %637 = memref.load %arg2[%c233] : memref<288xf32, #tpu.memory_space<smem>>
    %638 = vector.broadcast %637 : f32 to vector<16x16xf32>
    %639 = arith.mulf %638, %612 : vector<16x16xf32>
    %640 = arith.addf %604, %639 : vector<16x16xf32>
    %c269 = arith.constant 269 : index
    %641 = memref.load %arg2[%c269] : memref<288xf32, #tpu.memory_space<smem>>
    %642 = vector.broadcast %641 : f32 to vector<16x16xf32>
    %643 = arith.mulf %642, %612 : vector<16x16xf32>
    %644 = arith.addf %608, %643 : vector<16x16xf32>
    %c0_i32_53 = arith.constant 0 : i32
    %645 = arith.addi %4, %c0_i32_53 : i32
    %c2_54 = arith.constant 2 : index
    %646 = arith.index_cast %645 : i32 to index
    %c0_55 = arith.constant 0 : index
    %647 = vector.load %arg6[%c2_54, %646, %c0_55] : memref<4x18x18xf32, #tpu.memory_space<vmem>>, vector<1x16x16xf32>
    %648 = vector.shape_cast %647 : vector<1x16x16xf32> to vector<16x16xf32>
    %c18 = arith.constant 18 : index
    %649 = memref.load %arg2[%c18] : memref<288xf32, #tpu.memory_space<smem>>
    %650 = vector.broadcast %649 : f32 to vector<16x16xf32>
    %651 = arith.mulf %650, %648 : vector<16x16xf32>
    %652 = arith.addf %616, %651 : vector<16x16xf32>
    %c54 = arith.constant 54 : index
    %653 = memref.load %arg2[%c54] : memref<288xf32, #tpu.memory_space<smem>>
    %654 = vector.broadcast %653 : f32 to vector<16x16xf32>
    %655 = arith.mulf %654, %648 : vector<16x16xf32>
    %656 = arith.addf %620, %655 : vector<16x16xf32>
    %c90 = arith.constant 90 : index
    %657 = memref.load %arg2[%c90] : memref<288xf32, #tpu.memory_space<smem>>
    %658 = vector.broadcast %657 : f32 to vector<16x16xf32>
    %659 = arith.mulf %658, %648 : vector<16x16xf32>
    %660 = arith.addf %624, %659 : vector<16x16xf32>
    %c126 = arith.constant 126 : index
    %661 = memref.load %arg2[%c126] : memref<288xf32, #tpu.memory_space<smem>>
    %662 = vector.broadcast %661 : f32 to vector<16x16xf32>
    %663 = arith.mulf %662, %648 : vector<16x16xf32>
    %664 = arith.addf %628, %663 : vector<16x16xf32>
    %c162 = arith.constant 162 : index
    %665 = memref.load %arg2[%c162] : memref<288xf32, #tpu.memory_space<smem>>
    %666 = vector.broadcast %665 : f32 to vector<16x16xf32>
    %667 = arith.mulf %666, %648 : vector<16x16xf32>
    %668 = arith.addf %632, %667 : vector<16x16xf32>
    %c198 = arith.constant 198 : index
    %669 = memref.load %arg2[%c198] : memref<288xf32, #tpu.memory_space<smem>>
    %670 = vector.broadcast %669 : f32 to vector<16x16xf32>
    %671 = arith.mulf %670, %648 : vector<16x16xf32>
    %672 = arith.addf %636, %671 : vector<16x16xf32>
    %c234 = arith.constant 234 : index
    %673 = memref.load %arg2[%c234] : memref<288xf32, #tpu.memory_space<smem>>
    %674 = vector.broadcast %673 : f32 to vector<16x16xf32>
    %675 = arith.mulf %674, %648 : vector<16x16xf32>
    %676 = arith.addf %640, %675 : vector<16x16xf32>
    %c270 = arith.constant 270 : index
    %677 = memref.load %arg2[%c270] : memref<288xf32, #tpu.memory_space<smem>>
    %678 = vector.broadcast %677 : f32 to vector<16x16xf32>
    %679 = arith.mulf %678, %648 : vector<16x16xf32>
    %680 = arith.addf %644, %679 : vector<16x16xf32>
    %c0_i32_56 = arith.constant 0 : i32
    %681 = arith.addi %4, %c0_i32_56 : i32
    %c2_57 = arith.constant 2 : index
    %682 = arith.index_cast %681 : i32 to index
    %c1_58 = arith.constant 1 : index
    %683 = vector.load %arg6[%c2_57, %682, %c1_58] : memref<4x18x18xf32, #tpu.memory_space<vmem>>, vector<1x16x16xf32>
    %684 = vector.shape_cast %683 : vector<1x16x16xf32> to vector<16x16xf32>
    %c19 = arith.constant 19 : index
    %685 = memref.load %arg2[%c19] : memref<288xf32, #tpu.memory_space<smem>>
    %686 = vector.broadcast %685 : f32 to vector<16x16xf32>
    %687 = arith.mulf %686, %684 : vector<16x16xf32>
    %688 = arith.addf %652, %687 : vector<16x16xf32>
    %c55 = arith.constant 55 : index
    %689 = memref.load %arg2[%c55] : memref<288xf32, #tpu.memory_space<smem>>
    %690 = vector.broadcast %689 : f32 to vector<16x16xf32>
    %691 = arith.mulf %690, %684 : vector<16x16xf32>
    %692 = arith.addf %656, %691 : vector<16x16xf32>
    %c91 = arith.constant 91 : index
    %693 = memref.load %arg2[%c91] : memref<288xf32, #tpu.memory_space<smem>>
    %694 = vector.broadcast %693 : f32 to vector<16x16xf32>
    %695 = arith.mulf %694, %684 : vector<16x16xf32>
    %696 = arith.addf %660, %695 : vector<16x16xf32>
    %c127 = arith.constant 127 : index
    %697 = memref.load %arg2[%c127] : memref<288xf32, #tpu.memory_space<smem>>
    %698 = vector.broadcast %697 : f32 to vector<16x16xf32>
    %699 = arith.mulf %698, %684 : vector<16x16xf32>
    %700 = arith.addf %664, %699 : vector<16x16xf32>
    %c163 = arith.constant 163 : index
    %701 = memref.load %arg2[%c163] : memref<288xf32, #tpu.memory_space<smem>>
    %702 = vector.broadcast %701 : f32 to vector<16x16xf32>
    %703 = arith.mulf %702, %684 : vector<16x16xf32>
    %704 = arith.addf %668, %703 : vector<16x16xf32>
    %c199 = arith.constant 199 : index
    %705 = memref.load %arg2[%c199] : memref<288xf32, #tpu.memory_space<smem>>
    %706 = vector.broadcast %705 : f32 to vector<16x16xf32>
    %707 = arith.mulf %706, %684 : vector<16x16xf32>
    %708 = arith.addf %672, %707 : vector<16x16xf32>
    %c235 = arith.constant 235 : index
    %709 = memref.load %arg2[%c235] : memref<288xf32, #tpu.memory_space<smem>>
    %710 = vector.broadcast %709 : f32 to vector<16x16xf32>
    %711 = arith.mulf %710, %684 : vector<16x16xf32>
    %712 = arith.addf %676, %711 : vector<16x16xf32>
    %c271 = arith.constant 271 : index
    %713 = memref.load %arg2[%c271] : memref<288xf32, #tpu.memory_space<smem>>
    %714 = vector.broadcast %713 : f32 to vector<16x16xf32>
    %715 = arith.mulf %714, %684 : vector<16x16xf32>
    %716 = arith.addf %680, %715 : vector<16x16xf32>
    %c0_i32_59 = arith.constant 0 : i32
    %717 = arith.addi %4, %c0_i32_59 : i32
    %c2_60 = arith.constant 2 : index
    %718 = arith.index_cast %717 : i32 to index
    %c2_61 = arith.constant 2 : index
    %719 = vector.load %arg6[%c2_60, %718, %c2_61] : memref<4x18x18xf32, #tpu.memory_space<vmem>>, vector<1x16x16xf32>
    %720 = vector.shape_cast %719 : vector<1x16x16xf32> to vector<16x16xf32>
    %c20 = arith.constant 20 : index
    %721 = memref.load %arg2[%c20] : memref<288xf32, #tpu.memory_space<smem>>
    %722 = vector.broadcast %721 : f32 to vector<16x16xf32>
    %723 = arith.mulf %722, %720 : vector<16x16xf32>
    %724 = arith.addf %688, %723 : vector<16x16xf32>
    %c56 = arith.constant 56 : index
    %725 = memref.load %arg2[%c56] : memref<288xf32, #tpu.memory_space<smem>>
    %726 = vector.broadcast %725 : f32 to vector<16x16xf32>
    %727 = arith.mulf %726, %720 : vector<16x16xf32>
    %728 = arith.addf %692, %727 : vector<16x16xf32>
    %c92 = arith.constant 92 : index
    %729 = memref.load %arg2[%c92] : memref<288xf32, #tpu.memory_space<smem>>
    %730 = vector.broadcast %729 : f32 to vector<16x16xf32>
    %731 = arith.mulf %730, %720 : vector<16x16xf32>
    %732 = arith.addf %696, %731 : vector<16x16xf32>
    %c128 = arith.constant 128 : index
    %733 = memref.load %arg2[%c128] : memref<288xf32, #tpu.memory_space<smem>>
    %734 = vector.broadcast %733 : f32 to vector<16x16xf32>
    %735 = arith.mulf %734, %720 : vector<16x16xf32>
    %736 = arith.addf %700, %735 : vector<16x16xf32>
    %c164 = arith.constant 164 : index
    %737 = memref.load %arg2[%c164] : memref<288xf32, #tpu.memory_space<smem>>
    %738 = vector.broadcast %737 : f32 to vector<16x16xf32>
    %739 = arith.mulf %738, %720 : vector<16x16xf32>
    %740 = arith.addf %704, %739 : vector<16x16xf32>
    %c200 = arith.constant 200 : index
    %741 = memref.load %arg2[%c200] : memref<288xf32, #tpu.memory_space<smem>>
    %742 = vector.broadcast %741 : f32 to vector<16x16xf32>
    %743 = arith.mulf %742, %720 : vector<16x16xf32>
    %744 = arith.addf %708, %743 : vector<16x16xf32>
    %c236 = arith.constant 236 : index
    %745 = memref.load %arg2[%c236] : memref<288xf32, #tpu.memory_space<smem>>
    %746 = vector.broadcast %745 : f32 to vector<16x16xf32>
    %747 = arith.mulf %746, %720 : vector<16x16xf32>
    %748 = arith.addf %712, %747 : vector<16x16xf32>
    %c272 = arith.constant 272 : index
    %749 = memref.load %arg2[%c272] : memref<288xf32, #tpu.memory_space<smem>>
    %750 = vector.broadcast %749 : f32 to vector<16x16xf32>
    %751 = arith.mulf %750, %720 : vector<16x16xf32>
    %752 = arith.addf %716, %751 : vector<16x16xf32>
    %c1_i32_62 = arith.constant 1 : i32
    %753 = arith.addi %4, %c1_i32_62 : i32
    %c2_63 = arith.constant 2 : index
    %754 = arith.index_cast %753 : i32 to index
    %c0_64 = arith.constant 0 : index
    %755 = vector.load %arg6[%c2_63, %754, %c0_64] : memref<4x18x18xf32, #tpu.memory_space<vmem>>, vector<1x16x16xf32>
    %756 = vector.shape_cast %755 : vector<1x16x16xf32> to vector<16x16xf32>
    %c21 = arith.constant 21 : index
    %757 = memref.load %arg2[%c21] : memref<288xf32, #tpu.memory_space<smem>>
    %758 = vector.broadcast %757 : f32 to vector<16x16xf32>
    %759 = arith.mulf %758, %756 : vector<16x16xf32>
    %760 = arith.addf %724, %759 : vector<16x16xf32>
    %c57 = arith.constant 57 : index
    %761 = memref.load %arg2[%c57] : memref<288xf32, #tpu.memory_space<smem>>
    %762 = vector.broadcast %761 : f32 to vector<16x16xf32>
    %763 = arith.mulf %762, %756 : vector<16x16xf32>
    %764 = arith.addf %728, %763 : vector<16x16xf32>
    %c93 = arith.constant 93 : index
    %765 = memref.load %arg2[%c93] : memref<288xf32, #tpu.memory_space<smem>>
    %766 = vector.broadcast %765 : f32 to vector<16x16xf32>
    %767 = arith.mulf %766, %756 : vector<16x16xf32>
    %768 = arith.addf %732, %767 : vector<16x16xf32>
    %c129 = arith.constant 129 : index
    %769 = memref.load %arg2[%c129] : memref<288xf32, #tpu.memory_space<smem>>
    %770 = vector.broadcast %769 : f32 to vector<16x16xf32>
    %771 = arith.mulf %770, %756 : vector<16x16xf32>
    %772 = arith.addf %736, %771 : vector<16x16xf32>
    %c165 = arith.constant 165 : index
    %773 = memref.load %arg2[%c165] : memref<288xf32, #tpu.memory_space<smem>>
    %774 = vector.broadcast %773 : f32 to vector<16x16xf32>
    %775 = arith.mulf %774, %756 : vector<16x16xf32>
    %776 = arith.addf %740, %775 : vector<16x16xf32>
    %c201 = arith.constant 201 : index
    %777 = memref.load %arg2[%c201] : memref<288xf32, #tpu.memory_space<smem>>
    %778 = vector.broadcast %777 : f32 to vector<16x16xf32>
    %779 = arith.mulf %778, %756 : vector<16x16xf32>
    %780 = arith.addf %744, %779 : vector<16x16xf32>
    %c237 = arith.constant 237 : index
    %781 = memref.load %arg2[%c237] : memref<288xf32, #tpu.memory_space<smem>>
    %782 = vector.broadcast %781 : f32 to vector<16x16xf32>
    %783 = arith.mulf %782, %756 : vector<16x16xf32>
    %784 = arith.addf %748, %783 : vector<16x16xf32>
    %c273 = arith.constant 273 : index
    %785 = memref.load %arg2[%c273] : memref<288xf32, #tpu.memory_space<smem>>
    %786 = vector.broadcast %785 : f32 to vector<16x16xf32>
    %787 = arith.mulf %786, %756 : vector<16x16xf32>
    %788 = arith.addf %752, %787 : vector<16x16xf32>
    %c1_i32_65 = arith.constant 1 : i32
    %789 = arith.addi %4, %c1_i32_65 : i32
    %c2_66 = arith.constant 2 : index
    %790 = arith.index_cast %789 : i32 to index
    %c1_67 = arith.constant 1 : index
    %791 = vector.load %arg6[%c2_66, %790, %c1_67] : memref<4x18x18xf32, #tpu.memory_space<vmem>>, vector<1x16x16xf32>
    %792 = vector.shape_cast %791 : vector<1x16x16xf32> to vector<16x16xf32>
    %c22 = arith.constant 22 : index
    %793 = memref.load %arg2[%c22] : memref<288xf32, #tpu.memory_space<smem>>
    %794 = vector.broadcast %793 : f32 to vector<16x16xf32>
    %795 = arith.mulf %794, %792 : vector<16x16xf32>
    %796 = arith.addf %760, %795 : vector<16x16xf32>
    %c58 = arith.constant 58 : index
    %797 = memref.load %arg2[%c58] : memref<288xf32, #tpu.memory_space<smem>>
    %798 = vector.broadcast %797 : f32 to vector<16x16xf32>
    %799 = arith.mulf %798, %792 : vector<16x16xf32>
    %800 = arith.addf %764, %799 : vector<16x16xf32>
    %c94 = arith.constant 94 : index
    %801 = memref.load %arg2[%c94] : memref<288xf32, #tpu.memory_space<smem>>
    %802 = vector.broadcast %801 : f32 to vector<16x16xf32>
    %803 = arith.mulf %802, %792 : vector<16x16xf32>
    %804 = arith.addf %768, %803 : vector<16x16xf32>
    %c130 = arith.constant 130 : index
    %805 = memref.load %arg2[%c130] : memref<288xf32, #tpu.memory_space<smem>>
    %806 = vector.broadcast %805 : f32 to vector<16x16xf32>
    %807 = arith.mulf %806, %792 : vector<16x16xf32>
    %808 = arith.addf %772, %807 : vector<16x16xf32>
    %c166 = arith.constant 166 : index
    %809 = memref.load %arg2[%c166] : memref<288xf32, #tpu.memory_space<smem>>
    %810 = vector.broadcast %809 : f32 to vector<16x16xf32>
    %811 = arith.mulf %810, %792 : vector<16x16xf32>
    %812 = arith.addf %776, %811 : vector<16x16xf32>
    %c202 = arith.constant 202 : index
    %813 = memref.load %arg2[%c202] : memref<288xf32, #tpu.memory_space<smem>>
    %814 = vector.broadcast %813 : f32 to vector<16x16xf32>
    %815 = arith.mulf %814, %792 : vector<16x16xf32>
    %816 = arith.addf %780, %815 : vector<16x16xf32>
    %c238 = arith.constant 238 : index
    %817 = memref.load %arg2[%c238] : memref<288xf32, #tpu.memory_space<smem>>
    %818 = vector.broadcast %817 : f32 to vector<16x16xf32>
    %819 = arith.mulf %818, %792 : vector<16x16xf32>
    %820 = arith.addf %784, %819 : vector<16x16xf32>
    %c274 = arith.constant 274 : index
    %821 = memref.load %arg2[%c274] : memref<288xf32, #tpu.memory_space<smem>>
    %822 = vector.broadcast %821 : f32 to vector<16x16xf32>
    %823 = arith.mulf %822, %792 : vector<16x16xf32>
    %824 = arith.addf %788, %823 : vector<16x16xf32>
    %c1_i32_68 = arith.constant 1 : i32
    %825 = arith.addi %4, %c1_i32_68 : i32
    %c2_69 = arith.constant 2 : index
    %826 = arith.index_cast %825 : i32 to index
    %c2_70 = arith.constant 2 : index
    %827 = vector.load %arg6[%c2_69, %826, %c2_70] : memref<4x18x18xf32, #tpu.memory_space<vmem>>, vector<1x16x16xf32>
    %828 = vector.shape_cast %827 : vector<1x16x16xf32> to vector<16x16xf32>
    %c23 = arith.constant 23 : index
    %829 = memref.load %arg2[%c23] : memref<288xf32, #tpu.memory_space<smem>>
    %830 = vector.broadcast %829 : f32 to vector<16x16xf32>
    %831 = arith.mulf %830, %828 : vector<16x16xf32>
    %832 = arith.addf %796, %831 : vector<16x16xf32>
    %c59 = arith.constant 59 : index
    %833 = memref.load %arg2[%c59] : memref<288xf32, #tpu.memory_space<smem>>
    %834 = vector.broadcast %833 : f32 to vector<16x16xf32>
    %835 = arith.mulf %834, %828 : vector<16x16xf32>
    %836 = arith.addf %800, %835 : vector<16x16xf32>
    %c95 = arith.constant 95 : index
    %837 = memref.load %arg2[%c95] : memref<288xf32, #tpu.memory_space<smem>>
    %838 = vector.broadcast %837 : f32 to vector<16x16xf32>
    %839 = arith.mulf %838, %828 : vector<16x16xf32>
    %840 = arith.addf %804, %839 : vector<16x16xf32>
    %c131 = arith.constant 131 : index
    %841 = memref.load %arg2[%c131] : memref<288xf32, #tpu.memory_space<smem>>
    %842 = vector.broadcast %841 : f32 to vector<16x16xf32>
    %843 = arith.mulf %842, %828 : vector<16x16xf32>
    %844 = arith.addf %808, %843 : vector<16x16xf32>
    %c167 = arith.constant 167 : index
    %845 = memref.load %arg2[%c167] : memref<288xf32, #tpu.memory_space<smem>>
    %846 = vector.broadcast %845 : f32 to vector<16x16xf32>
    %847 = arith.mulf %846, %828 : vector<16x16xf32>
    %848 = arith.addf %812, %847 : vector<16x16xf32>
    %c203 = arith.constant 203 : index
    %849 = memref.load %arg2[%c203] : memref<288xf32, #tpu.memory_space<smem>>
    %850 = vector.broadcast %849 : f32 to vector<16x16xf32>
    %851 = arith.mulf %850, %828 : vector<16x16xf32>
    %852 = arith.addf %816, %851 : vector<16x16xf32>
    %c239 = arith.constant 239 : index
    %853 = memref.load %arg2[%c239] : memref<288xf32, #tpu.memory_space<smem>>
    %854 = vector.broadcast %853 : f32 to vector<16x16xf32>
    %855 = arith.mulf %854, %828 : vector<16x16xf32>
    %856 = arith.addf %820, %855 : vector<16x16xf32>
    %c275 = arith.constant 275 : index
    %857 = memref.load %arg2[%c275] : memref<288xf32, #tpu.memory_space<smem>>
    %858 = vector.broadcast %857 : f32 to vector<16x16xf32>
    %859 = arith.mulf %858, %828 : vector<16x16xf32>
    %860 = arith.addf %824, %859 : vector<16x16xf32>
    %c2_i32_71 = arith.constant 2 : i32
    %861 = arith.addi %4, %c2_i32_71 : i32
    %c2_72 = arith.constant 2 : index
    %862 = arith.index_cast %861 : i32 to index
    %c0_73 = arith.constant 0 : index
    %863 = vector.load %arg6[%c2_72, %862, %c0_73] : memref<4x18x18xf32, #tpu.memory_space<vmem>>, vector<1x16x16xf32>
    %864 = vector.shape_cast %863 : vector<1x16x16xf32> to vector<16x16xf32>
    %c24 = arith.constant 24 : index
    %865 = memref.load %arg2[%c24] : memref<288xf32, #tpu.memory_space<smem>>
    %866 = vector.broadcast %865 : f32 to vector<16x16xf32>
    %867 = arith.mulf %866, %864 : vector<16x16xf32>
    %868 = arith.addf %832, %867 : vector<16x16xf32>
    %c60 = arith.constant 60 : index
    %869 = memref.load %arg2[%c60] : memref<288xf32, #tpu.memory_space<smem>>
    %870 = vector.broadcast %869 : f32 to vector<16x16xf32>
    %871 = arith.mulf %870, %864 : vector<16x16xf32>
    %872 = arith.addf %836, %871 : vector<16x16xf32>
    %c96 = arith.constant 96 : index
    %873 = memref.load %arg2[%c96] : memref<288xf32, #tpu.memory_space<smem>>
    %874 = vector.broadcast %873 : f32 to vector<16x16xf32>
    %875 = arith.mulf %874, %864 : vector<16x16xf32>
    %876 = arith.addf %840, %875 : vector<16x16xf32>
    %c132 = arith.constant 132 : index
    %877 = memref.load %arg2[%c132] : memref<288xf32, #tpu.memory_space<smem>>
    %878 = vector.broadcast %877 : f32 to vector<16x16xf32>
    %879 = arith.mulf %878, %864 : vector<16x16xf32>
    %880 = arith.addf %844, %879 : vector<16x16xf32>
    %c168 = arith.constant 168 : index
    %881 = memref.load %arg2[%c168] : memref<288xf32, #tpu.memory_space<smem>>
    %882 = vector.broadcast %881 : f32 to vector<16x16xf32>
    %883 = arith.mulf %882, %864 : vector<16x16xf32>
    %884 = arith.addf %848, %883 : vector<16x16xf32>
    %c204 = arith.constant 204 : index
    %885 = memref.load %arg2[%c204] : memref<288xf32, #tpu.memory_space<smem>>
    %886 = vector.broadcast %885 : f32 to vector<16x16xf32>
    %887 = arith.mulf %886, %864 : vector<16x16xf32>
    %888 = arith.addf %852, %887 : vector<16x16xf32>
    %c240 = arith.constant 240 : index
    %889 = memref.load %arg2[%c240] : memref<288xf32, #tpu.memory_space<smem>>
    %890 = vector.broadcast %889 : f32 to vector<16x16xf32>
    %891 = arith.mulf %890, %864 : vector<16x16xf32>
    %892 = arith.addf %856, %891 : vector<16x16xf32>
    %c276 = arith.constant 276 : index
    %893 = memref.load %arg2[%c276] : memref<288xf32, #tpu.memory_space<smem>>
    %894 = vector.broadcast %893 : f32 to vector<16x16xf32>
    %895 = arith.mulf %894, %864 : vector<16x16xf32>
    %896 = arith.addf %860, %895 : vector<16x16xf32>
    %c2_i32_74 = arith.constant 2 : i32
    %897 = arith.addi %4, %c2_i32_74 : i32
    %c2_75 = arith.constant 2 : index
    %898 = arith.index_cast %897 : i32 to index
    %c1_76 = arith.constant 1 : index
    %899 = vector.load %arg6[%c2_75, %898, %c1_76] : memref<4x18x18xf32, #tpu.memory_space<vmem>>, vector<1x16x16xf32>
    %900 = vector.shape_cast %899 : vector<1x16x16xf32> to vector<16x16xf32>
    %c25 = arith.constant 25 : index
    %901 = memref.load %arg2[%c25] : memref<288xf32, #tpu.memory_space<smem>>
    %902 = vector.broadcast %901 : f32 to vector<16x16xf32>
    %903 = arith.mulf %902, %900 : vector<16x16xf32>
    %904 = arith.addf %868, %903 : vector<16x16xf32>
    %c61 = arith.constant 61 : index
    %905 = memref.load %arg2[%c61] : memref<288xf32, #tpu.memory_space<smem>>
    %906 = vector.broadcast %905 : f32 to vector<16x16xf32>
    %907 = arith.mulf %906, %900 : vector<16x16xf32>
    %908 = arith.addf %872, %907 : vector<16x16xf32>
    %c97 = arith.constant 97 : index
    %909 = memref.load %arg2[%c97] : memref<288xf32, #tpu.memory_space<smem>>
    %910 = vector.broadcast %909 : f32 to vector<16x16xf32>
    %911 = arith.mulf %910, %900 : vector<16x16xf32>
    %912 = arith.addf %876, %911 : vector<16x16xf32>
    %c133 = arith.constant 133 : index
    %913 = memref.load %arg2[%c133] : memref<288xf32, #tpu.memory_space<smem>>
    %914 = vector.broadcast %913 : f32 to vector<16x16xf32>
    %915 = arith.mulf %914, %900 : vector<16x16xf32>
    %916 = arith.addf %880, %915 : vector<16x16xf32>
    %c169 = arith.constant 169 : index
    %917 = memref.load %arg2[%c169] : memref<288xf32, #tpu.memory_space<smem>>
    %918 = vector.broadcast %917 : f32 to vector<16x16xf32>
    %919 = arith.mulf %918, %900 : vector<16x16xf32>
    %920 = arith.addf %884, %919 : vector<16x16xf32>
    %c205 = arith.constant 205 : index
    %921 = memref.load %arg2[%c205] : memref<288xf32, #tpu.memory_space<smem>>
    %922 = vector.broadcast %921 : f32 to vector<16x16xf32>
    %923 = arith.mulf %922, %900 : vector<16x16xf32>
    %924 = arith.addf %888, %923 : vector<16x16xf32>
    %c241 = arith.constant 241 : index
    %925 = memref.load %arg2[%c241] : memref<288xf32, #tpu.memory_space<smem>>
    %926 = vector.broadcast %925 : f32 to vector<16x16xf32>
    %927 = arith.mulf %926, %900 : vector<16x16xf32>
    %928 = arith.addf %892, %927 : vector<16x16xf32>
    %c277 = arith.constant 277 : index
    %929 = memref.load %arg2[%c277] : memref<288xf32, #tpu.memory_space<smem>>
    %930 = vector.broadcast %929 : f32 to vector<16x16xf32>
    %931 = arith.mulf %930, %900 : vector<16x16xf32>
    %932 = arith.addf %896, %931 : vector<16x16xf32>
    %c2_i32_77 = arith.constant 2 : i32
    %933 = arith.addi %4, %c2_i32_77 : i32
    %c2_78 = arith.constant 2 : index
    %934 = arith.index_cast %933 : i32 to index
    %c2_79 = arith.constant 2 : index
    %935 = vector.load %arg6[%c2_78, %934, %c2_79] : memref<4x18x18xf32, #tpu.memory_space<vmem>>, vector<1x16x16xf32>
    %936 = vector.shape_cast %935 : vector<1x16x16xf32> to vector<16x16xf32>
    %c26 = arith.constant 26 : index
    %937 = memref.load %arg2[%c26] : memref<288xf32, #tpu.memory_space<smem>>
    %938 = vector.broadcast %937 : f32 to vector<16x16xf32>
    %939 = arith.mulf %938, %936 : vector<16x16xf32>
    %940 = arith.addf %904, %939 : vector<16x16xf32>
    %c62 = arith.constant 62 : index
    %941 = memref.load %arg2[%c62] : memref<288xf32, #tpu.memory_space<smem>>
    %942 = vector.broadcast %941 : f32 to vector<16x16xf32>
    %943 = arith.mulf %942, %936 : vector<16x16xf32>
    %944 = arith.addf %908, %943 : vector<16x16xf32>
    %c98 = arith.constant 98 : index
    %945 = memref.load %arg2[%c98] : memref<288xf32, #tpu.memory_space<smem>>
    %946 = vector.broadcast %945 : f32 to vector<16x16xf32>
    %947 = arith.mulf %946, %936 : vector<16x16xf32>
    %948 = arith.addf %912, %947 : vector<16x16xf32>
    %c134 = arith.constant 134 : index
    %949 = memref.load %arg2[%c134] : memref<288xf32, #tpu.memory_space<smem>>
    %950 = vector.broadcast %949 : f32 to vector<16x16xf32>
    %951 = arith.mulf %950, %936 : vector<16x16xf32>
    %952 = arith.addf %916, %951 : vector<16x16xf32>
    %c170 = arith.constant 170 : index
    %953 = memref.load %arg2[%c170] : memref<288xf32, #tpu.memory_space<smem>>
    %954 = vector.broadcast %953 : f32 to vector<16x16xf32>
    %955 = arith.mulf %954, %936 : vector<16x16xf32>
    %956 = arith.addf %920, %955 : vector<16x16xf32>
    %c206 = arith.constant 206 : index
    %957 = memref.load %arg2[%c206] : memref<288xf32, #tpu.memory_space<smem>>
    %958 = vector.broadcast %957 : f32 to vector<16x16xf32>
    %959 = arith.mulf %958, %936 : vector<16x16xf32>
    %960 = arith.addf %924, %959 : vector<16x16xf32>
    %c242 = arith.constant 242 : index
    %961 = memref.load %arg2[%c242] : memref<288xf32, #tpu.memory_space<smem>>
    %962 = vector.broadcast %961 : f32 to vector<16x16xf32>
    %963 = arith.mulf %962, %936 : vector<16x16xf32>
    %964 = arith.addf %928, %963 : vector<16x16xf32>
    %c278 = arith.constant 278 : index
    %965 = memref.load %arg2[%c278] : memref<288xf32, #tpu.memory_space<smem>>
    %966 = vector.broadcast %965 : f32 to vector<16x16xf32>
    %967 = arith.mulf %966, %936 : vector<16x16xf32>
    %968 = arith.addf %932, %967 : vector<16x16xf32>
    %c0_i32_80 = arith.constant 0 : i32
    %969 = arith.addi %4, %c0_i32_80 : i32
    %c3_81 = arith.constant 3 : index
    %970 = arith.index_cast %969 : i32 to index
    %c0_82 = arith.constant 0 : index
    %971 = vector.load %arg6[%c3_81, %970, %c0_82] : memref<4x18x18xf32, #tpu.memory_space<vmem>>, vector<1x16x16xf32>
    %972 = vector.shape_cast %971 : vector<1x16x16xf32> to vector<16x16xf32>
    %c27 = arith.constant 27 : index
    %973 = memref.load %arg2[%c27] : memref<288xf32, #tpu.memory_space<smem>>
    %974 = vector.broadcast %973 : f32 to vector<16x16xf32>
    %975 = arith.mulf %974, %972 : vector<16x16xf32>
    %976 = arith.addf %940, %975 : vector<16x16xf32>
    %c63 = arith.constant 63 : index
    %977 = memref.load %arg2[%c63] : memref<288xf32, #tpu.memory_space<smem>>
    %978 = vector.broadcast %977 : f32 to vector<16x16xf32>
    %979 = arith.mulf %978, %972 : vector<16x16xf32>
    %980 = arith.addf %944, %979 : vector<16x16xf32>
    %c99 = arith.constant 99 : index
    %981 = memref.load %arg2[%c99] : memref<288xf32, #tpu.memory_space<smem>>
    %982 = vector.broadcast %981 : f32 to vector<16x16xf32>
    %983 = arith.mulf %982, %972 : vector<16x16xf32>
    %984 = arith.addf %948, %983 : vector<16x16xf32>
    %c135 = arith.constant 135 : index
    %985 = memref.load %arg2[%c135] : memref<288xf32, #tpu.memory_space<smem>>
    %986 = vector.broadcast %985 : f32 to vector<16x16xf32>
    %987 = arith.mulf %986, %972 : vector<16x16xf32>
    %988 = arith.addf %952, %987 : vector<16x16xf32>
    %c171 = arith.constant 171 : index
    %989 = memref.load %arg2[%c171] : memref<288xf32, #tpu.memory_space<smem>>
    %990 = vector.broadcast %989 : f32 to vector<16x16xf32>
    %991 = arith.mulf %990, %972 : vector<16x16xf32>
    %992 = arith.addf %956, %991 : vector<16x16xf32>
    %c207 = arith.constant 207 : index
    %993 = memref.load %arg2[%c207] : memref<288xf32, #tpu.memory_space<smem>>
    %994 = vector.broadcast %993 : f32 to vector<16x16xf32>
    %995 = arith.mulf %994, %972 : vector<16x16xf32>
    %996 = arith.addf %960, %995 : vector<16x16xf32>
    %c243 = arith.constant 243 : index
    %997 = memref.load %arg2[%c243] : memref<288xf32, #tpu.memory_space<smem>>
    %998 = vector.broadcast %997 : f32 to vector<16x16xf32>
    %999 = arith.mulf %998, %972 : vector<16x16xf32>
    %1000 = arith.addf %964, %999 : vector<16x16xf32>
    %c279 = arith.constant 279 : index
    %1001 = memref.load %arg2[%c279] : memref<288xf32, #tpu.memory_space<smem>>
    %1002 = vector.broadcast %1001 : f32 to vector<16x16xf32>
    %1003 = arith.mulf %1002, %972 : vector<16x16xf32>
    %1004 = arith.addf %968, %1003 : vector<16x16xf32>
    %c0_i32_83 = arith.constant 0 : i32
    %1005 = arith.addi %4, %c0_i32_83 : i32
    %c3_84 = arith.constant 3 : index
    %1006 = arith.index_cast %1005 : i32 to index
    %c1_85 = arith.constant 1 : index
    %1007 = vector.load %arg6[%c3_84, %1006, %c1_85] : memref<4x18x18xf32, #tpu.memory_space<vmem>>, vector<1x16x16xf32>
    %1008 = vector.shape_cast %1007 : vector<1x16x16xf32> to vector<16x16xf32>
    %c28 = arith.constant 28 : index
    %1009 = memref.load %arg2[%c28] : memref<288xf32, #tpu.memory_space<smem>>
    %1010 = vector.broadcast %1009 : f32 to vector<16x16xf32>
    %1011 = arith.mulf %1010, %1008 : vector<16x16xf32>
    %1012 = arith.addf %976, %1011 : vector<16x16xf32>
    %c64 = arith.constant 64 : index
    %1013 = memref.load %arg2[%c64] : memref<288xf32, #tpu.memory_space<smem>>
    %1014 = vector.broadcast %1013 : f32 to vector<16x16xf32>
    %1015 = arith.mulf %1014, %1008 : vector<16x16xf32>
    %1016 = arith.addf %980, %1015 : vector<16x16xf32>
    %c100 = arith.constant 100 : index
    %1017 = memref.load %arg2[%c100] : memref<288xf32, #tpu.memory_space<smem>>
    %1018 = vector.broadcast %1017 : f32 to vector<16x16xf32>
    %1019 = arith.mulf %1018, %1008 : vector<16x16xf32>
    %1020 = arith.addf %984, %1019 : vector<16x16xf32>
    %c136 = arith.constant 136 : index
    %1021 = memref.load %arg2[%c136] : memref<288xf32, #tpu.memory_space<smem>>
    %1022 = vector.broadcast %1021 : f32 to vector<16x16xf32>
    %1023 = arith.mulf %1022, %1008 : vector<16x16xf32>
    %1024 = arith.addf %988, %1023 : vector<16x16xf32>
    %c172 = arith.constant 172 : index
    %1025 = memref.load %arg2[%c172] : memref<288xf32, #tpu.memory_space<smem>>
    %1026 = vector.broadcast %1025 : f32 to vector<16x16xf32>
    %1027 = arith.mulf %1026, %1008 : vector<16x16xf32>
    %1028 = arith.addf %992, %1027 : vector<16x16xf32>
    %c208 = arith.constant 208 : index
    %1029 = memref.load %arg2[%c208] : memref<288xf32, #tpu.memory_space<smem>>
    %1030 = vector.broadcast %1029 : f32 to vector<16x16xf32>
    %1031 = arith.mulf %1030, %1008 : vector<16x16xf32>
    %1032 = arith.addf %996, %1031 : vector<16x16xf32>
    %c244 = arith.constant 244 : index
    %1033 = memref.load %arg2[%c244] : memref<288xf32, #tpu.memory_space<smem>>
    %1034 = vector.broadcast %1033 : f32 to vector<16x16xf32>
    %1035 = arith.mulf %1034, %1008 : vector<16x16xf32>
    %1036 = arith.addf %1000, %1035 : vector<16x16xf32>
    %c280 = arith.constant 280 : index
    %1037 = memref.load %arg2[%c280] : memref<288xf32, #tpu.memory_space<smem>>
    %1038 = vector.broadcast %1037 : f32 to vector<16x16xf32>
    %1039 = arith.mulf %1038, %1008 : vector<16x16xf32>
    %1040 = arith.addf %1004, %1039 : vector<16x16xf32>
    %c0_i32_86 = arith.constant 0 : i32
    %1041 = arith.addi %4, %c0_i32_86 : i32
    %c3_87 = arith.constant 3 : index
    %1042 = arith.index_cast %1041 : i32 to index
    %c2_88 = arith.constant 2 : index
    %1043 = vector.load %arg6[%c3_87, %1042, %c2_88] : memref<4x18x18xf32, #tpu.memory_space<vmem>>, vector<1x16x16xf32>
    %1044 = vector.shape_cast %1043 : vector<1x16x16xf32> to vector<16x16xf32>
    %c29 = arith.constant 29 : index
    %1045 = memref.load %arg2[%c29] : memref<288xf32, #tpu.memory_space<smem>>
    %1046 = vector.broadcast %1045 : f32 to vector<16x16xf32>
    %1047 = arith.mulf %1046, %1044 : vector<16x16xf32>
    %1048 = arith.addf %1012, %1047 : vector<16x16xf32>
    %c65 = arith.constant 65 : index
    %1049 = memref.load %arg2[%c65] : memref<288xf32, #tpu.memory_space<smem>>
    %1050 = vector.broadcast %1049 : f32 to vector<16x16xf32>
    %1051 = arith.mulf %1050, %1044 : vector<16x16xf32>
    %1052 = arith.addf %1016, %1051 : vector<16x16xf32>
    %c101 = arith.constant 101 : index
    %1053 = memref.load %arg2[%c101] : memref<288xf32, #tpu.memory_space<smem>>
    %1054 = vector.broadcast %1053 : f32 to vector<16x16xf32>
    %1055 = arith.mulf %1054, %1044 : vector<16x16xf32>
    %1056 = arith.addf %1020, %1055 : vector<16x16xf32>
    %c137 = arith.constant 137 : index
    %1057 = memref.load %arg2[%c137] : memref<288xf32, #tpu.memory_space<smem>>
    %1058 = vector.broadcast %1057 : f32 to vector<16x16xf32>
    %1059 = arith.mulf %1058, %1044 : vector<16x16xf32>
    %1060 = arith.addf %1024, %1059 : vector<16x16xf32>
    %c173 = arith.constant 173 : index
    %1061 = memref.load %arg2[%c173] : memref<288xf32, #tpu.memory_space<smem>>
    %1062 = vector.broadcast %1061 : f32 to vector<16x16xf32>
    %1063 = arith.mulf %1062, %1044 : vector<16x16xf32>
    %1064 = arith.addf %1028, %1063 : vector<16x16xf32>
    %c209 = arith.constant 209 : index
    %1065 = memref.load %arg2[%c209] : memref<288xf32, #tpu.memory_space<smem>>
    %1066 = vector.broadcast %1065 : f32 to vector<16x16xf32>
    %1067 = arith.mulf %1066, %1044 : vector<16x16xf32>
    %1068 = arith.addf %1032, %1067 : vector<16x16xf32>
    %c245 = arith.constant 245 : index
    %1069 = memref.load %arg2[%c245] : memref<288xf32, #tpu.memory_space<smem>>
    %1070 = vector.broadcast %1069 : f32 to vector<16x16xf32>
    %1071 = arith.mulf %1070, %1044 : vector<16x16xf32>
    %1072 = arith.addf %1036, %1071 : vector<16x16xf32>
    %c281 = arith.constant 281 : index
    %1073 = memref.load %arg2[%c281] : memref<288xf32, #tpu.memory_space<smem>>
    %1074 = vector.broadcast %1073 : f32 to vector<16x16xf32>
    %1075 = arith.mulf %1074, %1044 : vector<16x16xf32>
    %1076 = arith.addf %1040, %1075 : vector<16x16xf32>
    %c1_i32_89 = arith.constant 1 : i32
    %1077 = arith.addi %4, %c1_i32_89 : i32
    %c3_90 = arith.constant 3 : index
    %1078 = arith.index_cast %1077 : i32 to index
    %c0_91 = arith.constant 0 : index
    %1079 = vector.load %arg6[%c3_90, %1078, %c0_91] : memref<4x18x18xf32, #tpu.memory_space<vmem>>, vector<1x16x16xf32>
    %1080 = vector.shape_cast %1079 : vector<1x16x16xf32> to vector<16x16xf32>
    %c30 = arith.constant 30 : index
    %1081 = memref.load %arg2[%c30] : memref<288xf32, #tpu.memory_space<smem>>
    %1082 = vector.broadcast %1081 : f32 to vector<16x16xf32>
    %1083 = arith.mulf %1082, %1080 : vector<16x16xf32>
    %1084 = arith.addf %1048, %1083 : vector<16x16xf32>
    %c66 = arith.constant 66 : index
    %1085 = memref.load %arg2[%c66] : memref<288xf32, #tpu.memory_space<smem>>
    %1086 = vector.broadcast %1085 : f32 to vector<16x16xf32>
    %1087 = arith.mulf %1086, %1080 : vector<16x16xf32>
    %1088 = arith.addf %1052, %1087 : vector<16x16xf32>
    %c102 = arith.constant 102 : index
    %1089 = memref.load %arg2[%c102] : memref<288xf32, #tpu.memory_space<smem>>
    %1090 = vector.broadcast %1089 : f32 to vector<16x16xf32>
    %1091 = arith.mulf %1090, %1080 : vector<16x16xf32>
    %1092 = arith.addf %1056, %1091 : vector<16x16xf32>
    %c138 = arith.constant 138 : index
    %1093 = memref.load %arg2[%c138] : memref<288xf32, #tpu.memory_space<smem>>
    %1094 = vector.broadcast %1093 : f32 to vector<16x16xf32>
    %1095 = arith.mulf %1094, %1080 : vector<16x16xf32>
    %1096 = arith.addf %1060, %1095 : vector<16x16xf32>
    %c174 = arith.constant 174 : index
    %1097 = memref.load %arg2[%c174] : memref<288xf32, #tpu.memory_space<smem>>
    %1098 = vector.broadcast %1097 : f32 to vector<16x16xf32>
    %1099 = arith.mulf %1098, %1080 : vector<16x16xf32>
    %1100 = arith.addf %1064, %1099 : vector<16x16xf32>
    %c210 = arith.constant 210 : index
    %1101 = memref.load %arg2[%c210] : memref<288xf32, #tpu.memory_space<smem>>
    %1102 = vector.broadcast %1101 : f32 to vector<16x16xf32>
    %1103 = arith.mulf %1102, %1080 : vector<16x16xf32>
    %1104 = arith.addf %1068, %1103 : vector<16x16xf32>
    %c246 = arith.constant 246 : index
    %1105 = memref.load %arg2[%c246] : memref<288xf32, #tpu.memory_space<smem>>
    %1106 = vector.broadcast %1105 : f32 to vector<16x16xf32>
    %1107 = arith.mulf %1106, %1080 : vector<16x16xf32>
    %1108 = arith.addf %1072, %1107 : vector<16x16xf32>
    %c282 = arith.constant 282 : index
    %1109 = memref.load %arg2[%c282] : memref<288xf32, #tpu.memory_space<smem>>
    %1110 = vector.broadcast %1109 : f32 to vector<16x16xf32>
    %1111 = arith.mulf %1110, %1080 : vector<16x16xf32>
    %1112 = arith.addf %1076, %1111 : vector<16x16xf32>
    %c1_i32_92 = arith.constant 1 : i32
    %1113 = arith.addi %4, %c1_i32_92 : i32
    %c3_93 = arith.constant 3 : index
    %1114 = arith.index_cast %1113 : i32 to index
    %c1_94 = arith.constant 1 : index
    %1115 = vector.load %arg6[%c3_93, %1114, %c1_94] : memref<4x18x18xf32, #tpu.memory_space<vmem>>, vector<1x16x16xf32>
    %1116 = vector.shape_cast %1115 : vector<1x16x16xf32> to vector<16x16xf32>
    %c31 = arith.constant 31 : index
    %1117 = memref.load %arg2[%c31] : memref<288xf32, #tpu.memory_space<smem>>
    %1118 = vector.broadcast %1117 : f32 to vector<16x16xf32>
    %1119 = arith.mulf %1118, %1116 : vector<16x16xf32>
    %1120 = arith.addf %1084, %1119 : vector<16x16xf32>
    %c67 = arith.constant 67 : index
    %1121 = memref.load %arg2[%c67] : memref<288xf32, #tpu.memory_space<smem>>
    %1122 = vector.broadcast %1121 : f32 to vector<16x16xf32>
    %1123 = arith.mulf %1122, %1116 : vector<16x16xf32>
    %1124 = arith.addf %1088, %1123 : vector<16x16xf32>
    %c103 = arith.constant 103 : index
    %1125 = memref.load %arg2[%c103] : memref<288xf32, #tpu.memory_space<smem>>
    %1126 = vector.broadcast %1125 : f32 to vector<16x16xf32>
    %1127 = arith.mulf %1126, %1116 : vector<16x16xf32>
    %1128 = arith.addf %1092, %1127 : vector<16x16xf32>
    %c139 = arith.constant 139 : index
    %1129 = memref.load %arg2[%c139] : memref<288xf32, #tpu.memory_space<smem>>
    %1130 = vector.broadcast %1129 : f32 to vector<16x16xf32>
    %1131 = arith.mulf %1130, %1116 : vector<16x16xf32>
    %1132 = arith.addf %1096, %1131 : vector<16x16xf32>
    %c175 = arith.constant 175 : index
    %1133 = memref.load %arg2[%c175] : memref<288xf32, #tpu.memory_space<smem>>
    %1134 = vector.broadcast %1133 : f32 to vector<16x16xf32>
    %1135 = arith.mulf %1134, %1116 : vector<16x16xf32>
    %1136 = arith.addf %1100, %1135 : vector<16x16xf32>
    %c211 = arith.constant 211 : index
    %1137 = memref.load %arg2[%c211] : memref<288xf32, #tpu.memory_space<smem>>
    %1138 = vector.broadcast %1137 : f32 to vector<16x16xf32>
    %1139 = arith.mulf %1138, %1116 : vector<16x16xf32>
    %1140 = arith.addf %1104, %1139 : vector<16x16xf32>
    %c247 = arith.constant 247 : index
    %1141 = memref.load %arg2[%c247] : memref<288xf32, #tpu.memory_space<smem>>
    %1142 = vector.broadcast %1141 : f32 to vector<16x16xf32>
    %1143 = arith.mulf %1142, %1116 : vector<16x16xf32>
    %1144 = arith.addf %1108, %1143 : vector<16x16xf32>
    %c283 = arith.constant 283 : index
    %1145 = memref.load %arg2[%c283] : memref<288xf32, #tpu.memory_space<smem>>
    %1146 = vector.broadcast %1145 : f32 to vector<16x16xf32>
    %1147 = arith.mulf %1146, %1116 : vector<16x16xf32>
    %1148 = arith.addf %1112, %1147 : vector<16x16xf32>
    %c1_i32_95 = arith.constant 1 : i32
    %1149 = arith.addi %4, %c1_i32_95 : i32
    %c3_96 = arith.constant 3 : index
    %1150 = arith.index_cast %1149 : i32 to index
    %c2_97 = arith.constant 2 : index
    %1151 = vector.load %arg6[%c3_96, %1150, %c2_97] : memref<4x18x18xf32, #tpu.memory_space<vmem>>, vector<1x16x16xf32>
    %1152 = vector.shape_cast %1151 : vector<1x16x16xf32> to vector<16x16xf32>
    %c32 = arith.constant 32 : index
    %1153 = memref.load %arg2[%c32] : memref<288xf32, #tpu.memory_space<smem>>
    %1154 = vector.broadcast %1153 : f32 to vector<16x16xf32>
    %1155 = arith.mulf %1154, %1152 : vector<16x16xf32>
    %1156 = arith.addf %1120, %1155 : vector<16x16xf32>
    %c68 = arith.constant 68 : index
    %1157 = memref.load %arg2[%c68] : memref<288xf32, #tpu.memory_space<smem>>
    %1158 = vector.broadcast %1157 : f32 to vector<16x16xf32>
    %1159 = arith.mulf %1158, %1152 : vector<16x16xf32>
    %1160 = arith.addf %1124, %1159 : vector<16x16xf32>
    %c104 = arith.constant 104 : index
    %1161 = memref.load %arg2[%c104] : memref<288xf32, #tpu.memory_space<smem>>
    %1162 = vector.broadcast %1161 : f32 to vector<16x16xf32>
    %1163 = arith.mulf %1162, %1152 : vector<16x16xf32>
    %1164 = arith.addf %1128, %1163 : vector<16x16xf32>
    %c140 = arith.constant 140 : index
    %1165 = memref.load %arg2[%c140] : memref<288xf32, #tpu.memory_space<smem>>
    %1166 = vector.broadcast %1165 : f32 to vector<16x16xf32>
    %1167 = arith.mulf %1166, %1152 : vector<16x16xf32>
    %1168 = arith.addf %1132, %1167 : vector<16x16xf32>
    %c176 = arith.constant 176 : index
    %1169 = memref.load %arg2[%c176] : memref<288xf32, #tpu.memory_space<smem>>
    %1170 = vector.broadcast %1169 : f32 to vector<16x16xf32>
    %1171 = arith.mulf %1170, %1152 : vector<16x16xf32>
    %1172 = arith.addf %1136, %1171 : vector<16x16xf32>
    %c212 = arith.constant 212 : index
    %1173 = memref.load %arg2[%c212] : memref<288xf32, #tpu.memory_space<smem>>
    %1174 = vector.broadcast %1173 : f32 to vector<16x16xf32>
    %1175 = arith.mulf %1174, %1152 : vector<16x16xf32>
    %1176 = arith.addf %1140, %1175 : vector<16x16xf32>
    %c248 = arith.constant 248 : index
    %1177 = memref.load %arg2[%c248] : memref<288xf32, #tpu.memory_space<smem>>
    %1178 = vector.broadcast %1177 : f32 to vector<16x16xf32>
    %1179 = arith.mulf %1178, %1152 : vector<16x16xf32>
    %1180 = arith.addf %1144, %1179 : vector<16x16xf32>
    %c284 = arith.constant 284 : index
    %1181 = memref.load %arg2[%c284] : memref<288xf32, #tpu.memory_space<smem>>
    %1182 = vector.broadcast %1181 : f32 to vector<16x16xf32>
    %1183 = arith.mulf %1182, %1152 : vector<16x16xf32>
    %1184 = arith.addf %1148, %1183 : vector<16x16xf32>
    %c2_i32_98 = arith.constant 2 : i32
    %1185 = arith.addi %4, %c2_i32_98 : i32
    %c3_99 = arith.constant 3 : index
    %1186 = arith.index_cast %1185 : i32 to index
    %c0_100 = arith.constant 0 : index
    %1187 = vector.load %arg6[%c3_99, %1186, %c0_100] : memref<4x18x18xf32, #tpu.memory_space<vmem>>, vector<1x16x16xf32>
    %1188 = vector.shape_cast %1187 : vector<1x16x16xf32> to vector<16x16xf32>
    %c33 = arith.constant 33 : index
    %1189 = memref.load %arg2[%c33] : memref<288xf32, #tpu.memory_space<smem>>
    %1190 = vector.broadcast %1189 : f32 to vector<16x16xf32>
    %1191 = arith.mulf %1190, %1188 : vector<16x16xf32>
    %1192 = arith.addf %1156, %1191 : vector<16x16xf32>
    %c69 = arith.constant 69 : index
    %1193 = memref.load %arg2[%c69] : memref<288xf32, #tpu.memory_space<smem>>
    %1194 = vector.broadcast %1193 : f32 to vector<16x16xf32>
    %1195 = arith.mulf %1194, %1188 : vector<16x16xf32>
    %1196 = arith.addf %1160, %1195 : vector<16x16xf32>
    %c105 = arith.constant 105 : index
    %1197 = memref.load %arg2[%c105] : memref<288xf32, #tpu.memory_space<smem>>
    %1198 = vector.broadcast %1197 : f32 to vector<16x16xf32>
    %1199 = arith.mulf %1198, %1188 : vector<16x16xf32>
    %1200 = arith.addf %1164, %1199 : vector<16x16xf32>
    %c141 = arith.constant 141 : index
    %1201 = memref.load %arg2[%c141] : memref<288xf32, #tpu.memory_space<smem>>
    %1202 = vector.broadcast %1201 : f32 to vector<16x16xf32>
    %1203 = arith.mulf %1202, %1188 : vector<16x16xf32>
    %1204 = arith.addf %1168, %1203 : vector<16x16xf32>
    %c177 = arith.constant 177 : index
    %1205 = memref.load %arg2[%c177] : memref<288xf32, #tpu.memory_space<smem>>
    %1206 = vector.broadcast %1205 : f32 to vector<16x16xf32>
    %1207 = arith.mulf %1206, %1188 : vector<16x16xf32>
    %1208 = arith.addf %1172, %1207 : vector<16x16xf32>
    %c213 = arith.constant 213 : index
    %1209 = memref.load %arg2[%c213] : memref<288xf32, #tpu.memory_space<smem>>
    %1210 = vector.broadcast %1209 : f32 to vector<16x16xf32>
    %1211 = arith.mulf %1210, %1188 : vector<16x16xf32>
    %1212 = arith.addf %1176, %1211 : vector<16x16xf32>
    %c249 = arith.constant 249 : index
    %1213 = memref.load %arg2[%c249] : memref<288xf32, #tpu.memory_space<smem>>
    %1214 = vector.broadcast %1213 : f32 to vector<16x16xf32>
    %1215 = arith.mulf %1214, %1188 : vector<16x16xf32>
    %1216 = arith.addf %1180, %1215 : vector<16x16xf32>
    %c285 = arith.constant 285 : index
    %1217 = memref.load %arg2[%c285] : memref<288xf32, #tpu.memory_space<smem>>
    %1218 = vector.broadcast %1217 : f32 to vector<16x16xf32>
    %1219 = arith.mulf %1218, %1188 : vector<16x16xf32>
    %1220 = arith.addf %1184, %1219 : vector<16x16xf32>
    %c2_i32_101 = arith.constant 2 : i32
    %1221 = arith.addi %4, %c2_i32_101 : i32
    %c3_102 = arith.constant 3 : index
    %1222 = arith.index_cast %1221 : i32 to index
    %c1_103 = arith.constant 1 : index
    %1223 = vector.load %arg6[%c3_102, %1222, %c1_103] : memref<4x18x18xf32, #tpu.memory_space<vmem>>, vector<1x16x16xf32>
    %1224 = vector.shape_cast %1223 : vector<1x16x16xf32> to vector<16x16xf32>
    %c34 = arith.constant 34 : index
    %1225 = memref.load %arg2[%c34] : memref<288xf32, #tpu.memory_space<smem>>
    %1226 = vector.broadcast %1225 : f32 to vector<16x16xf32>
    %1227 = arith.mulf %1226, %1224 : vector<16x16xf32>
    %1228 = arith.addf %1192, %1227 : vector<16x16xf32>
    %c70 = arith.constant 70 : index
    %1229 = memref.load %arg2[%c70] : memref<288xf32, #tpu.memory_space<smem>>
    %1230 = vector.broadcast %1229 : f32 to vector<16x16xf32>
    %1231 = arith.mulf %1230, %1224 : vector<16x16xf32>
    %1232 = arith.addf %1196, %1231 : vector<16x16xf32>
    %c106 = arith.constant 106 : index
    %1233 = memref.load %arg2[%c106] : memref<288xf32, #tpu.memory_space<smem>>
    %1234 = vector.broadcast %1233 : f32 to vector<16x16xf32>
    %1235 = arith.mulf %1234, %1224 : vector<16x16xf32>
    %1236 = arith.addf %1200, %1235 : vector<16x16xf32>
    %c142 = arith.constant 142 : index
    %1237 = memref.load %arg2[%c142] : memref<288xf32, #tpu.memory_space<smem>>
    %1238 = vector.broadcast %1237 : f32 to vector<16x16xf32>
    %1239 = arith.mulf %1238, %1224 : vector<16x16xf32>
    %1240 = arith.addf %1204, %1239 : vector<16x16xf32>
    %c178 = arith.constant 178 : index
    %1241 = memref.load %arg2[%c178] : memref<288xf32, #tpu.memory_space<smem>>
    %1242 = vector.broadcast %1241 : f32 to vector<16x16xf32>
    %1243 = arith.mulf %1242, %1224 : vector<16x16xf32>
    %1244 = arith.addf %1208, %1243 : vector<16x16xf32>
    %c214 = arith.constant 214 : index
    %1245 = memref.load %arg2[%c214] : memref<288xf32, #tpu.memory_space<smem>>
    %1246 = vector.broadcast %1245 : f32 to vector<16x16xf32>
    %1247 = arith.mulf %1246, %1224 : vector<16x16xf32>
    %1248 = arith.addf %1212, %1247 : vector<16x16xf32>
    %c250 = arith.constant 250 : index
    %1249 = memref.load %arg2[%c250] : memref<288xf32, #tpu.memory_space<smem>>
    %1250 = vector.broadcast %1249 : f32 to vector<16x16xf32>
    %1251 = arith.mulf %1250, %1224 : vector<16x16xf32>
    %1252 = arith.addf %1216, %1251 : vector<16x16xf32>
    %c286 = arith.constant 286 : index
    %1253 = memref.load %arg2[%c286] : memref<288xf32, #tpu.memory_space<smem>>
    %1254 = vector.broadcast %1253 : f32 to vector<16x16xf32>
    %1255 = arith.mulf %1254, %1224 : vector<16x16xf32>
    %1256 = arith.addf %1220, %1255 : vector<16x16xf32>
    %c2_i32_104 = arith.constant 2 : i32
    %1257 = arith.addi %4, %c2_i32_104 : i32
    %c3_105 = arith.constant 3 : index
    %1258 = arith.index_cast %1257 : i32 to index
    %c2_106 = arith.constant 2 : index
    %1259 = vector.load %arg6[%c3_105, %1258, %c2_106] : memref<4x18x18xf32, #tpu.memory_space<vmem>>, vector<1x16x16xf32>
    %1260 = vector.shape_cast %1259 : vector<1x16x16xf32> to vector<16x16xf32>
    %c35 = arith.constant 35 : index
    %1261 = memref.load %arg2[%c35] : memref<288xf32, #tpu.memory_space<smem>>
    %1262 = vector.broadcast %1261 : f32 to vector<16x16xf32>
    %1263 = arith.mulf %1262, %1260 : vector<16x16xf32>
    %1264 = arith.addf %1228, %1263 : vector<16x16xf32>
    %c71 = arith.constant 71 : index
    %1265 = memref.load %arg2[%c71] : memref<288xf32, #tpu.memory_space<smem>>
    %1266 = vector.broadcast %1265 : f32 to vector<16x16xf32>
    %1267 = arith.mulf %1266, %1260 : vector<16x16xf32>
    %1268 = arith.addf %1232, %1267 : vector<16x16xf32>
    %c107 = arith.constant 107 : index
    %1269 = memref.load %arg2[%c107] : memref<288xf32, #tpu.memory_space<smem>>
    %1270 = vector.broadcast %1269 : f32 to vector<16x16xf32>
    %1271 = arith.mulf %1270, %1260 : vector<16x16xf32>
    %1272 = arith.addf %1236, %1271 : vector<16x16xf32>
    %c143 = arith.constant 143 : index
    %1273 = memref.load %arg2[%c143] : memref<288xf32, #tpu.memory_space<smem>>
    %1274 = vector.broadcast %1273 : f32 to vector<16x16xf32>
    %1275 = arith.mulf %1274, %1260 : vector<16x16xf32>
    %1276 = arith.addf %1240, %1275 : vector<16x16xf32>
    %c179 = arith.constant 179 : index
    %1277 = memref.load %arg2[%c179] : memref<288xf32, #tpu.memory_space<smem>>
    %1278 = vector.broadcast %1277 : f32 to vector<16x16xf32>
    %1279 = arith.mulf %1278, %1260 : vector<16x16xf32>
    %1280 = arith.addf %1244, %1279 : vector<16x16xf32>
    %c215 = arith.constant 215 : index
    %1281 = memref.load %arg2[%c215] : memref<288xf32, #tpu.memory_space<smem>>
    %1282 = vector.broadcast %1281 : f32 to vector<16x16xf32>
    %1283 = arith.mulf %1282, %1260 : vector<16x16xf32>
    %1284 = arith.addf %1248, %1283 : vector<16x16xf32>
    %c251 = arith.constant 251 : index
    %1285 = memref.load %arg2[%c251] : memref<288xf32, #tpu.memory_space<smem>>
    %1286 = vector.broadcast %1285 : f32 to vector<16x16xf32>
    %1287 = arith.mulf %1286, %1260 : vector<16x16xf32>
    %1288 = arith.addf %1252, %1287 : vector<16x16xf32>
    %c287 = arith.constant 287 : index
    %1289 = memref.load %arg2[%c287] : memref<288xf32, #tpu.memory_space<smem>>
    %1290 = vector.broadcast %1289 : f32 to vector<16x16xf32>
    %1291 = arith.mulf %1290, %1260 : vector<16x16xf32>
    %1292 = arith.addf %1256, %1291 : vector<16x16xf32>
    %c0_107 = arith.constant 0 : index
    %1293 = memref.load %arg3[%c0_107] : memref<8xf32, #tpu.memory_space<smem>>
    %1294 = vector.broadcast %1293 : f32 to vector<16x16xf32>
    %1295 = arith.addf %1264, %1294 : vector<16x16xf32>
    %cst = arith.constant 0.000000e+00 : f32
    %1296 = vector.broadcast %cst : f32 to vector<16x16xf32>
    %1297 = arith.maximumf %1295, %1296 : vector<16x16xf32>
    %c0_108 = arith.constant 0 : index
    %c0_109 = arith.constant 0 : index
    %c0_110 = arith.constant 0 : index
    %c0_111 = arith.constant 0 : index
    %1298 = vector.load %arg5[%c0_108, %c0_109, %c0_110, %c0_111] : memref<1x8x16x16xf32, #tpu.memory_space<vmem>>, vector<1x1x16x16xf32>
    %1299 = vector.shape_cast %1298 : vector<1x1x16x16xf32> to vector<16x16xf32>
    %1300 = vector.shape_cast %1297 : vector<16x16xf32> to vector<1x1x16x16xf32>
    tpu.vector_store %arg5[%c0_108, %c0_109, %c0_110, %c0_111], %1300 {strides = array<i32>} : memref<1x8x16x16xf32, #tpu.memory_space<vmem>>, vector<1x1x16x16xf32>,
    %c1_112 = arith.constant 1 : index
    %1301 = memref.load %arg3[%c1_112] : memref<8xf32, #tpu.memory_space<smem>>
    %1302 = vector.broadcast %1301 : f32 to vector<16x16xf32>
    %1303 = arith.addf %1268, %1302 : vector<16x16xf32>
    %cst_113 = arith.constant 0.000000e+00 : f32
    %1304 = vector.broadcast %cst_113 : f32 to vector<16x16xf32>
    %1305 = arith.maximumf %1303, %1304 : vector<16x16xf32>
    %c0_114 = arith.constant 0 : index
    %c1_115 = arith.constant 1 : index
    %c0_116 = arith.constant 0 : index
    %c0_117 = arith.constant 0 : index
    %1306 = vector.load %arg5[%c0_114, %c1_115, %c0_116, %c0_117] : memref<1x8x16x16xf32, #tpu.memory_space<vmem>>, vector<1x1x16x16xf32>
    %1307 = vector.shape_cast %1306 : vector<1x1x16x16xf32> to vector<16x16xf32>
    %1308 = vector.shape_cast %1305 : vector<16x16xf32> to vector<1x1x16x16xf32>
    tpu.vector_store %arg5[%c0_114, %c1_115, %c0_116, %c0_117], %1308 {strides = array<i32>} : memref<1x8x16x16xf32, #tpu.memory_space<vmem>>, vector<1x1x16x16xf32>,
    %c2_118 = arith.constant 2 : index
    %1309 = memref.load %arg3[%c2_118] : memref<8xf32, #tpu.memory_space<smem>>
    %1310 = vector.broadcast %1309 : f32 to vector<16x16xf32>
    %1311 = arith.addf %1272, %1310 : vector<16x16xf32>
    %cst_119 = arith.constant 0.000000e+00 : f32
    %1312 = vector.broadcast %cst_119 : f32 to vector<16x16xf32>
    %1313 = arith.maximumf %1311, %1312 : vector<16x16xf32>
    %c0_120 = arith.constant 0 : index
    %c2_121 = arith.constant 2 : index
    %c0_122 = arith.constant 0 : index
    %c0_123 = arith.constant 0 : index
    %1314 = vector.load %arg5[%c0_120, %c2_121, %c0_122, %c0_123] : memref<1x8x16x16xf32, #tpu.memory_space<vmem>>, vector<1x1x16x16xf32>
    %1315 = vector.shape_cast %1314 : vector<1x1x16x16xf32> to vector<16x16xf32>
    %1316 = vector.shape_cast %1313 : vector<16x16xf32> to vector<1x1x16x16xf32>
    tpu.vector_store %arg5[%c0_120, %c2_121, %c0_122, %c0_123], %1316 {strides = array<i32>} : memref<1x8x16x16xf32, #tpu.memory_space<vmem>>, vector<1x1x16x16xf32>,
    %c3_124 = arith.constant 3 : index
    %1317 = memref.load %arg3[%c3_124] : memref<8xf32, #tpu.memory_space<smem>>
    %1318 = vector.broadcast %1317 : f32 to vector<16x16xf32>
    %1319 = arith.addf %1276, %1318 : vector<16x16xf32>
    %cst_125 = arith.constant 0.000000e+00 : f32
    %1320 = vector.broadcast %cst_125 : f32 to vector<16x16xf32>
    %1321 = arith.maximumf %1319, %1320 : vector<16x16xf32>
    %c0_126 = arith.constant 0 : index
    %c3_127 = arith.constant 3 : index
    %c0_128 = arith.constant 0 : index
    %c0_129 = arith.constant 0 : index
    %1322 = vector.load %arg5[%c0_126, %c3_127, %c0_128, %c0_129] : memref<1x8x16x16xf32, #tpu.memory_space<vmem>>, vector<1x1x16x16xf32>
    %1323 = vector.shape_cast %1322 : vector<1x1x16x16xf32> to vector<16x16xf32>
    %1324 = vector.shape_cast %1321 : vector<16x16xf32> to vector<1x1x16x16xf32>
    tpu.vector_store %arg5[%c0_126, %c3_127, %c0_128, %c0_129], %1324 {strides = array<i32>} : memref<1x8x16x16xf32, #tpu.memory_space<vmem>>, vector<1x1x16x16xf32>,
    %c4_130 = arith.constant 4 : index
    %1325 = memref.load %arg3[%c4_130] : memref<8xf32, #tpu.memory_space<smem>>
    %1326 = vector.broadcast %1325 : f32 to vector<16x16xf32>
    %1327 = arith.addf %1280, %1326 : vector<16x16xf32>
    %cst_131 = arith.constant 0.000000e+00 : f32
    %1328 = vector.broadcast %cst_131 : f32 to vector<16x16xf32>
    %1329 = arith.maximumf %1327, %1328 : vector<16x16xf32>
    %c0_132 = arith.constant 0 : index
    %c4_133 = arith.constant 4 : index
    %c0_134 = arith.constant 0 : index
    %c0_135 = arith.constant 0 : index
    %1330 = vector.load %arg5[%c0_132, %c4_133, %c0_134, %c0_135] : memref<1x8x16x16xf32, #tpu.memory_space<vmem>>, vector<1x1x16x16xf32>
    %1331 = vector.shape_cast %1330 : vector<1x1x16x16xf32> to vector<16x16xf32>
    %1332 = vector.shape_cast %1329 : vector<16x16xf32> to vector<1x1x16x16xf32>
    tpu.vector_store %arg5[%c0_132, %c4_133, %c0_134, %c0_135], %1332 {strides = array<i32>} : memref<1x8x16x16xf32, #tpu.memory_space<vmem>>, vector<1x1x16x16xf32>,
    %c5_136 = arith.constant 5 : index
    %1333 = memref.load %arg3[%c5_136] : memref<8xf32, #tpu.memory_space<smem>>
    %1334 = vector.broadcast %1333 : f32 to vector<16x16xf32>
    %1335 = arith.addf %1284, %1334 : vector<16x16xf32>
    %cst_137 = arith.constant 0.000000e+00 : f32
    %1336 = vector.broadcast %cst_137 : f32 to vector<16x16xf32>
    %1337 = arith.maximumf %1335, %1336 : vector<16x16xf32>
    %c0_138 = arith.constant 0 : index
    %c5_139 = arith.constant 5 : index
    %c0_140 = arith.constant 0 : index
    %c0_141 = arith.constant 0 : index
    %1338 = vector.load %arg5[%c0_138, %c5_139, %c0_140, %c0_141] : memref<1x8x16x16xf32, #tpu.memory_space<vmem>>, vector<1x1x16x16xf32>
    %1339 = vector.shape_cast %1338 : vector<1x1x16x16xf32> to vector<16x16xf32>
    %1340 = vector.shape_cast %1337 : vector<16x16xf32> to vector<1x1x16x16xf32>
    tpu.vector_store %arg5[%c0_138, %c5_139, %c0_140, %c0_141], %1340 {strides = array<i32>} : memref<1x8x16x16xf32, #tpu.memory_space<vmem>>, vector<1x1x16x16xf32>,
    %c6_142 = arith.constant 6 : index
    %1341 = memref.load %arg3[%c6_142] : memref<8xf32, #tpu.memory_space<smem>>
    %1342 = vector.broadcast %1341 : f32 to vector<16x16xf32>
    %1343 = arith.addf %1288, %1342 : vector<16x16xf32>
    %cst_143 = arith.constant 0.000000e+00 : f32
    %1344 = vector.broadcast %cst_143 : f32 to vector<16x16xf32>
    %1345 = arith.maximumf %1343, %1344 : vector<16x16xf32>
    %c0_144 = arith.constant 0 : index
    %c6_145 = arith.constant 6 : index
    %c0_146 = arith.constant 0 : index
    %c0_147 = arith.constant 0 : index
    %1346 = vector.load %arg5[%c0_144, %c6_145, %c0_146, %c0_147] : memref<1x8x16x16xf32, #tpu.memory_space<vmem>>, vector<1x1x16x16xf32>
    %1347 = vector.shape_cast %1346 : vector<1x1x16x16xf32> to vector<16x16xf32>
    %1348 = vector.shape_cast %1345 : vector<16x16xf32> to vector<1x1x16x16xf32>
    tpu.vector_store %arg5[%c0_144, %c6_145, %c0_146, %c0_147], %1348 {strides = array<i32>} : memref<1x8x16x16xf32, #tpu.memory_space<vmem>>, vector<1x1x16x16xf32>,
    %c7_148 = arith.constant 7 : index
    %1349 = memref.load %arg3[%c7_148] : memref<8xf32, #tpu.memory_space<smem>>
    %1350 = vector.broadcast %1349 : f32 to vector<16x16xf32>
    %1351 = arith.addf %1292, %1350 : vector<16x16xf32>
    %cst_149 = arith.constant 0.000000e+00 : f32
    %1352 = vector.broadcast %cst_149 : f32 to vector<16x16xf32>
    %1353 = arith.maximumf %1351, %1352 : vector<16x16xf32>
    %c0_150 = arith.constant 0 : index
    %c7_151 = arith.constant 7 : index
    %c0_152 = arith.constant 0 : index
    %c0_153 = arith.constant 0 : index
    %1354 = vector.load %arg5[%c0_150, %c7_151, %c0_152, %c0_153] : memref<1x8x16x16xf32, #tpu.memory_space<vmem>>, vector<1x1x16x16xf32>
    %1355 = vector.shape_cast %1354 : vector<1x1x16x16xf32> to vector<16x16xf32>
    %1356 = vector.shape_cast %1353 : vector<16x16xf32> to vector<1x1x16x16xf32>
    tpu.vector_store %arg5[%c0_150, %c7_151, %c0_152, %c0_153], %1356 {strides = array<i32>} : memref<1x8x16x16xf32, #tpu.memory_space<vmem>>, vector<1x1x16x16xf32>,
    return
  }
  func.func @transform_0(%arg0: i32, %arg1: i32) -> i32 {
    %c0_i32 = arith.constant 0 : i32
    %c0_i32_0 = arith.constant 0 : i32
    return %c0_i32 : i32
  }
  func.func @transform_1(%arg0: i32, %arg1: i32) -> i32 {
    %c0_i32 = arith.constant 0 : i32
    %c0_i32_0 = arith.constant 0 : i32
    return %c0_i32 : i32
  }
  func.func @transform_2(%arg0: i32, %arg1: i32) -> (i32, i32, i32, i32) {
    %c0_i32 = arith.constant 0 : i32
    %c0_i32_0 = arith.constant 0 : i32
    %c0_i32_1 = arith.constant 0 : i32
    %c0_i32_2 = arith.constant 0 : i32
    return %arg0, %c0_i32, %c0_i32_0, %c0_i32_1 : i32, i32, i32, i32
  }
  func.func @transform_3(%arg0: i32, %arg1: i32) -> (i32, i32, i32, i32) {
    %c0_i32 = arith.constant 0 : i32
    %c0_i32_0 = arith.constant 0 : i32
    %c0_i32_1 = arith.constant 0 : i32
    return %arg0, %c0_i32, %arg1, %c0_i32_0 : i32, i32, i32, i32
  }
}

</mosaic_0001>

<bundles_post_ra>
// kernel: _same_pad_conv2d.1
= control target key start
LH: loop header
LB: loop body
LE: loop exit
PB: predicated region body
PF: predicated region fallthrough
CT: control target
= control target key end

     0   :  { %s7941_s0 = inlined_call_operand.vmem [shape: f32[288], index: 0, kind: input, shape index: {}]   ;;  %s7942_s1 = inlined_call_operand.vmem [shape: f32[8], index: 1, kind: input, shape index: {}]   ;;  %s7943_s2 = inlined_call_operand.vmem [shape: f32[2,4,16,16], index: 2, kind: input, shape index: {}]   ;;  %s7944_s3 = inlined_call_operand.hbm [shape: f32[2,8,16,16], index: 3, kind: output, shape index: {}]  }
   0x1   :  { %7953 = sst [smem:[#allocation12_spill]] %s7941_s0 }
   0x2   :  { %7954 = sst [smem:[#allocation13_spill]] %s7942_s1 }
   0x3   :  { %7955 = sst [smem:[#allocation14_spill]] %s7943_s2 }
   0x4   :  { %8 = vsyncpa [#allocation5], 0 }
   0x5   :  { %9 = vsyncpa [#allocation7], 0 }
   0x6   :  { %10 = vsyncpa [#allocation4], 0 }
   0x7   :  { %12 = vsyncpa [#allocation4 + $0x1], 0  ;;  %s4551_s12 = smov 0   ;;  %s4553_s13 = smov 0  }
   0x8   :  { %s4555_s14 = smov 0   ;;  %s4557_s15 = smov 0  }
   0x9   :  { %s4559_s16 = smov 0   ;;  %s4561_s17 = smov 0  }
   0xa LB: > { %s3975_s18 = sadd.s32 4294967295, %s4520_s17   ;;  %s3976_s19 = sadd.s32 4294967294, %s4520_s17   ;;  %s4520_s17 = sphi %s4561_s17, %s18_s17   ;;  %s4516_s16 = sphi %s4559_s16, %s7974_s16   ;;  %s4512_s15 = sphi %s4557_s15, %s7973_s15   ;;  %s4508_s14 = sphi %s4555_s14, %s7972_s14   ;;  %s4504_s13 = sphi %s4553_s13, %s7971_s13   ;;  %s4500_s12 = sphi %s4551_s12, %s7970_s12  }
   0xb   : > { %s30_s20 = sadd.s32 1, %s4516_s16  ;;  %s107_s21 = sadd.s32 1, %s4508_s14 }
   0xc   : > { %p32_p0 = scmp.ge.s32.totalorder %s30_s20, 2  ;;  %p117_p1 = scmp.ne.s32.totalorder %s4508_s14, %s4504_s13 }
   0xd   : > { %p118_p2 = scmp.eq.s32.totalorder %s3975_s18, 1  ;;  %p123_p3 = scmp.ne.s32.totalorder %s4504_s13, %s4500_s12 }
   0xe   : > { %s7976_s20 = smov (%p32_p0, %s30_s20), 0  ;;  %p124_p5 = scmp.eq.s32.totalorder %s3976_s19, 1 }
   0xf   : > { %p4591_p4 = por %p118_p2, %p117_p1  ;;  %s102_s23 = ssub.s32 %s4516_s16, %s7976_s20 }
  0x10   : > { %p3977_p6 = scmp.ge.s32.totalorder %s4520_s17, 1  ;;  %p105_p7 = scmp.eq.s32.totalorder %s102_s23, 0 }
  0x11   : > { %s7956_s22 = scalar_select %p4591_p4, 1, 0 }
  0x12   : > { %p4598_p8 = por %p124_p5, %p123_p3  ;;  %p131_p9 = scmp.lt.s32.totalorder %s4520_s17, 3 }
  0x13   : > { %s4604_s25 = scalar_select %p105_p7, %s4508_s14, %s107_s21  }
  0x14   : > { %s7957_s24 = scalar_select %p4598_p8, 1, 0 }
  0x15   : > { %p4606_p10 = pnand %p3977_p6, %p131_p9  ;;  %p4610_p11 = scmp.eq.s32.totalorder %s3975_s18, 0 }
  0x16   : > { %s7960_s0 = sld [smem:[#allocation12_spill]] }
  0x17   : > { %s7958_s26 = scalar_select %p4606_p10, 1, 0 }
  0x18   : > { %s7959_s27 = scalar_select %p4610_p11, 1, 0 }
  0x19   : > { %p4334_p12 = pneg %p4606_p10  ;;  %s7961_s1 = sld [smem:[#allocation13_spill]] }
  0x1b   : > { %p4624_p13 = pnand %p4610_p11, %p4334_p12 }
  0x1c   : > { %s144_s30 = sshll.u32 %s7960_s0, 4  ;;  %s145_s30 = int_to_ptr.vmem [resolvable:$true] %s144_s30 }
  0x1d   : > { %s4406_s8 = scalar_lea.vmem %s145_s30, 48  ;;  %p4408_p1 = pneg %p4624_p13 }
  0x1e   : > { %p4407_p0 = scmp.ne.s32.totalorder %s145_s30, %s4406_s8  ;;  %s4413_s9 = scalar_lea.vmem %s145_s30, 64 }
  0x1f   : > { %s155_s6 = sshll.u32 %s7961_s1, 4  ;;  %p4414_p5 = scmp.lt.s32.totalorder %s145_s30, %s145_s30  ;;  %s156_s6 = int_to_ptr.vmem [resolvable:$true] %s155_s6 }
  0x20   : > { %p4409_p2 = pnand %p4408_p1, %p4407_p0  ;;  %p4415_p6 = scmp.lt.s32.totalorder %s4413_s9, %s4406_s8 }
  0x22   : > { %p4410_p3 = pneg %p4409_p2  ;;  %p4416_p7 = por %p4415_p6, %p4414_p5 }
  0x24   : > { %p4417_p9 = pnand %p4416_p7, %p4410_p3 }
  0x26   : > { %4420 = shalt.err (!%p4417_p9)
}
  0x27   : > { %s4522_s10 = smov [#allocation3]   ;;  %s4421_s11 = scalar_lea.vmem %s156_s6, 16 }
  0x28   : > { %4337 = dma.vmem_to_smem (!%p4624_p13), %s145_s30, 48, %s4522_s10, [#allocation5]  }
  0x29   : > { %p4422_p12 = scmp.ne.s32.totalorder %s156_s6, %s4421_s11  ;;  %p4429_p11 = scmp.lt.s32.totalorder %s156_s6, %s156_s6 }
  0x2a   : > { %p4430_p0 = scmp.lt.s32.totalorder %s4421_s11, %s4421_s11 }
  0x2b   : > { %p4424_p8 = pnand %p4422_p12, %p4408_p1 }
  0x2c   : > { %p4431_p2 = por %p4430_p0, %p4429_p11 }
  0x2d   : > { %p4425_p4 = pneg %p4424_p8 }
  0x2f   : > { %p4432_p10 = pnand %p4431_p2, %p4425_p4 }
  0x31   : > { %4435 = shalt.err (!%p4432_p10)
}
  0x32   : > { %s4523_s18 = smov [#allocation6]   ;;  %p7963_p3 = scmp.ne.s32.totalorder %s7958_s26, 0 }
  0x33   : > { %4340 = dma.vmem_to_smem (!%p4624_p13), %s156_s6, 16, %s4523_s18, [#allocation7]  }
  0x34   : > { %176 = sbr.rel (%p7963_p3) target bundleno = 1356 (0x54c), region = 32  ;;  %p7964_p5 = scmp.ne.s32.totalorder (!%p7963_p3), %s7959_s27, 0 }
  0x39   : > { %4487 = dma.done.wait (%p7964_p5), [#allocation5], 48  }
  0x3a   : > { %4489 = vsyncadd (%p7964_p5), [#allocation5], 4294967248 }
  0x3b   : > { %4491 = dma.done.wait (%p7964_p5), [#allocation7], 16  }
  0x3c   : > { %4493 = vsyncadd (%p7964_p5), [#allocation7], 4294967280 }
  0x3d   : > { %186 = sfence }
  0x3e   : > { %p205_p4 = scmp.lt.s32.totalorder %s4512_s15, 1  ;;  %s7965_s2 = sld [smem:[#allocation14_spill]]  ;;  %vm255_vm0 = vcmask 138248   ;;  %vm284_vm1 = vcmask 131080   ;;  %vm373_vm2 = vcmask 7168   ;;  %vm376_vm3 = vcmask 1024  }
  0x3f   : > { %s4524_s27 = smov 1   ;;  %s7949_s29 = smov 126   ;;  %vm447_vm4 = vcmask 146568   ;;  %vm450_vm5 = vcmask 140424   ;;  %vm3763_vm6 = vcmask 130048  }
  0x40   : > { %s206_s19 = scalar_select %p205_p4, %s4512_s15, 1 }
  0x41   : > { %s4526_s30 = smov 2   ;;  %s4725_s4 = sld [smem:[#allocation3 + $0x1]] }
  0x42   : > { %s4322_s21 = sshll.u32 %s206_s19, 6  ;;  %s4728_s5 = sld [smem:[#allocation3 + $0x25]] }
  0x43   : > { %s4731_s6 = sld [smem:[#allocation3 + $0x49]]  ;;  %s7951_s8 = smov 127  }
  0x44   : > { %s4655_s28 = scalar_lea.vmem %s7965_s2, %s4322_s21  ;;  %s4737_s7 = sld [smem:[#allocation3 + $0x6d]] }
  0x45   : > { %v217_v0 = vld [vmem:[%s4655_s28 + $0x10] sm:$0xff]  ;;  %v215_v1 = vld [vmem:[%s4655_s28] sm:$0xff]  ;;  %v218_v2 = vld [vmem:[%s4655_s28 + $0x18] sm:$0xff]  ;;  %s4744_s9 = sld [smem:[#allocation3 + $0x91]]  ;;  %s7966_s0 = smov 127  }
  0x46   : > { %235 = vrot.lane.b32.xlu1 %v217_v0, %s4524_s27  ;;  %231 = vrot.lane.b32.xlu0 %v215_v1, %s4524_s27  ;;  %v216_v3 = vld [vmem:[%s4655_s28 + $0x8] sm:$0xff]  ;;  %v219_v5 = vld [vmem:[%s4655_s28 + $0x20] sm:$0xff]  ;;  %s4749_s10 = sld [smem:[#allocation3 + $0xb5]]  ;;  %p7968_p10 = scmp.ne.s32.totalorder %s7956_s22, 0 }
  0x47   : > { %v220_v4 = vld [vmem:[%s4655_s28 + $0x28] sm:$0xff]  ;;  %v222_v6 = vld [vmem:[%s4655_s28 + $0x38] sm:$0xff]  ;;  %v221_v7 = vld [vmem:[%s4655_s28 + $0x30] sm:$0xff]  ;;  %s4759_s11 = sld [smem:[#allocation3 + $0xd9]] }
  0x48   : > { %v265_v8 = vld [vmem:[%s4655_s28 + $0x11] sm:$0x1]  ;;  %v264_v9 = vld [vmem:[%s4655_s28 + $0x1] sm:$0x1]  ;;  %v290_v12 = vld [vmem:[%s4655_s28 + $0x1e] sm:$0x1] }
  0x49   : > { %v267_v10 = vld [vmem:[%s4655_s28 + $0x31] sm:$0x1]  ;;  %v266_v11 = vld [vmem:[%s4655_s28 + $0x21] sm:$0x1]  ;;  %v289_v13 = vld [vmem:[%s4655_s28 + $0xe] sm:$0x1] }
  0x4a   : > { %237 = vrot.lane.b32.xlu1 %v218_v2, %s4524_s27  ;;  %233 = vrot.lane.b32.xlu0 %v216_v3, %s4524_s27  ;;  %v291_v14 = vld [vmem:[%s4655_s28 + $0x2e] sm:$0x1]  ;;  %v292_v15 = vld [vmem:[%s4655_s28 + $0x3e] sm:$0x1]  ;;  %s4768_s18 = sld [smem:[#allocation3 + $0xfd]] }
  0x4b   : > { %s4777_s19 = sld [smem:[#allocation3 + $0x2]] }
  0x4c   : > { %s4786_s21 = sld [smem:[#allocation3 + $0x26]] }
  0x4d   : > { %s4794_s23 = sld [smem:[#allocation3 + $0x4a]] }
  0x4e   : > { %241 = vrot.lane.b32.xlu1 %v220_v4, %s4524_s27  ;;  %239 = vrot.lane.b32.xlu0 %v219_v5, %s4524_s27  ;;  %v498_v5 = vstv %s4725_s4  ;;  %s4801_s26 = sld [smem:[#allocation3 + $0x6e]] }
  0x4f   : > { %s4808_s28 = sld [smem:[#allocation3 + $0x92]] }
  0x50   : > { %s4829_s4 = sld [smem:[#allocation3 + $0xfe]] }
  0x51   : > { %s5132_s1 = sld [smem:[#allocation3 + $0xb7]] }
  0x52   : > { %245 = vrot.lane.b32.xlu1 %v222_v6, %s4524_s27  ;;  %243 = vrot.lane.b32.xlu0 %v221_v7, %s4524_s27  ;;  %s5159_s2 = sld [smem:[#allocation3 + $0xdb]] }
  0x56   : > { %274 = vrot.lane.b32.xlu1 %v265_v8, %s4524_s27  ;;  %272 = vrot.lane.b32.xlu0 %v264_v9, %s4524_s27  ;;  %v512_v8 = vstv %s4728_s5  ;;  %s4838_s5 = sld [smem:[#allocation3 + $0x4]] }
  0x5a   : > { %278 = vrot.lane.b32.xlu1 %v267_v10, %s4524_s27  ;;  %276 = vrot.lane.b32.xlu0 %v266_v11, %s4524_s27 }
  0x5e   : > { %299 = vrot.lane.b32.xlu1 %v290_v12, %s4524_s27  ;;  %297 = vrot.lane.b32.xlu0 %v289_v13, %s4524_s27  ;;  %v526_v12 = vstv %s4731_s6  ;;  %s4845_s6 = sld [smem:[#allocation3 + $0x28]] }
  0x62   : > { %301 = vrot.lane.b32.xlu0 %v291_v14, %s4524_s27  ;;  %303 = vrot.lane.b32.xlu1 %v292_v15, %s4524_s27  ;;  %v540_v14 = vstv %s4737_s7  ;;  %s4815_s27 = sld [smem:[#allocation3 + $0xb6]] }
  0x63   : > { %s4854_s7 = sld [smem:[#allocation3 + $0x4c]] }
  0xb8   : > { %v236_v16 = vpop.permute.xlu1 %235  ;;  %v232_v17 = vpop.permute.xlu0 %231 }
  0xb9   : > { %258 = vst.msk [vmem:[#allocation2 + $0x19] sm:$0xff] %vm255_vm0, %v236_v16  ;;  %256 = vst.msk [vmem:[#allocation2 + $0x1] sm:$0xff] %vm255_vm0, %v232_v17 }
  0xbc   : > { %v238_v18 = vpop.permute.xlu1 %237  ;;  %v234_v19 = vpop.permute.xlu0 %233 }
  0xbd   : > { %259 = vst.msk [vmem:[#allocation2 + $0x21] sm:$0xff] %vm255_vm0, %v238_v18  ;;  %257 = vst.msk [vmem:[#allocation2 + $0x9] sm:$0xff] %vm255_vm0, %v234_v19 }
  0xc0   : > { %v242_v20 = vpop.permute.xlu1 %241  ;;  %v240_v21 = vpop.permute.xlu0 %239 }
  0xc1   : > { %261 = vst.msk [vmem:[#allocation2 + $0x39] sm:$0xff] %vm255_vm0, %v242_v20  ;;  %260 = vst.msk [vmem:[#allocation2 + $0x31] sm:$0xff] %vm255_vm0, %v240_v21  ;;  %v554_v20 = vstv %s4744_s9  ;;  %s4861_s9 = sld [smem:[#allocation3 + $0x70]] }
  0xc4   : > { %v246_v22 = vpop.permute.xlu1 %245  ;;  %v244_v23 = vpop.permute.xlu0 %243  ;;  %v314_v24 = vld [vmem:[#allocation2 + $0x8] sm:$0xff]  ;;  %v317_v37 = vld [vmem:[#allocation2 + $0x20] sm:$0xff] }
  0xc5   : > { %263 = vst.msk [vmem:[#allocation2 + $0x51] sm:$0xff] %vm255_vm0, %v246_v22  ;;  %262 = vst.msk [vmem:[#allocation2 + $0x49] sm:$0xff] %vm255_vm0, %v244_v23  ;;  %339 = vrot.lane.b32.xlu1 %v314_v24, %s7949_s29 }
  0xc8   : > { %v275_v25 = vpop.permute.xlu1 %274  ;;  %v273_v26 = vpop.permute.xlu0 %272  ;;  %v320_v38 = vld [vmem:[#allocation2 + $0x38] sm:$0xff] }
  0xc9   : > { %286 = vst.msk [vmem:[#allocation2 + $0x18] sm:$0x1] %vm284_vm1, %v275_v25  ;;  %285 = vst.msk [vmem:[#allocation2] sm:$0x1] %vm284_vm1, %v273_v26  ;;  %v568_v25 = vstv %s4749_s10  ;;  %s4868_s10 = sld [smem:[#allocation3 + $0x94]] }
  0xcc   : > { %v279_v27 = vpop.permute.xlu1 %278  ;;  %v277_v28 = vpop.permute.xlu0 %276  ;;  %v323_v43 = vld [vmem:[#allocation2 + $0x50] sm:$0xff] }
  0xcd   : > { %288 = vst.msk [vmem:[#allocation2 + $0x48] sm:$0x1] %vm284_vm1, %v279_v27  ;;  %287 = vst.msk [vmem:[#allocation2 + $0x30] sm:$0x1] %vm284_vm1, %v277_v28 }
  0xd0   : > { %v300_v29 = vpop.permute.xlu1 %299  ;;  %v298_v30 = vpop.permute.xlu0 %297  ;;  %v313_v31 = vld [vmem:[#allocation2] sm:$0xff]  ;;  %v316_v32 = vld [vmem:[#allocation2 + $0x18] sm:$0xff] }
  0xd1   : > { %310 = vst.msk [vmem:[#allocation2 + $0x29] sm:$0x1] %vm284_vm1, %v300_v29  ;;  %309 = vst.msk [vmem:[#allocation2 + $0x11] sm:$0x1] %vm284_vm1, %v298_v30  ;;  %337 = vrot.lane.b32.xlu0 %v313_v31, %s7949_s29  ;;  %343 = vrot.lane.b32.xlu1 %v316_v32, %s7949_s29  ;;  %v582_v30 = vstv %s4759_s11  ;;  %s4877_s11 = sld [smem:[#allocation3 + $0xb8]] }
  0xd4   : > { %v302_v33 = vpop.permute.xlu0 %301  ;;  %v304_v34 = vpop.permute.xlu1 %303  ;;  %v322_v39 = vld [vmem:[#allocation2 + $0x48] sm:$0xff]  ;;  %v319_v40 = vld [vmem:[#allocation2 + $0x30] sm:$0xff] }
  0xd5   : > { %311 = vst.msk [vmem:[#allocation2 + $0x41] sm:$0x1] %vm284_vm1, %v302_v33  ;;  %312 = vst.msk [vmem:[#allocation2 + $0x59] sm:$0x1] %vm284_vm1, %v304_v34 }
  0xd8   : > { %v318_v35 = vld [vmem:[#allocation2 + $0x28] sm:$0x3]  ;;  %v315_v36 = vld [vmem:[#allocation2 + $0x10] sm:$0x3] }
  0xd9   : > { %347 = vrot.lane.b32.xlu1 %v318_v35, %s7949_s29  ;;  %341 = vrot.lane.b32.xlu0 %v315_v36, %s7949_s29  ;;  %v596_v35 = vstv %s4768_s18  ;;  %s4884_s18 = sld [smem:[#allocation3 + $0xdc]] }
  0xdc   : > { %v321_v41 = vld [vmem:[#allocation2 + $0x40] sm:$0x3]  ;;  %v324_v42 = vld [vmem:[#allocation2 + $0x58] sm:$0x3] }
  0xdd   : > { %351 = vrot.lane.b32.xlu1 %v320_v38, %s7949_s29  ;;  %345 = vrot.lane.b32.xlu0 %v317_v37, %s7949_s29 }
  0xe1   : > { %355 = vrot.lane.b32.xlu1 %v322_v39, %s7949_s29  ;;  %349 = vrot.lane.b32.xlu0 %v319_v40, %s7949_s29  ;;  %v610_v39 = vstv %s4777_s19  ;;  %s4891_s19 = sld [smem:[#allocation3 + $0x100]] }
  0xe5   : > { %353 = vrot.lane.b32.xlu0 %v321_v41, %s7949_s29  ;;  %359 = vrot.lane.b32.xlu1 %v324_v42, %s7949_s29  ;;  %v624_v42 = vstv %s4786_s21  ;;  %s4898_s21 = sld [smem:[#allocation3 + $0x5]] }
  0xe9   : > { %357 = vrot.lane.b32.xlu0 %v323_v43, %s7949_s29 }
 0x137   : > { %v340_v44 = vpop.permute.xlu1 %339 }
 0x138   : > { %375 = vst.msk [vmem:[#allocation2 + $0x8] sm:$0xff] %vm373_vm2, %v340_v44 }
 0x13f   : > { %v388_v45 = vld [vmem:[#allocation2 + $0x8] sm:$0xff] }
 0x140   : > { %413 = vrot.lane.b32.xlu1 %v388_v45, %s4526_s30  ;;  %v638_v45 = vstv %s4794_s23  ;;  %s4905_s23 = sld [smem:[#allocation3 + $0x29]] }
 0x143   : > { %v338_v46 = vpop.permute.xlu0 %337  ;;  %v344_v47 = vpop.permute.xlu1 %343 }
 0x144   : > { %374 = vst.msk [vmem:[#allocation2] sm:$0xff] %vm373_vm2, %v338_v46  ;;  %378 = vst.msk [vmem:[#allocation2 + $0x18] sm:$0xff] %vm373_vm2, %v344_v47 }
 0x14b   : > { %v348_v48 = vpop.permute.xlu1 %347  ;;  %v342_v49 = vpop.permute.xlu0 %341  ;;  %v387_v50 = vld [vmem:[#allocation2] sm:$0xff]  ;;  %v390_v51 = vld [vmem:[#allocation2 + $0x18] sm:$0xff] }
 0x14c   : > { %380 = vst.msk [vmem:[#allocation2 + $0x28] sm:$0x3] %vm376_vm3, %v348_v48  ;;  %377 = vst.msk [vmem:[#allocation2 + $0x10] sm:$0x3] %vm376_vm3, %v342_v49  ;;  %411 = vrot.lane.b32.xlu0 %v387_v50, %s4526_s30  ;;  %417 = vrot.lane.b32.xlu1 %v390_v51, %s4526_s30  ;;  %v652_v48 = vstv %s4801_s26  ;;  %v666_v51 = vstv %s4808_s28  ;;  %s4912_s26 = sld [smem:[#allocation3 + $0x4d]] }
 0x14d   : > { %s4919_s28 = sld [smem:[#allocation3 + $0x71]] }
 0x14f   : > { %v352_v52 = vpop.permute.xlu1 %351  ;;  %v346_v53 = vpop.permute.xlu0 %345 }
 0x150   : > { %382 = vst.msk [vmem:[#allocation2 + $0x38] sm:$0xff] %vm373_vm2, %v352_v52  ;;  %379 = vst.msk [vmem:[#allocation2 + $0x20] sm:$0xff] %vm373_vm2, %v346_v53 }
 0x153   : > { %v356_v54 = vpop.permute.xlu1 %355  ;;  %v350_v55 = vpop.permute.xlu0 %349  ;;  %v392_v56 = vld [vmem:[#allocation2 + $0x28] sm:$0x3]  ;;  %v389_v57 = vld [vmem:[#allocation2 + $0x10] sm:$0x3] }
 0x154   : > { %384 = vst.msk [vmem:[#allocation2 + $0x48] sm:$0xff] %vm373_vm2, %v356_v54  ;;  %381 = vst.msk [vmem:[#allocation2 + $0x30] sm:$0xff] %vm373_vm2, %v350_v55  ;;  %421 = vrot.lane.b32.xlu1 %v392_v56, %s4526_s30  ;;  %415 = vrot.lane.b32.xlu0 %v389_v57, %s4526_s30  ;;  %v680_v54 = vstv %s4815_s27  ;;  %s4926_s27 = sld [smem:[#allocation3 + $0x95]] }
 0x157   : > { %v354_v58 = vpop.permute.xlu0 %353  ;;  %v394_v59 = vld [vmem:[#allocation2 + $0x38] sm:$0xff]  ;;  %v391_v60 = vld [vmem:[#allocation2 + $0x20] sm:$0xff]  ;;  %v360_v61 = vpop.permute.xlu1 %359 }
 0x158   : > { %383 = vst.msk [vmem:[#allocation2 + $0x40] sm:$0x3] %vm376_vm3, %v354_v58  ;;  %425 = vrot.lane.b32.xlu1 %v394_v59, %s4526_s30  ;;  %419 = vrot.lane.b32.xlu0 %v391_v60, %s4526_s30  ;;  %386 = vst.msk [vmem:[#allocation2 + $0x58] sm:$0x3] %vm376_vm3, %v360_v61  ;;  %v708_v60 = vstv %s4829_s4  ;;  %s4940_s4 = sld [smem:[#allocation3 + $0xdd]] }
 0x15b   : > { %v358_v62 = vpop.permute.xlu0 %357  ;;  %v396_v63 = vld [vmem:[#allocation2 + $0x48] sm:$0xff]  ;;  %v393_v0 = vld [vmem:[#allocation2 + $0x30] sm:$0xff] }
 0x15c   : > { %385 = vst.msk [vmem:[#allocation2 + $0x50] sm:$0xff] %vm373_vm2, %v358_v62  ;;  %429 = vrot.lane.b32.xlu1 %v396_v63, %s4526_s30  ;;  %423 = vrot.lane.b32.xlu0 %v393_v0, %s4526_s30  ;;  %v774_v0 = vstv %s4838_s5  ;;  %s4947_s5 = sld [smem:[#allocation3 + $0x101]] }
 0x15f   : > { %v395_v1 = vld [vmem:[#allocation2 + $0x40] sm:$0x3]  ;;  %v398_v2 = vld [vmem:[#allocation2 + $0x58] sm:$0x3] }
 0x160   : > { %427 = vrot.lane.b32.xlu0 %v395_v1, %s4526_s30  ;;  %433 = vrot.lane.b32.xlu1 %v398_v2, %s4526_s30 }
 0x163   : > { %v397_v3 = vld [vmem:[#allocation2 + $0x50] sm:$0xff] }
 0x164   : > { %431 = vrot.lane.b32.xlu0 %v397_v3, %s4526_s30  ;;  %s4822_s30 = sld [smem:[#allocation3 + $0xda]]  ;;  %v788_v3 = vstv %s4845_s6 }
 0x165   : > { %s4956_s6 = sld [smem:[#allocation3 + $0x7]] }
 0x16a   : > { %v694_v57 = vstv %s4822_s30  ;;  %s4933_s30 = sld [smem:[#allocation3 + $0xb9]] }
 0x1b2   : > { %v414_v4 = vpop.permute.xlu1 %413 }
 0x1b3   : > { %449 = vst.msk [vmem:[#allocation2 + $0x8] sm:$0xff] %vm447_vm4, %v414_v4 }
 0x1ba   : > { %v4733_v6 = vld [vmem:[#allocation2 + $0x8] sm:$0xff] }
 0x1bb   : > { %v500_v7 = vmul.f32 %v498_v5, %v4733_v6  ;;  %v514_v11 = vmul.f32 %v512_v8, %v4733_v6  ;;  %v528_v13 = vmul.f32 %v526_v12, %v4733_v6  ;;  %v542_v18 = vmul.f32 %v540_v14, %v4733_v6 }
 0x1bc   : > { %v556_v23 = vmul.f32 %v554_v20, %v4733_v6  ;;  %v570_v28 = vmul.f32 %v568_v25, %v4733_v6  ;;  %v584_v33 = vmul.f32 %v582_v30, %v4733_v6  ;;  %v598_v37 = vmul.f32 %v596_v35, %v4733_v6 }
 0x1bd   : > { %505 = vrot.lane.b32.xlu1 %v500_v7, %s7951_s8  ;;  %v612_v40 = vmul.f32 %v610_v39, %v4733_v6  ;;  %v626_v43 = vmul.f32 %v624_v42, %v4733_v6  ;;  %v640_v46 = vmul.f32 %v638_v45, %v4733_v6  ;;  %v654_v49 = vmul.f32 %v652_v48, %v4733_v6 }
 0x1be   : > { %v412_v9 = vpop.permute.xlu0 %411  ;;  %v418_v10 = vpop.permute.xlu1 %417  ;;  %v668_v52 = vmul.f32 %v666_v51, %v4733_v6  ;;  %v682_v55 = vmul.f32 %v680_v54, %v4733_v6  ;;  %v696_v58 = vmul.f32 %v694_v57, %v4733_v6  ;;  %v710_v61 = vmul.f32 %v708_v60, %v4733_v6 }
 0x1bf   : > { %448 = vst.msk [vmem:[#allocation2] sm:$0xff] %vm447_vm4, %v412_v9  ;;  %452 = vst.msk [vmem:[#allocation2 + $0x18] sm:$0xff] %vm447_vm4, %v418_v10  ;;  %v802_v7 = vstv %s4854_s7  ;;  %s4965_s7 = sld [smem:[#allocation3 + $0x2b]] }
 0x1c1   : > { %519 = vrot.lane.b32.xlu1 %v514_v11, %s7951_s8  ;;  %v816_v11 = vstv %s4861_s9  ;;  %s4976_s9 = sld [smem:[#allocation3 + $0x4f]] }
 0x1c5   : > { %533 = vrot.lane.b32.xlu1 %v528_v13, %s7951_s8 }
 0x1c6   : > { %v4752_v15 = vld [vmem:[#allocation2] sm:$0xff]  ;;  %v422_v16 = vpop.permute.xlu1 %421  ;;  %v416_v17 = vpop.permute.xlu0 %415 }
 0x1c7   : > { %454 = vst.msk [vmem:[#allocation2 + $0x28] sm:$0x3] %vm450_vm5, %v422_v16  ;;  %451 = vst.msk [vmem:[#allocation2 + $0x10] sm:$0x3] %vm450_vm5, %v416_v17  ;;  %v499_v19 = vmul.f32 %v498_v5, %v4752_v15  ;;  %v513_v24 = vmul.f32 %v512_v8, %v4752_v15  ;;  %v527_v29 = vmul.f32 %v526_v12, %v4752_v15  ;;  %v4872_v10 = vld [vmem:[#allocation2 + $0x1] sm:$0xff] }
 0x1c8   : > { %v541_v34 = vmul.f32 %v540_v14, %v4752_v15  ;;  %v555_v38 = vmul.f32 %v554_v20, %v4752_v15  ;;  %v569_v41 = vmul.f32 %v568_v25, %v4752_v15  ;;  %v583_v44 = vmul.f32 %v582_v30, %v4752_v15 }
 0x1c9   : > { %547 = vrot.lane.b32.xlu1 %v542_v18, %s7951_s8  ;;  %503 = vrot.lane.b32.xlu0 %v499_v19, %s7951_s8  ;;  %v597_v47 = vmul.f32 %v596_v35, %v4752_v15  ;;  %v611_v50 = vmul.f32 %v610_v39, %v4752_v15  ;;  %v625_v53 = vmul.f32 %v624_v42, %v4752_v15  ;;  %v830_v14 = vstv %s4868_s10  ;;  %s4987_s10 = sld [smem:[#allocation3 + $0x73]] }
 0x1ca   : > { %v426_v21 = vpop.permute.xlu1 %425  ;;  %v420_v22 = vpop.permute.xlu0 %419  ;;  %v639_v56 = vmul.f32 %v638_v45, %v4752_v15  ;;  %v653_v59 = vmul.f32 %v652_v48, %v4752_v15  ;;  %v667_v62 = vmul.f32 %v666_v51, %v4752_v15  ;;  %v681_v1 = vmul.f32 %v680_v54, %v4752_v15 }
 0x1cb   : > { %456 = vst.msk [vmem:[#allocation2 + $0x38] sm:$0xff] %vm447_vm4, %v426_v21  ;;  %453 = vst.msk [vmem:[#allocation2 + $0x20] sm:$0xff] %vm447_vm4, %v420_v22  ;;  %v695_v4 = vmul.f32 %v694_v57, %v4752_v15  ;;  %v709_v8 = vmul.f32 %v708_v60, %v4752_v15  ;;  %v775_v12 = vmul.f32 %v4872_v10, %v774_v0  ;;  %v844_v18 = vstv %s4877_s11  ;;  %s4995_s11 = sld [smem:[#allocation3]] }
 0x1cc   : > { %v789_v16 = vmul.f32 %v4872_v10, %v788_v3  ;;  %v803_v19 = vmul.f32 %v4872_v10, %v802_v7  ;;  %v858_v21 = vstv %s4884_s18  ;;  %v817_v22 = vmul.f32 %v4872_v10, %v816_v11  ;;  %s5000_s18 = sld [smem:[#allocation3 + $0x97]] }
 0x1cd   : > { %561 = vrot.lane.b32.xlu1 %v556_v23, %s7951_s8  ;;  %517 = vrot.lane.b32.xlu0 %v513_v24, %s7951_s8  ;;  %v872_v24 = vstv %s4891_s19  ;;  %v831_v25 = vmul.f32 %v4872_v10, %v830_v14  ;;  %v900_v30 = vstv %s4905_s23  ;;  %s5010_s19 = sld [smem:[#allocation3 + $0x24]] }
 0x1ce   : > { %v430_v26 = vpop.permute.xlu1 %429  ;;  %v424_v27 = vpop.permute.xlu0 %423  ;;  %v4849_v63 = vld [vmem:[#allocation2 + $0x9] sm:$0xff]  ;;  %v942_v39 = vstv %s4926_s27  ;;  %v956_v42 = vstv %s4933_s30  ;;  %v1064_v60 = vstv %s4965_s7  ;;  %s5017_s23 = sld [smem:[#allocation3 + $0xbb]] }
 0x1cf   : > { %458 = vst.msk [vmem:[#allocation2 + $0x48] sm:$0xff] %vm447_vm4, %v430_v26  ;;  %455 = vst.msk [vmem:[#allocation2 + $0x30] sm:$0xff] %vm447_vm4, %v424_v27  ;;  %v776_v2 = vmul.f32 %v4849_v63, %v774_v0  ;;  %v790_v5 = vmul.f32 %v4849_v63, %v788_v3  ;;  %v804_v9 = vmul.f32 %v4849_v63, %v802_v7  ;;  %v886_v27 = vstv %s4898_s21  ;;  %v4971_v54 = vld [vmem:[#allocation2 + $0xa] sm:$0xff]  ;;  %s5012_s21 = sld [smem:[#allocation3 + $0x48]] }
 0x1d0   : > { %v818_v13 = vmul.f32 %v4849_v63, %v816_v11  ;;  %v832_v17 = vmul.f32 %v4849_v63, %v830_v14  ;;  %v846_v20 = vmul.f32 %v4849_v63, %v844_v18  ;;  %v860_v23 = vmul.f32 %v4849_v63, %v858_v21  ;;  %s5030_s27 = sld [smem:[#allocation3 + $0x90]] }
 0x1d1   : > { %575 = vrot.lane.b32.xlu1 %v570_v28, %s7951_s8  ;;  %531 = vrot.lane.b32.xlu0 %v527_v29, %s7951_s8  ;;  %v874_v26 = vmul.f32 %v4849_v63, %v872_v24  ;;  %v845_v28 = vmul.f32 %v4872_v10, %v844_v18  ;;  %v888_v29 = vmul.f32 %v4849_v63, %v886_v27  ;;  %s5035_s30 = sld [smem:[#allocation3 + $0xdf]] }
 0x1d2   : > { %v428_v31 = vpop.permute.xlu0 %427  ;;  %v434_v32 = vpop.permute.xlu1 %433  ;;  %v958_v45 = vmul.f32 %v4849_v63, %v956_v42  ;;  %s5057_s7 = sld [smem:[#allocation3 + $0x103]] }
 0x1d3   : > { %457 = vst.msk [vmem:[#allocation2 + $0x40] sm:$0x3] %vm450_vm5, %v428_v31  ;;  %460 = vst.msk [vmem:[#allocation2 + $0x58] sm:$0x3] %vm450_vm5, %v434_v32  ;;  %v859_v31 = vmul.f32 %v4872_v10, %v858_v21  ;;  %v902_v32 = vmul.f32 %v4849_v63, %v900_v30 }
 0x1d5   : > { %589 = vrot.lane.b32.xlu1 %v584_v33, %s7951_s8  ;;  %545 = vrot.lane.b32.xlu0 %v541_v34, %s7951_s8  ;;  %v914_v33 = vstv %s4912_s26  ;;  %v873_v34 = vmul.f32 %v4872_v10, %v872_v24  ;;  %s5025_s26 = sld [smem:[#allocation3 + $0x3]] }
 0x1d6   : > { %v432_v36 = vpop.permute.xlu0 %431  ;;  %v916_v35 = vmul.f32 %v4849_v63, %v914_v33 }
 0x1d7   : > { %459 = vst.msk [vmem:[#allocation2 + $0x50] sm:$0xff] %vm447_vm4, %v432_v36  ;;  %v928_v36 = vstv %s4919_s28  ;;  %s5027_s28 = sld [smem:[#allocation3 + $0x6c]] }
 0x1d8   : > { %v929_v48 = vmul.f32 %v4872_v10, %v928_v36 }
 0x1d9   : > { %603 = vrot.lane.b32.xlu1 %v598_v37, %s7951_s8  ;;  %559 = vrot.lane.b32.xlu0 %v555_v38, %s7951_s8  ;;  %v887_v37 = vmul.f32 %v4872_v10, %v886_v27  ;;  %v930_v38 = vmul.f32 %v4849_v63, %v928_v36  ;;  %v1134_v36 = vstv %s5035_s30  ;;  %s5209_s30 = sld [smem:[#allocation3 + $0xff]] }
 0x1dd   : > { %617 = vrot.lane.b32.xlu1 %v612_v40, %s7949_s29  ;;  %573 = vrot.lane.b32.xlu0 %v569_v41, %s7951_s8  ;;  %v901_v40 = vmul.f32 %v4872_v10, %v900_v30  ;;  %v944_v41 = vmul.f32 %v4849_v63, %v942_v39  ;;  %v726_v30 = vstv %s5025_s26  ;;  %s5093_s26 = sld [smem:[#allocation3 + $0x2c]] }
 0x1e1   : > { %631 = vrot.lane.b32.xlu1 %v626_v43, %s7949_s29  ;;  %587 = vrot.lane.b32.xlu0 %v583_v44, %s7951_s8  ;;  %v915_v44 = vmul.f32 %v4872_v10, %v914_v33  ;;  %v728_v33 = vmul.f32 %v4849_v63, %v726_v30 }
 0x1e5   : > { %645 = vrot.lane.b32.xlu1 %v640_v46, %s7949_s29  ;;  %601 = vrot.lane.b32.xlu0 %v597_v47, %s7951_s8  ;;  %v970_v46 = vstv %s4940_s4  ;;  %s5043_s4 = sld [smem:[#allocation3 + $0x27]] }
 0x1e6   : > { %v971_v0 = vmul.f32 %v4872_v10, %v970_v46 }
 0x1e9   : > { %659 = vrot.lane.b32.xlu1 %v654_v49, %s7949_s29  ;;  %615 = vrot.lane.b32.xlu0 %v611_v50, %s7949_s29  ;;  %v972_v49 = vmul.f32 %v4849_v63, %v970_v46  ;;  %v984_v50 = vstv %s4947_s5  ;;  %s5048_s5 = sld [smem:[#allocation3 + $0xb4]]  ;;  %v478_v46 = vstv %s5027_s28 }
 0x1ea   : > { %s5223_s28 = sld [smem:[#allocation3 + $0xbc]] }
 0x1ed   : > { %673 = vrot.lane.b32.xlu1 %v668_v52, %s7949_s29  ;;  %629 = vrot.lane.b32.xlu0 %v625_v53, %s7949_s29  ;;  %v943_v52 = vmul.f32 %v4872_v10, %v942_v39  ;;  %v986_v53 = vmul.f32 %v4849_v63, %v984_v50 }
 0x1f1   : > { %687 = vrot.lane.b32.xlu1 %v682_v55, %s7949_s29  ;;  %643 = vrot.lane.b32.xlu0 %v639_v56, %s7949_s29  ;;  %v1050_v55 = vstv %s4956_s6  ;;  %s5051_s6 = sld [smem:[#allocation3 + $0xd8]] }
 0x1f5   : > { %701 = vrot.lane.b32.xlu1 %v696_v58, %s7949_s29  ;;  %657 = vrot.lane.b32.xlu0 %v653_v59, %s7949_s29  ;;  %v957_v58 = vmul.f32 %v4872_v10, %v956_v42  ;;  %v1052_v59 = vmul.f32 %v4971_v54, %v1050_v55  ;;  %v732_v42 = vstv %s5043_s4  ;;  %s5333_s4 = sld [smem:[#allocation3 + $0x76]] }
 0x1f9   : > { %715 = vrot.lane.b32.xlu1 %v710_v61, %s7949_s29  ;;  %671 = vrot.lane.b32.xlu0 %v667_v62, %s7949_s29 }
 0x1fd   : > { %685 = vrot.lane.b32.xlu0 %v681_v1, %s7949_s29  ;;  %781 = vrot.lane.b32.xlu1 %v776_v2, %s7951_s8  ;;  %v1066_v1 = vmul.f32 %v4971_v54, %v1064_v60  ;;  %v1078_v2 = vstv %s4976_s9  ;;  %s5064_s9 = sld [smem:[#allocation3 + $0x4b]] }
 0x1fe   : > { %v1080_v7 = vmul.f32 %v4971_v54, %v1078_v2 }
 0x201   : > { %699 = vrot.lane.b32.xlu0 %v695_v4, %s7949_s29  ;;  %795 = vrot.lane.b32.xlu1 %v790_v5, %s7951_s8  ;;  %v985_v5 = vmul.f32 %v4872_v10, %v984_v50  ;;  %v1148_v50 = vstv %s5057_s7  ;;  %s5367_s7 = sld [smem:[#allocation3 + $0x6]] }
 0x205   : > { %713 = vrot.lane.b32.xlu0 %v709_v8, %s7949_s29  ;;  %809 = vrot.lane.b32.xlu1 %v804_v9, %s7951_s8  ;;  %v5008_v8 = vld [vmem:[#allocation2 + $0x2] sm:$0xff]  ;;  %v1092_v9 = vstv %s4987_s10  ;;  %s5069_s10 = sld [smem:[#allocation3 + $0xfc]] }
 0x206   : > { %v1094_v14 = vmul.f32 %v4971_v54, %v1092_v9 }
 0x209   : > { %779 = vrot.lane.b32.xlu0 %v775_v12, %s7951_s8  ;;  %823 = vrot.lane.b32.xlu1 %v818_v13, %s7951_s8  ;;  %v1051_v13 = vmul.f32 %v5008_v8, %v1050_v55 }
 0x20d   : > { %793 = vrot.lane.b32.xlu0 %v789_v16, %s7951_s8  ;;  %837 = vrot.lane.b32.xlu1 %v832_v17, %s7951_s8  ;;  %v466_v16 = vstv %s4995_s11  ;;  %v1106_v17 = vstv %s5000_s18  ;;  %s5075_s18 = sld [smem:[#allocation3 + $0x8]] }
 0x20e   : > { %v1108_v21 = vmul.f32 %v4971_v54, %v1106_v17  ;;  %s5149_s11 = sld [smem:[#allocation3 + $0x74]] }
 0x211   : > { %807 = vrot.lane.b32.xlu0 %v803_v19, %s7951_s8  ;;  %851 = vrot.lane.b32.xlu1 %v846_v20, %s7951_s8  ;;  %v1065_v20 = vmul.f32 %v5008_v8, %v1064_v60  ;;  %v1150_v60 = vmul.f32 %v4971_v54, %v1148_v50 }
 0x215   : > { %821 = vrot.lane.b32.xlu0 %v817_v22, %s7951_s8  ;;  %865 = vrot.lane.b32.xlu1 %v860_v23, %s7951_s8  ;;  %v468_v22 = vmul.f32 %v466_v16, %v4733_v6  ;;  %v470_v23 = vstv %s5010_s19  ;;  %s7967_s19 = smov 126  }
 0x219   : > { %835 = vrot.lane.b32.xlu0 %v831_v25, %s7951_s8  ;;  %879 = vrot.lane.b32.xlu1 %v874_v26, %s7951_s8  ;;  %v1120_v25 = vstv %s5017_s23  ;;  %s5081_s23 = sld [smem:[#allocation3 + $0x6f]] }
 0x21d   : > { %849 = vrot.lane.b32.xlu0 %v845_v28, %s7951_s8  ;;  %893 = vrot.lane.b32.xlu1 %v888_v29, %s7949_s29  ;;  %v1079_v28 = vmul.f32 %v5008_v8, %v1078_v2  ;;  %v1122_v29 = vmul.f32 %v4971_v54, %v1120_v25 }
 0x221   : > { %863 = vrot.lane.b32.xlu0 %v859_v31, %s7951_s8  ;;  %907 = vrot.lane.b32.xlu1 %v902_v32, %s7949_s29  ;;  %v472_v31 = vmul.f32 %v470_v23, %v4733_v6 }
 0x225   : > { %877 = vrot.lane.b32.xlu0 %v873_v34, %s7951_s8  ;;  %921 = vrot.lane.b32.xlu1 %v916_v35, %s7949_s29  ;;  %v474_v34 = vstv %s5012_s21  ;;  %s5188_s21 = sld [smem:[#allocation3 + $0x98]] }
 0x229   : > { %891 = vrot.lane.b32.xlu0 %v887_v37, %s7949_s29  ;;  %935 = vrot.lane.b32.xlu1 %v930_v38, %s7949_s29 }
 0x22d   : > { %905 = vrot.lane.b32.xlu0 %v901_v40, %s7949_s29  ;;  %949 = vrot.lane.b32.xlu1 %v944_v41, %s7949_s29  ;;  %v1093_v40 = vmul.f32 %v5008_v8, %v1092_v9  ;;  %v1136_v41 = vmul.f32 %v4971_v54, %v1134_v36  ;;  %v1162_v9 = vstv %s5075_s18  ;;  %s5383_s18 = sld [smem:[#allocation3 + $0x106]] }
 0x22f   : > { %v4949_v43 = vpop.permute.xlu1 %505 }
 0x230   : > { %v510_v24 = vadd.f32 %v4949_v43, %v468_v22  ;;  %v476_v43 = vmul.f32 %v474_v34, %v4733_v6 }
 0x231   : > { %919 = vrot.lane.b32.xlu0 %v915_v44, %s7949_s29  ;;  %963 = vrot.lane.b32.xlu1 %v958_v45, %s7949_s29  ;;  %v734_v45 = vmul.f32 %v4849_v63, %v732_v42 }
 0x233   : > { %v4958_v47 = vpop.permute.xlu1 %519 }
 0x234   : > { %v524_v35 = vadd.f32 %v4958_v47, %v472_v31  ;;  %v482_v47 = vstv %s5030_s27  ;;  %s5270_s27 = sld [smem:[#allocation3 + $0x104]] }
 0x235   : > { %933 = vrot.lane.b32.xlu0 %v929_v48, %s7949_s29  ;;  %977 = vrot.lane.b32.xlu1 %v972_v49, %s7949_s29  ;;  %v486_v49 = vstv %s5048_s5  ;;  %s5344_s5 = sld [smem:[#allocation3 + $0x9a]] }
 0x237   : > { %v4967_v51 = vpop.permute.xlu1 %533 }
 0x238   : > { %v538_v48 = vadd.f32 %v4967_v51, %v476_v43  ;;  %v480_v51 = vmul.f32 %v478_v46, %v4733_v6 }
 0x239   : > { %947 = vrot.lane.b32.xlu0 %v943_v52, %s7949_s29  ;;  %991 = vrot.lane.b32.xlu1 %v986_v53, %s7949_s29  ;;  %v490_v53 = vstv %s5051_s6  ;;  %s5357_s6 = sld [smem:[#allocation3 + $0xbe]] }
 0x23b   : > { %v4978_v56 = vpop.permute.xlu1 %547  ;;  %v4980_v57 = vpop.permute.xlu0 %503 }
 0x23d   : > { %961 = vrot.lane.b32.xlu0 %v957_v58, %s7949_s29  ;;  %1057 = vrot.lane.b32.xlu1 %v1052_v59, %s7951_s8  ;;  %v1107_v59 = vmul.f32 %v5008_v8, %v1106_v17  ;;  %v744_v17 = vstv %s5081_s23  ;;  %s5394_s23 = sld [smem:[#allocation3 + $0x4e]] }
 0x23f   : > { %v4989_v61 = vpop.permute.xlu1 %561  ;;  %v4991_v62 = vpop.permute.xlu0 %517 }
 0x241   : > { %975 = vrot.lane.b32.xlu0 %v971_v0, %s7949_s29  ;;  %1071 = vrot.lane.b32.xlu1 %v1066_v1, %s7951_s8  ;;  %v738_v0 = vstv %s5064_s9  ;;  %v467_v1 = vmul.f32 %v466_v16, %v4752_v15  ;;  %s5370_s9 = sld [smem:[#allocation3 + $0xe2]] }
 0x243   : > { %v5002_v3 = vpop.permute.xlu1 %575  ;;  %v5004_v4 = vpop.permute.xlu0 %531 }
 0x245   : > { %989 = vrot.lane.b32.xlu0 %v985_v5, %s7949_s29  ;;  %1085 = vrot.lane.b32.xlu1 %v1080_v7, %s7951_s8  ;;  %s5102_s29 = sld [smem:[#allocation3 + $0x93]]  ;;  %v740_v5 = vmul.f32 %v4849_v63, %v738_v0  ;;  %v494_v7 = vstv %s5069_s10 }
 0x246   : > { %s5380_s10 = sld [smem:[#allocation3 + $0x2a]] }
 0x247   : > { %v5019_v11 = vpop.permute.xlu1 %589  ;;  %v5021_v12 = vpop.permute.xlu0 %545 }
 0x249   : > { %1055 = vrot.lane.b32.xlu0 %v1051_v13, %s7951_s8  ;;  %1099 = vrot.lane.b32.xlu1 %v1094_v14, %s7951_s8  ;;  %v552_v13 = vadd.f32 %v4978_v56, %v480_v51  ;;  %v509_v14 = vadd.f32 %v4980_v57, %v467_v1  ;;  %v1164_v56 = vmul.f32 %v4971_v54, %v1162_v9 }
 0x24b   : > { %v5037_v18 = vpop.permute.xlu1 %603  ;;  %v5039_v19 = vpop.permute.xlu0 %559  ;;  %v750_v31 = vstv %s5102_s29  ;;  %s5285_s29 = sld [smem:[#allocation3 + $0xa]] }
 0x24d   : > { %1069 = vrot.lane.b32.xlu0 %v1065_v20, %s7951_s8  ;;  %1113 = vrot.lane.b32.xlu1 %v1108_v21, %s7951_s8  ;;  %v484_v20 = vmul.f32 %v482_v47, %v4733_v6  ;;  %v471_v21 = vmul.f32 %v470_v23, %v4752_v15  ;;  %v727_v23 = vmul.f32 %v4872_v10, %v726_v30 }
 0x24e   : > { %v488_v30 = vmul.f32 %v486_v49, %v4733_v6 }
 0x24f   : > { %v618_v26 = vpop.permute.xlu1 %617  ;;  %v5059_v27 = vpop.permute.xlu0 %573 }
 0x250   : > { %v622_v32 = vadd.f32 %v618_v26, %v510_v24  ;;  %v1121_v26 = vmul.f32 %v5008_v8, %v1120_v25  ;;  %v1176_v25 = vstv %s5093_s26  ;;  %s5397_s26 = sld [smem:[#allocation3 + $0xb]] }
 0x251   : > { %1083 = vrot.lane.b32.xlu0 %v1079_v28, %s7951_s8  ;;  %1127 = vrot.lane.b32.xlu1 %v1122_v29, %s7951_s8  ;;  %v746_v29 = vmul.f32 %v4849_v63, %v744_v17 }
 0x252   : > { %v5079_v37 = vadd.f32 %v728_v33, %v622_v32  ;;  %v566_v32 = vadd.f32 %v4989_v61, %v484_v20  ;;  %v523_v33 = vadd.f32 %v4991_v62, %v471_v21  ;;  %v1135_v61 = vmul.f32 %v5008_v8, %v1134_v36 }
 0x253   : > { %v632_v38 = vpop.permute.xlu1 %631  ;;  %v5083_v39 = vpop.permute.xlu0 %587  ;;  %v1178_v62 = vmul.f32 %v4971_v54, %v1176_v25  ;;  %v756_v36 = vstv %s5132_s1  ;;  %s5303_s1 = sld [smem:[#allocation3 + $0x2e]] }
 0x254   : > { %v636_v44 = vadd.f32 %v632_v38, %v524_v35  ;;  %v758_v21 = vmul.f32 %v4849_v63, %v756_v36 }
 0x255   : > { %1097 = vrot.lane.b32.xlu0 %v1093_v40, %s7951_s8  ;;  %1141 = vrot.lane.b32.xlu1 %v1136_v41, %s7951_s8  ;;  %s5123_s8 = sld [smem:[#allocation3 + $0x50]]  ;;  %v475_v40 = vmul.f32 %v474_v34, %v4752_v15  ;;  %v733_v34 = vmul.f32 %v4872_v10, %v732_v42  ;;  %v492_v42 = vmul.f32 %v490_v53, %v4733_v6 }
 0x256   : > { %v5107_v52 = vadd.f32 %v734_v45, %v636_v44 }
 0x257   : > { %v646_v55 = vpop.permute.xlu1 %645  ;;  %v5110_v58 = vpop.permute.xlu0 %601 }
 0x258   : > { %v650_v2 = vadd.f32 %v646_v55, %v538_v48  ;;  %v752_v48 = vmul.f32 %v4849_v63, %v750_v31 }
 0x259   : > { %1111 = vrot.lane.b32.xlu0 %v1107_v59, %s7966_s0  ;;  %1155 = vrot.lane.b32.xlu1 %v1150_v60, %s7966_s0  ;;  %v580_v59 = vadd.f32 %v5002_v3, %v488_v30  ;;  %v537_v60 = vadd.f32 %v5004_v4, %v475_v40 }
 0x25a   : > { %v5136_v16 = vadd.f32 %v740_v5, %v650_v2  ;;  %v479_v2 = vmul.f32 %v478_v46, %v4752_v15  ;;  %v739_v46 = vmul.f32 %v4872_v10, %v738_v0  ;;  %v496_v0 = vmul.f32 %v494_v7, %v4733_v6 }
 0x25b   : > { %v660_v22 = vpop.permute.xlu1 %659  ;;  %v616_v24 = vpop.permute.xlu0 %615  ;;  %v1190_v55 = vstv %s5123_s8  ;;  %v745_v6 = vmul.f32 %v4872_v10, %v744_v17  ;;  %v487_v17 = vmul.f32 %v486_v49, %v4752_v15  ;;  %s5319_s8 = sld [smem:[#allocation3 + $0x52]] }
 0x25c   : > { %v664_v57 = vadd.f32 %v660_v22, %v552_v13  ;;  %v621_v28 = vadd.f32 %v616_v24, %v509_v14  ;;  %v1149_v14 = vmul.f32 %v5008_v8, %v1148_v50  ;;  %v1192_v3 = vmul.f32 %v4971_v54, %v1190_v55 }
 0x25d   : > { %1125 = vrot.lane.b32.xlu0 %v1121_v26, %s7966_s0  ;;  %1169 = vrot.lane.b32.xlu1 %v1164_v56, %s7967_s19  ;;  %v1204_v50 = vstv %s5149_s11  ;;  %v762_v22 = vstv %s5159_s2  ;;  %v594_v24 = vadd.f32 %v5019_v11, %v492_v42  ;;  %v551_v26 = vadd.f32 %v5021_v12, %v479_v2  ;;  %s5248_s2 = sld [smem:[#allocation3 + $0xe0]] }
 0x25e   : > { %v5163_v35 = vadd.f32 %v746_v29, %v664_v57  ;;  %v5165_v38 = vadd.f32 %v727_v23, %v621_v28  ;;  %v483_v28 = vmul.f32 %v482_v47, %v4752_v15  ;;  %v1163_v11 = vmul.f32 %v5008_v8, %v1162_v9  ;;  %s5406_s11 = sld [smem:[#allocation3 + $0x72]] }
 0x25f   : > { %v674_v41 = vpop.permute.xlu1 %673  ;;  %v630_v43 = vpop.permute.xlu0 %629  ;;  %v1206_v12 = vmul.f32 %v4971_v54, %v1204_v50  ;;  %v764_v30 = vmul.f32 %v4849_v63, %v762_v22  ;;  %v1218_v47 = vstv %s5188_s21  ;;  %v608_v40 = vadd.f32 %v5037_v18, %v496_v0  ;;  %s5412_s21 = sld [smem:[#allocation3 + $0x2f]] }
 0x260   : > { %v678_v44 = vadd.f32 %v674_v41, %v566_v32  ;;  %v635_v45 = vadd.f32 %v630_v43, %v523_v33  ;;  %v565_v9 = vadd.f32 %v5039_v19, %v483_v28  ;;  %v1220_v18 = vmul.f32 %v4971_v54, %v1218_v47 }
 0x261   : > { %1139 = vrot.lane.b32.xlu0 %v1135_v61, %s7966_s0  ;;  %1183 = vrot.lane.b32.xlu1 %v1178_v62, %s7967_s19  ;;  %v579_v49 = vadd.f32 %v5059_v27, %v487_v17  ;;  %v491_v27 = vmul.f32 %v490_v53, %v4752_v15  ;;  %v1205_v53 = vmul.f32 %v5008_v8, %v1204_v50  ;;  %v1260_v0 = vstv %s5270_s27  ;;  %s5449_s27 = sld [smem:[#allocation3 + $0x77]] }
 0x262   : > { %v5193_v51 = vadd.f32 %v752_v48, %v678_v44  ;;  %v5195_v1 = vadd.f32 %v733_v34, %v635_v45  ;;  %v1177_v44 = vmul.f32 %v5008_v8, %v1176_v25  ;;  %v768_v45 = vstv %s5209_s30  ;;  %s5423_s30 = sld [smem:[#allocation3 + $0x96]] }
 0x263   : > { %v688_v5 = vpop.permute.xlu1 %687  ;;  %v644_v13 = vpop.permute.xlu0 %643  ;;  %v770_v34 = vmul.f32 %v4849_v63, %v768_v45  ;;  %v1232_v25 = vstv %s5223_s28  ;;  %s5429_s28 = sld [smem:[#allocation3 + $0x53]] }
 0x264   : > { %v692_v4 = vadd.f32 %v688_v5, %v580_v59  ;;  %v649_v20 = vadd.f32 %v644_v13, %v537_v60  ;;  %v751_v59 = vmul.f32 %v4872_v10, %v750_v31  ;;  %v1191_v31 = vmul.f32 %v5008_v8, %v1190_v55 }
 0x265   : > { %1153 = vrot.lane.b32.xlu0 %v1149_v14, %s7966_s0  ;;  %1197 = vrot.lane.b32.xlu1 %v1192_v3, %s7967_s19  ;;  %v1234_v5 = vmul.f32 %v4971_v54, %v1232_v25  ;;  %v757_v14 = vmul.f32 %v4872_v10, %v756_v36  ;;  %v593_v3 = vadd.f32 %v5083_v39, %v491_v27 }
 0x266   : > { %v5225_v56 = vadd.f32 %v758_v21, %v692_v4  ;;  %v5227_v57 = vadd.f32 %v739_v46, %v649_v20  ;;  %v1246_v4 = vstv %s5248_s2  ;;  %v495_v36 = vmul.f32 %v494_v7, %v4752_v15  ;;  %s5442_s2 = sld [smem:[#allocation3 + $0xba]] }
 0x267   : > { %v702_v29 = vpop.permute.xlu1 %701  ;;  %v658_v23 = vpop.permute.xlu0 %657  ;;  %v1248_v46 = vmul.f32 %v4971_v54, %v1246_v4  ;;  %v1262_v15 = vmul.f32 %v4971_v54, %v1260_v0  ;;  %v1219_v7 = vmul.f32 %v5008_v8, %v1218_v47  ;;  %v1340_v47 = vstv %s5303_s1  ;;  %s5471_s1 = sld [smem:[#allocation3 + $0x9b]] }
 0x268   : > { %v706_v32 = vadd.f32 %v702_v29, %v594_v24  ;;  %v663_v33 = vadd.f32 %v658_v23, %v551_v26  ;;  %v763_v26 = vmul.f32 %v4872_v10, %v762_v22  ;;  %v607_v39 = vadd.f32 %v5110_v58, %v495_v36  ;;  %v5316_v23 = vld [vmem:[#allocation2 + $0x20] sm:$0xff] }
 0x269   : > { %1167 = vrot.lane.b32.xlu0 %v1163_v11, %s7967_s19  ;;  %1211 = vrot.lane.b32.xlu1 %v1206_v12, %s7967_s19  ;;  %v1326_v11 = vstv %s5285_s29  ;;  %v769_v12 = vmul.f32 %v4872_v10, %v768_v45  ;;  %v1247_v17 = vmul.f32 %v5008_v8, %v1246_v4  ;;  %v1261_v45 = vmul.f32 %v5008_v8, %v1260_v0  ;;  %s5464_s29 = sld [smem:[#allocation3 + $0xde]] }
 0x26a   : > { %v5250_v41 = vadd.f32 %v764_v30, %v706_v32  ;;  %v5252_v43 = vadd.f32 %v745_v6, %v663_v33  ;;  %v1328_v30 = vmul.f32 %v5316_v23, %v1326_v11  ;;  %v1233_v6 = vmul.f32 %v5008_v8, %v1232_v25 }
 0x26b   : > { %v716_v61 = vpop.permute.xlu1 %715  ;;  %v672_v62 = vpop.permute.xlu0 %671  ;;  %v1002_v36 = vstv %s5367_s7  ;;  %s5553_s7 = sld [smem:[#allocation3 + $0xd]] }
 0x26c   : > { %v720_v19 = vadd.f32 %v716_v61, %v608_v40  ;;  %v677_v48 = vadd.f32 %v672_v62, %v565_v9  ;;  %v1342_v9 = vmul.f32 %v5316_v23, %v1340_v47  ;;  %v1354_v61 = vstv %s5319_s8  ;;  %s5486_s8 = sld [smem:[#allocation3 + $0x102]] }
 0x26d   : > { %1181 = vrot.lane.b32.xlu0 %v1177_v44, %s7967_s19  ;;  %1225 = vrot.lane.b32.xlu1 %v1220_v18, %s7967_s19  ;;  %v1356_v18 = vmul.f32 %v5316_v23, %v1354_v61 }
 0x26e   : > { %v5272_v60 = vadd.f32 %v770_v34, %v720_v19  ;;  %v5274_v42 = vadd.f32 %v751_v59, %v677_v48  ;;  %v5354_v19 = vld [vmem:[#allocation2 + $0x18] sm:$0xff]  ;;  %v1368_v48 = vstv %s5333_s4  ;;  %s5493_s4 = sld [smem:[#allocation3 + $0xbf]] }
 0x26f   : > { %v5276_v2 = vpop.permute.xlu1 %781  ;;  %v686_v63 = vpop.permute.xlu0 %685  ;;  %v1327_v25 = vmul.f32 %v5354_v19, %v1326_v11 }
 0x270   : > { %v691_v13 = vadd.f32 %v686_v63, %v579_v49  ;;  %v1370_v49 = vmul.f32 %v5316_v23, %v1368_v48  ;;  %v1382_v63 = vstv %s5344_s5  ;;  %s5514_s5 = sld [smem:[#allocation3 + $0xe3]] }
 0x271   : > { %1195 = vrot.lane.b32.xlu0 %v1191_v31, %s7967_s19  ;;  %1239 = vrot.lane.b32.xlu1 %v1234_v5, %s7967_s19  ;;  %v1384_v27 = vmul.f32 %v5316_v23, %v1382_v63 }
 0x272   : > { %v5294_v55 = vadd.f32 %v757_v14, %v691_v13  ;;  %v1341_v13 = vmul.f32 %v5354_v19, %v1340_v47  ;;  %v1396_v14 = vstv %s5357_s6  ;;  %s5534_s6 = sld [smem:[#allocation3 + $0x107]] }
 0x273   : > { %v5296_v20 = vpop.permute.xlu1 %795  ;;  %v700_v21 = vpop.permute.xlu0 %699 }
 0x274   : > { %v705_v24 = vadd.f32 %v700_v21, %v593_v3  ;;  %v786_v3 = vadd.f32 %v5276_v2, %v5079_v37  ;;  %v800_v37 = vadd.f32 %v5296_v20, %v5107_v52 }
 0x275   : > { %1209 = vrot.lane.b32.xlu0 %v1205_v53, %s7967_s19  ;;  %1253 = vrot.lane.b32.xlu1 %v1248_v46, %s7967_s19  ;;  %v1398_v53 = vmul.f32 %v5316_v23, %v1396_v14  ;;  %v1355_v46 = vmul.f32 %v5354_v19, %v1354_v61  ;;  %v1014_v61 = vstv %s5394_s23  ;;  %s5608_s23 = sld [smem:[#allocation3 + $0x9d]] }
 0x276   : > { %v5310_v28 = vadd.f32 %v763_v26, %v705_v24  ;;  %v1410_v26 = vstv %s5370_s9  ;;  %s5567_s9 = sld [smem:[#allocation3 + $0x31]] }
 0x277   : > { %v5312_v50 = vpop.permute.xlu1 %809  ;;  %v714_v29 = vpop.permute.xlu0 %713 }
 0x278   : > { %v719_v22 = vadd.f32 %v714_v29, %v607_v39  ;;  %v1004_v39 = vmul.f32 %v4971_v54, %v1002_v36  ;;  %v814_v20 = vadd.f32 %v5312_v50, %v5136_v16  ;;  %v1016_v16 = vmul.f32 %v4971_v54, %v1014_v61 }
 0x279   : > { %1267 = vrot.lane.b32.xlu1 %v1262_v15, %s7967_s19  ;;  %1223 = vrot.lane.b32.xlu0 %v1219_v7, %s7967_s19  ;;  %v1412_v15 = vmul.f32 %v5316_v23, %v1410_v26  ;;  %v1369_v7 = vmul.f32 %v5354_v19, %v1368_v48 }
 0x27a   : > { %v5324_v58 = vadd.f32 %v769_v12, %v719_v22  ;;  %v1008_v22 = vstv %s5380_s10  ;;  %v1424_v12 = vstv %s5383_s18  ;;  %s5583_s10 = sld [smem:[#allocation3 + $0x55]] }
 0x27b   : > { %v5326_v32 = vpop.permute.xlu1 %823  ;;  %v5328_v33 = vpop.permute.xlu0 %779  ;;  %v1010_v52 = vmul.f32 %v4971_v54, %v1008_v22  ;;  %s5597_s18 = sld [smem:[#allocation3 + $0x79]] }
 0x27c   : > { %v828_v50 = vadd.f32 %v5326_v32, %v5163_v35  ;;  %v785_v48 = vadd.f32 %v5328_v33, %v5165_v38  ;;  %v1003_v33 = vmul.f32 %v5008_v8, %v1002_v36 }
 0x27d   : > { %1333 = vrot.lane.b32.xlu1 %v1328_v30, %s7966_s0  ;;  %1237 = vrot.lane.b32.xlu0 %v1233_v6, %s7967_s19 }
 0x27f   : > { %v5337_v10 = vpop.permute.xlu1 %837  ;;  %v5339_v40 = vpop.permute.xlu0 %793 }
 0x281   : > { %1347 = vrot.lane.b32.xlu1 %v1342_v9, %s7966_s0  ;;  %1251 = vrot.lane.b32.xlu0 %v1247_v17, %s7967_s19  ;;  %v1426_v9 = vmul.f32 %v5316_v23, %v1424_v12  ;;  %v1383_v17 = vmul.f32 %v5354_v19, %v1382_v63 }
 0x283   : > { %v5348_v62 = vpop.permute.xlu1 %851  ;;  %v5350_v44 = vpop.permute.xlu0 %807 }
 0x285   : > { %1361 = vrot.lane.b32.xlu1 %v1356_v18, %s7966_s0  ;;  %1265 = vrot.lane.b32.xlu0 %v1261_v45, %s7967_s19  ;;  %v1438_v45 = vstv %s5397_s26  ;;  %s5621_s26 = sld [smem:[#allocation3 + $0xc1]] }
 0x287   : > { %v5361_v34 = vpop.permute.xlu1 %865  ;;  %v5363_v59 = vpop.permute.xlu0 %821 }
 0x289   : > { %1375 = vrot.lane.b32.xlu1 %v1370_v49, %s7966_s0  ;;  %1331 = vrot.lane.b32.xlu0 %v1327_v25, %s7966_s0 }
 0x28b   : > { %v5374_v31 = vpop.permute.xlu1 %879  ;;  %v5376_v5 = vpop.permute.xlu0 %835 }
 0x28d   : > { %1389 = vrot.lane.b32.xlu1 %v1384_v27, %s7966_s0  ;;  %1345 = vrot.lane.b32.xlu0 %v1341_v13, %s7966_s0  ;;  %v1440_v27 = vmul.f32 %v5316_v23, %v1438_v45  ;;  %v1397_v13 = vmul.f32 %v5354_v19, %v1396_v14  ;;  %v842_v14 = vadd.f32 %v5337_v10, %v5193_v51  ;;  %v1026_v51 = vstv %s5423_s30  ;;  %s5638_s30 = sld [smem:[#allocation3 + $0x2d]] }
 0x28f   : > { %v894_v4 = vpop.permute.xlu1 %893  ;;  %v5389_v21 = vpop.permute.xlu0 %849 }
 0x290   : > { %v898_v24 = vadd.f32 %v894_v4, %v786_v3  ;;  %v1452_v3 = vstv %s5412_s21  ;;  %v1020_v4 = vstv %s5406_s11  ;;  %s5625_s11 = sld [smem:[#allocation3 + $0x9]] }
 0x291   : > { %1403 = vrot.lane.b32.xlu1 %v1398_v53, %s7966_s0  ;;  %1359 = vrot.lane.b32.xlu0 %v1355_v46, %s7966_s0  ;;  %v1022_v38 = vmul.f32 %v4971_v54, %v1020_v4  ;;  %v799_v53 = vadd.f32 %v5339_v40, %v5195_v1  ;;  %v1454_v36 = vmul.f32 %v5316_v23, %v1452_v3  ;;  %s5634_s21 = sld [smem:[#allocation3 + $0xe5]] }
 0x292   : > { %v5404_v2 = vadd.f32 %v1004_v39, %v898_v24  ;;  %v1028_v40 = vmul.f32 %v4971_v54, %v1026_v51 }
 0x293   : > { %v908_v0 = vpop.permute.xlu1 %907  ;;  %v5408_v29 = vpop.permute.xlu0 %863 }
 0x294   : > { %v912_v11 = vadd.f32 %v908_v0, %v800_v37  ;;  %v1411_v0 = vmul.f32 %v5354_v19, %v1410_v26  ;;  %v856_v26 = vadd.f32 %v5348_v62, %v5225_v56  ;;  %v1032_v56 = vstv %s5442_s2  ;;  %s5652_s2 = sld [smem:[#allocation3 + $0x51]] }
 0x295   : > { %1417 = vrot.lane.b32.xlu1 %v1412_v15, %s7966_s0  ;;  %1373 = vrot.lane.b32.xlu0 %v1369_v7, %s7966_s0  ;;  %v1466_v15 = vstv %s5429_s28  ;;  %v1009_v7 = vmul.f32 %v5008_v8, %v1008_v22  ;;  %s5647_s28 = sld [smem:[#allocation3 + $0x109]] }
 0x296   : > { %v5421_v30 = vadd.f32 %v1010_v52, %v912_v11  ;;  %v813_v11 = vadd.f32 %v5350_v44, %v5227_v57  ;;  %v1468_v22 = vmul.f32 %v5316_v23, %v1466_v15  ;;  %v1034_v44 = vmul.f32 %v4971_v54, %v1032_v56 }
 0x297   : > { %v922_v6 = vpop.permute.xlu1 %921  ;;  %v5425_v47 = vpop.permute.xlu0 %877 }
 0x298   : > { %v926_v18 = vadd.f32 %v922_v6, %v814_v20 }
 0x299   : > { %1431 = vrot.lane.b32.xlu1 %v1426_v9, %s7966_s0  ;;  %1387 = vrot.lane.b32.xlu0 %v1383_v17, %s7966_s0  ;;  %v1425_v17 = vmul.f32 %v5354_v19, %v1424_v12  ;;  %v870_v12 = vadd.f32 %v5361_v34, %v5250_v41  ;;  %v1021_v34 = vmul.f32 %v5008_v8, %v1020_v4 }
 0x29a   : > { %v5440_v49 = vadd.f32 %v1016_v16, %v926_v18  ;;  %v1480_v18 = vstv %s5449_s27  ;;  %v1015_v16 = vmul.f32 %v5008_v8, %v1014_v61  ;;  %v1439_v61 = vmul.f32 %v5354_v19, %v1438_v45  ;;  %s5661_s27 = sld [smem:[#allocation3 + $0xe]] }
 0x29b   : > { %v936_v25 = vpop.permute.xlu1 %935  ;;  %v892_v63 = vpop.permute.xlu0 %891  ;;  %v841_v45 = vadd.f32 %v5376_v5, %v5274_v42  ;;  %v1453_v4 = vmul.f32 %v5354_v19, %v1452_v3  ;;  %v855_v5 = vadd.f32 %v5389_v21, %v5294_v55  ;;  %v869_v55 = vadd.f32 %v5408_v29, %v5310_v28 }
 0x29c   : > { %v940_v35 = vadd.f32 %v936_v25, %v828_v50  ;;  %v897_v32 = vadd.f32 %v892_v63, %v785_v48  ;;  %v827_v50 = vadd.f32 %v5363_v59, %v5252_v43  ;;  %v884_v59 = vadd.f32 %v5374_v31, %v5272_v60 }
 0x29d   : > { %1445 = vrot.lane.b32.xlu1 %v1440_v27, %s7967_s19  ;;  %1401 = vrot.lane.b32.xlu0 %v1397_v13, %s7966_s0  ;;  %v1482_v13 = vmul.f32 %v5316_v23, %v1480_v18  ;;  %v1027_v31 = vmul.f32 %v5008_v8, %v1026_v51  ;;  %v883_v28 = vadd.f32 %v5425_v47, %v5324_v58 }
 0x29e   : > { %v5460_v46 = vadd.f32 %v1022_v38, %v940_v35  ;;  %v5462_v24 = vadd.f32 %v1003_v33, %v897_v32  ;;  %v1494_v35 = vstv %s5471_s1  ;;  %v1038_v32 = vstv %s5464_s29  ;;  %s5667_s29 = sld [smem:[#allocation3 + $0x75]] }
 0x29f   : > { %v950_v39 = vpop.permute.xlu1 %949  ;;  %v906_v37 = vpop.permute.xlu0 %905  ;;  %v1040_v43 = vmul.f32 %v4971_v54, %v1038_v32  ;;  %s5677_s1 = sld [smem:[#allocation3 + $0x32]] }
 0x2a0   : > { %v954_v1 = vadd.f32 %v950_v39, %v842_v14  ;;  %v911_v10 = vadd.f32 %v906_v37, %v799_v53  ;;  %v1496_v37 = vmul.f32 %v5316_v23, %v1494_v35 }
 0x2a1   : > { %1459 = vrot.lane.b32.xlu1 %v1454_v36, %s7967_s19  ;;  %1415 = vrot.lane.b32.xlu0 %v1411_v0, %s7966_s0  ;;  %v1508_v36 = vstv %s5493_s4  ;;  %v1044_v0 = vstv %s5486_s8  ;;  %s5684_s8 = sld [smem:[#allocation3 + $0x99]] }
 0x2a2   : > { %v5482_v52 = vadd.f32 %v1028_v40, %v954_v1  ;;  %v5484_v20 = vadd.f32 %v1009_v7, %v911_v10  ;;  %v1046_v42 = vmul.f32 %v4971_v54, %v1044_v0  ;;  %v1467_v54 = vmul.f32 %v5354_v19, %v1466_v15  ;;  %s5694_s4 = sld [smem:[#allocation3 + $0x56]] }
 0x2a3   : > { %v964_v6 = vpop.permute.xlu1 %963  ;;  %v920_v9 = vpop.permute.xlu0 %919 }
 0x2a4   : > { %v968_v57 = vadd.f32 %v964_v6, %v856_v26  ;;  %v925_v62 = vadd.f32 %v920_v9, %v813_v11  ;;  %v1510_v26 = vmul.f32 %v5316_v23, %v1508_v36  ;;  %v1522_v11 = vstv %s5514_s5  ;;  %s5703_s5 = sld [smem:[#allocation3 + $0xbd]] }
 0x2a5   : > { %1473 = vrot.lane.b32.xlu1 %v1468_v22, %s7967_s19  ;;  %1429 = vrot.lane.b32.xlu0 %v1425_v17, %s7966_s0  ;;  %v1033_v6 = vmul.f32 %v5008_v8, %v1032_v56  ;;  %v1524_v15 = vmul.f32 %v5316_v23, %v1522_v11  ;;  %v1481_v17 = vmul.f32 %v5354_v19, %v1480_v18 }
 0x2a6   : > { %v5504_v48 = vadd.f32 %v1034_v44, %v968_v57  ;;  %v5506_v25 = vadd.f32 %v1015_v16, %v925_v62  ;;  %v1536_v62 = vstv %s5534_s6  ;;  %v1039_v56 = vmul.f32 %v5008_v8, %v1038_v32  ;;  %s5716_s6 = sld [smem:[#allocation3 + $0x7a]] }
 0x2a7   : > { %v978_v63 = vpop.permute.xlu1 %977  ;;  %v934_v27 = vpop.permute.xlu0 %933  ;;  %v1538_v18 = vmul.f32 %v5316_v23, %v1536_v62  ;;  %v1509_v32 = vmul.f32 %v5354_v19, %v1508_v36  ;;  %v1644_v36 = vstv %s5597_s18  ;;  %s5764_s18 = sld [smem:[#allocation3 + $0xc2]] }
 0x2a8   : > { %v982_v38 = vadd.f32 %v978_v63, %v870_v12  ;;  %v939_v41 = vadd.f32 %v934_v27, %v827_v50  ;;  %v1495_v12 = vmul.f32 %v5354_v19, %v1494_v35  ;;  %v5580_v50 = vld [vmem:[#allocation2 + $0x21] sm:$0xff]  ;;  %v1602_v27 = vstv %s5553_s7  ;;  %s5725_s7 = sld [smem:[#allocation3 + $0xe1]] }
 0x2a9   : > { %1487 = vrot.lane.b32.xlu1 %v1482_v13, %s7967_s19  ;;  %1443 = vrot.lane.b32.xlu0 %v1439_v61, %s7967_s19  ;;  %v1045_v13 = vmul.f32 %v5008_v8, %v1044_v0  ;;  %v1604_v35 = vmul.f32 %v5580_v50, %v1602_v27 }
 0x2aa   : > { %v5524_v33 = vadd.f32 %v1040_v43, %v982_v38  ;;  %v5526_v14 = vadd.f32 %v1021_v34, %v939_v41  ;;  %v1616_v38 = vstv %s5567_s9  ;;  %v1523_v34 = vmul.f32 %v5354_v19, %v1522_v11  ;;  %s5740_s9 = sld [smem:[#allocation3 + $0x9e]] }
 0x2ab   : > { %v992_v53 = vpop.permute.xlu1 %991  ;;  %v948_v39 = vpop.permute.xlu0 %947  ;;  %v1618_v43 = vmul.f32 %v5580_v50, %v1616_v38  ;;  %v1278_v11 = vstv %s5625_s11  ;;  %s5829_s11 = sld [smem:[#allocation3 + $0x10]] }
 0x2ac   : > { %v996_v1 = vadd.f32 %v992_v53, %v884_v59  ;;  %v953_v60 = vadd.f32 %v948_v39, %v841_v45  ;;  %v1630_v59 = vstv %s5583_s10  ;;  %s5749_s10 = sld [smem:[#allocation3 + $0x105]] }
 0x2ad   : > { %1501 = vrot.lane.b32.xlu1 %v1496_v37, %s7967_s19  ;;  %1457 = vrot.lane.b32.xlu0 %v1453_v4, %s7967_s19  ;;  %v1632_v39 = vmul.f32 %v5580_v50, %v1630_v59  ;;  %v1537_v37 = vmul.f32 %v5354_v19, %v1536_v62  ;;  %v5618_v4 = vld [vmem:[#allocation2 + $0x19] sm:$0xff]  ;;  %v1686_v62 = vstv %s5634_s21  ;;  %s5843_s21 = sld [smem:[#allocation3 + $0x34]] }
 0x2ae   : > { %v5542_v3 = vadd.f32 %v1046_v42, %v996_v1  ;;  %v5544_v10 = vadd.f32 %v1027_v31, %v953_v60  ;;  %v1646_v60 = vmul.f32 %v5580_v50, %v1644_v36  ;;  %v1603_v42 = vmul.f32 %v5618_v4, %v1602_v27 }
 0x2af   : > { %v5546_v40 = vpop.permute.xlu1 %1057  ;;  %v962_v7 = vpop.permute.xlu0 %961  ;;  %v1658_v31 = vstv %s5608_s23  ;;  %s5786_s23 = sld [smem:[#allocation3 + $0xe6]] }
 0x2b0   : > { %v967_v51 = vadd.f32 %v962_v7, %v855_v5 }
 0x2b1   : > { %1515 = vrot.lane.b32.xlu1 %v1510_v26, %s7967_s19  ;;  %1471 = vrot.lane.b32.xlu0 %v1467_v54, %s7967_s19  ;;  %v1660_v26 = vmul.f32 %v5580_v50, %v1658_v31  ;;  %v1617_v54 = vmul.f32 %v5618_v4, %v1616_v38 }
 0x2b2   : > { %v5560_v21 = vadd.f32 %v1033_v6, %v967_v51  ;;  %v1672_v51 = vstv %s5621_s26  ;;  %v1062_v6 = vadd.f32 %v5546_v40, %v5404_v2  ;;  %v1284_v2 = vstv %s5638_s30  ;;  %s5808_s26 = sld [smem:[#allocation3 + $0x10a]] }
 0x2b3   : > { %v5562_v9 = vpop.permute.xlu1 %1071  ;;  %v976_v22 = vpop.permute.xlu0 %975  ;;  %s5859_s30 = sld [smem:[#allocation3 + $0x58]] }
 0x2b4   : > { %v981_v57 = vadd.f32 %v976_v22, %v869_v55  ;;  %v1076_v40 = vadd.f32 %v5562_v9, %v5421_v30  ;;  %v1290_v30 = vstv %s5652_s2  ;;  %s5884_s2 = sld [smem:[#allocation3 + $0xa0]] }
 0x2b5   : > { %1529 = vrot.lane.b32.xlu1 %v1524_v15, %s7967_s19  ;;  %1485 = vrot.lane.b32.xlu0 %v1481_v17, %s7967_s19  ;;  %v1674_v15 = vmul.f32 %v5580_v50, %v1672_v51  ;;  %v1631_v17 = vmul.f32 %v5618_v4, %v1630_v59  ;;  %v1659_v59 = vmul.f32 %v5618_v4, %v1658_v31 }
 0x2b6   : > { %v5574_v29 = vadd.f32 %v1039_v56, %v981_v57  ;;  %v1280_v56 = vmul.f32 %v5316_v23, %v1278_v11 }
 0x2b7   : > { %v5576_v44 = vpop.permute.xlu1 %1085  ;;  %v990_v16 = vpop.permute.xlu0 %989 }
 0x2b8   : > { %v995_v63 = vadd.f32 %v990_v16, %v883_v28  ;;  %v1090_v9 = vadd.f32 %v5576_v44, %v5440_v49  ;;  %v1296_v49 = vstv %s5667_s29  ;;  %s5901_s29 = sld [smem:[#allocation3 + $0xc]] }
 0x2b9   : > { %1543 = vrot.lane.b32.xlu1 %v1538_v18, %s7967_s19  ;;  %1499 = vrot.lane.b32.xlu0 %v1495_v12, %s7967_s19  ;;  %v1688_v12 = vmul.f32 %v5580_v50, %v1686_v62 }
 0x2ba   : > { %v5588_v58 = vadd.f32 %v1045_v13, %v995_v63  ;;  %v1645_v63 = vmul.f32 %v5618_v4, %v1644_v36  ;;  %v1700_v13 = vstv %s5647_s28  ;;  %v1292_v36 = vmul.f32 %v5316_v23, %v1290_v30  ;;  %s5873_s28 = sld [smem:[#allocation3 + $0x7c]] }
 0x2bb   : > { %v5590_v47 = vpop.permute.xlu1 %1099  ;;  %v5592_v61 = vpop.permute.xlu0 %1055 }
 0x2bc   : > { %v1104_v44 = vadd.f32 %v5590_v47, %v5460_v46  ;;  %v1298_v46 = vmul.f32 %v5316_v23, %v1296_v49  ;;  %v1302_v47 = vstv %s5684_s8  ;;  %s5914_s8 = sld [smem:[#allocation3 + $0x30]] }
 0x2bd   : > { %1609 = vrot.lane.b32.xlu1 %v1604_v35, %s7966_s0  ;;  %1513 = vrot.lane.b32.xlu0 %v1509_v32, %s7967_s19  ;;  %v1286_v35 = vmul.f32 %v5316_v23, %v1284_v2 }
 0x2bf   : > { %v5601_v8 = vpop.permute.xlu1 %1113  ;;  %v5603_v41 = vpop.permute.xlu0 %1069 }
 0x2c1   : > { %1623 = vrot.lane.b32.xlu1 %v1618_v43, %s7966_s0  ;;  %1527 = vrot.lane.b32.xlu0 %v1523_v34, %s7967_s19  ;;  %v1702_v34 = vmul.f32 %v5580_v50, %v1700_v13 }
 0x2c3   : > { %v5612_v45 = vpop.permute.xlu1 %1127  ;;  %v5614_v53 = vpop.permute.xlu0 %1083 }
 0x2c5   : > { %1637 = vrot.lane.b32.xlu1 %v1632_v39, %s7966_s0  ;;  %1541 = vrot.lane.b32.xlu0 %v1537_v37, %s7967_s19  ;;  %v1714_v37 = vstv %s5661_s27  ;;  %s5897_s27 = sld [smem:[#allocation3 + $0xc4]] }
 0x2c7   : > { %v5627_v0 = vpop.permute.xlu1 %1141  ;;  %v5629_v1 = vpop.permute.xlu0 %1097 }
 0x2c9   : > { %1651 = vrot.lane.b32.xlu1 %v1646_v60, %s7966_s0  ;;  %1607 = vrot.lane.b32.xlu0 %v1603_v42, %s7966_s0  ;;  %v1061_v60 = vadd.f32 %v5592_v61, %v5462_v24  ;;  %v1279_v24 = vmul.f32 %v5354_v19, %v1278_v11  ;;  %v1118_v61 = vadd.f32 %v5601_v8, %v5482_v52 }
 0x2cb   : > { %v5640_v5 = vpop.permute.xlu1 %1155  ;;  %v5642_v7 = vpop.permute.xlu0 %1111 }
 0x2cd   : > { %1665 = vrot.lane.b32.xlu1 %v1660_v26, %s7966_s0  ;;  %1621 = vrot.lane.b32.xlu0 %v1617_v54, %s7966_s0  ;;  %v1716_v54 = vmul.f32 %v5580_v50, %v1714_v37 }
 0x2cf   : > { %v1170_v55 = vpop.permute.xlu1 %1169  ;;  %v5656_v22 = vpop.permute.xlu0 %1125 }
 0x2d0   : > { %v1174_v57 = vadd.f32 %v1170_v55, %v1062_v6  ;;  %v1673_v6 = vmul.f32 %v5618_v4, %v1672_v51  ;;  %v1728_v55 = vstv %s5677_s1  ;;  %v1075_v51 = vadd.f32 %v5603_v41, %v5484_v20  ;;  %s5910_s1 = sld [smem:[#allocation3 + $0xe8]] }
 0x2d1   : > { %1679 = vrot.lane.b32.xlu1 %v1674_v15, %s7966_s0  ;;  %1635 = vrot.lane.b32.xlu0 %v1631_v17, %s7966_s0  ;;  %v1304_v20 = vmul.f32 %v5316_v23, %v1302_v47  ;;  %v1285_v41 = vmul.f32 %v5354_v19, %v1284_v2 }
 0x2d2   : > { %v5671_v28 = vadd.f32 %v1280_v56, %v1174_v57 }
 0x2d3   : > { %v1184_v16 = vpop.permute.xlu1 %1183  ;;  %v5673_v18 = vpop.permute.xlu0 %1139 }
 0x2d4   : > { %v1188_v27 = vadd.f32 %v1184_v16, %v1076_v40  ;;  %v1730_v16 = vmul.f32 %v5580_v50, %v1728_v55 }
 0x2d5   : > { %1693 = vrot.lane.b32.xlu1 %v1688_v12, %s7966_s0  ;;  %1649 = vrot.lane.b32.xlu0 %v1645_v63, %s7966_s0  ;;  %v1687_v12 = vmul.f32 %v5618_v4, %v1686_v62  ;;  %v1742_v63 = vstv %s5694_s4  ;;  %v1132_v62 = vadd.f32 %v5612_v45, %v5504_v48  ;;  %s5923_s4 = sld [smem:[#allocation3 + $0x10c]] }
 0x2d6   : > { %v5688_v32 = vadd.f32 %v1286_v35, %v1188_v27  ;;  %v1308_v27 = vstv %s5703_s5  ;;  %v1089_v35 = vadd.f32 %v5614_v53, %v5506_v25  ;;  %v1291_v53 = vmul.f32 %v5354_v19, %v1290_v30  ;;  %s5928_s5 = sld [smem:[#allocation3 + $0x54]] }
 0x2d7   : > { %v1198_v38 = vpop.permute.xlu1 %1197  ;;  %v5690_v43 = vpop.permute.xlu0 %1153  ;;  %v1310_v25 = vmul.f32 %v5316_v23, %v1308_v27 }
 0x2d8   : > { %v1202_v39 = vadd.f32 %v1198_v38, %v1090_v9 }
 0x2d9   : > { %1707 = vrot.lane.b32.xlu1 %v1702_v34, %s7966_s0  ;;  %1663 = vrot.lane.b32.xlu0 %v1659_v59, %s7966_s0  ;;  %v1744_v59 = vmul.f32 %v5580_v50, %v1742_v63 }
 0x2da   : > { %v5709_v42 = vadd.f32 %v1292_v36, %v1202_v39  ;;  %v1701_v39 = vmul.f32 %v5618_v4, %v1700_v13  ;;  %v1756_v36 = vstv %s5716_s6  ;;  %v1146_v13 = vadd.f32 %v5627_v0, %v5524_v33  ;;  %s5937_s6 = sld [smem:[#allocation3 + $0x11]] }
 0x2db   : > { %v1212_v31 = vpop.permute.xlu1 %1211  ;;  %v1168_v26 = vpop.permute.xlu0 %1167  ;;  %v1758_v30 = vmul.f32 %v5580_v50, %v1756_v36  ;;  %v1297_v0 = vmul.f32 %v5354_v19, %v1296_v49 }
 0x2dc   : > { %v1216_v15 = vadd.f32 %v1212_v31, %v1104_v44  ;;  %v1173_v17 = vadd.f32 %v1168_v26, %v1061_v60  ;;  %v1314_v44 = vstv %s5725_s7  ;;  %v1103_v60 = vadd.f32 %v5629_v1, %v5526_v14  ;;  %s5943_s7 = sld [smem:[#allocation3 + $0x78]] }
 0x2dd   : > { %1721 = vrot.lane.b32.xlu1 %v1716_v54, %s7967_s19  ;;  %1677 = vrot.lane.b32.xlu0 %v1673_v6, %s7966_s0  ;;  %v1316_v14 = vmul.f32 %v5316_v23, %v1314_v44  ;;  %v1320_v1 = vstv %s5749_s10  ;;  %s5960_s10 = sld [smem:[#allocation3 + $0x9c]] }
 0x2de   : > { %v5731_v57 = vadd.f32 %v1298_v46, %v1216_v15  ;;  %v5733_v56 = vadd.f32 %v1279_v24, %v1173_v17  ;;  %v1715_v15 = vmul.f32 %v5618_v4, %v1714_v37  ;;  %v1770_v17 = vstv %s5740_s9  ;;  %s5953_s9 = sld [smem:[#allocation3 + $0x35]] }
 0x2df   : > { %v1226_v11 = vpop.permute.xlu1 %1225  ;;  %v1182_v40 = vpop.permute.xlu0 %1181  ;;  %v1160_v37 = vadd.f32 %v5640_v5, %v5542_v3  ;;  %v1117_v24 = vadd.f32 %v5642_v7, %v5544_v10  ;;  %v1772_v49 = vmul.f32 %v5580_v50, %v1770_v17  ;;  %v1322_v3 = vmul.f32 %v5316_v23, %v1320_v1 }
 0x2e0   : > { %v1230_v52 = vadd.f32 %v1226_v11, %v1118_v61  ;;  %v1187_v8 = vadd.f32 %v1182_v40, %v1075_v51  ;;  %v1303_v10 = vmul.f32 %v5354_v19, %v1302_v47  ;;  %v1131_v5 = vadd.f32 %v5656_v22, %v5560_v21 }
 0x2e1   : > { %1735 = vrot.lane.b32.xlu1 %v1730_v16, %s7967_s19  ;;  %1691 = vrot.lane.b32.xlu0 %v1687_v12, %s7966_s0  ;;  %v1729_v16 = vmul.f32 %v5618_v4, %v1728_v55  ;;  %v1784_v12 = vstv %s5764_s18  ;;  %v1743_v47 = vmul.f32 %v5618_v4, %v1742_v63  ;;  %v1145_v21 = vadd.f32 %v5673_v18, %v5574_v29  ;;  %s5970_s18 = sld [smem:[#allocation3 + $0x59]] }
 0x2e2   : > { %v5755_v9 = vadd.f32 %v1304_v20, %v1230_v52  ;;  %v5757_v38 = vadd.f32 %v1285_v41, %v1187_v8  ;;  %v1786_v23 = vmul.f32 %v5580_v50, %v1784_v12  ;;  %v1159_v29 = vadd.f32 %v5690_v43, %v5588_v58 }
 0x2e3   : > { %v1240_v2 = vpop.permute.xlu1 %1239  ;;  %v1196_v34 = vpop.permute.xlu0 %1195 }
 0x2e4   : > { %v1244_v48 = vadd.f32 %v1240_v2, %v1132_v62  ;;  %v1201_v45 = vadd.f32 %v1196_v34, %v1089_v35  ;;  %v1798_v35 = vstv %s5786_s23  ;;  %v1309_v2 = vmul.f32 %v5354_v19, %v1308_v27  ;;  %s5979_s23 = sld [smem:[#allocation3 + $0xc0]] }
 0x2e5   : > { %1749 = vrot.lane.b32.xlu1 %v1744_v59, %s7967_s19  ;;  %1705 = vrot.lane.b32.xlu0 %v1701_v39, %s7966_s0  ;;  %v1800_v63 = vmul.f32 %v5580_v50, %v1798_v35  ;;  %v1757_v39 = vmul.f32 %v5618_v4, %v1756_v36  ;;  %v1315_v27 = vmul.f32 %v5354_v19, %v1314_v44 }
 0x2e6   : > { %v5777_v31 = vadd.f32 %v1310_v25, %v1244_v48  ;;  %v5779_v26 = vadd.f32 %v1291_v53, %v1201_v45  ;;  %v1812_v45 = vstv %s5808_s26  ;;  %s5992_s26 = sld [smem:[#allocation3 + $0x7d]] }
 0x2e7   : > { %v1254_v54 = vpop.permute.xlu1 %1253  ;;  %v1210_v6 = vpop.permute.xlu0 %1209  ;;  %v1814_v36 = vmul.f32 %v5580_v50, %v1812_v45 }
 0x2e8   : > { %v1258_v46 = vadd.f32 %v1254_v54, %v1146_v13  ;;  %v1215_v33 = vadd.f32 %v1210_v6, %v1103_v60  ;;  %v1771_v13 = vmul.f32 %v5618_v4, %v1770_v17  ;;  %v5856_v60 = vld [vmem:[#allocation2 + $0x22] sm:$0xff]  ;;  %v1878_v54 = vstv %s5829_s11  ;;  %s6001_s11 = sld [smem:[#allocation3 + $0xe4]] }
 0x2e9   : > { %1763 = vrot.lane.b32.xlu1 %v1758_v30, %s7967_s19  ;;  %1719 = vrot.lane.b32.xlu0 %v1715_v15, %s7967_s19  ;;  %v1321_v6 = vmul.f32 %v5354_v19, %v1320_v1  ;;  %v1880_v15 = vmul.f32 %v5856_v60, %v1878_v54  ;;  %v1785_v17 = vmul.f32 %v5618_v4, %v1784_v12  ;;  %v1906_v1 = vstv %s5859_s30  ;;  %s6025_s30 = sld [smem:[#allocation3 + $0x108]] }
 0x2ea   : > { %v5799_v61 = vadd.f32 %v1316_v14, %v1258_v46  ;;  %v5801_v51 = vadd.f32 %v1297_v0, %v1215_v33  ;;  %v1892_v46 = vstv %s5843_s21  ;;  %v1799_v0 = vmul.f32 %v5618_v4, %v1798_v35  ;;  %s6016_s21 = sld [smem:[#allocation3 + $0xa1]] }
 0x2eb   : > { %v1268_v11 = vpop.permute.xlu1 %1267  ;;  %v1224_v40 = vpop.permute.xlu0 %1223  ;;  %v1894_v14 = vmul.f32 %v5856_v60, %v1892_v46  ;;  %v1554_v35 = vstv %s5901_s29  ;;  %s6105_s29 = sld [smem:[#allocation3 + $0x13]] }
 0x2ec   : > { %v1272_v52 = vadd.f32 %v1268_v11, %v1160_v37  ;;  %v1229_v8 = vadd.f32 %v1224_v40, %v1117_v24  ;;  %v1908_v11 = vmul.f32 %v5856_v60, %v1906_v1  ;;  %v1813_v40 = vmul.f32 %v5618_v4, %v1812_v45 }
 0x2ed   : > { %1777 = vrot.lane.b32.xlu1 %v1772_v49, %s7967_s19  ;;  %1733 = vrot.lane.b32.xlu0 %v1729_v16, %s7967_s19  ;;  %v5894_v49 = vld [vmem:[#allocation2 + $0x1a] sm:$0xff]  ;;  %v1920_v16 = vstv %s5873_s28  ;;  %v1962_v45 = vstv %s5910_s1  ;;  %s6040_s28 = sld [smem:[#allocation3 + $0xc5]] }
 0x2ee   : > { %v5818_v7 = vadd.f32 %v1322_v3, %v1272_v52  ;;  %v5820_v55 = vadd.f32 %v1303_v10, %v1229_v8  ;;  %v1922_v8 = vmul.f32 %v5856_v60, %v1920_v16  ;;  %v1879_v3 = vmul.f32 %v5894_v49, %v1878_v54  ;;  %s6119_s1 = sld [smem:[#allocation3 + $0x37]] }
 0x2ef   : > { %v5822_v20 = vpop.permute.xlu1 %1333  ;;  %v1238_v41 = vpop.permute.xlu0 %1237  ;;  %v1934_v10 = vstv %s5884_s2  ;;  %s6062_s2 = sld [smem:[#allocation3 + $0xe9]] }
 0x2f0   : > { %v1243_v62 = vadd.f32 %v1238_v41, %v1131_v5 }
 0x2f1   : > { %1791 = vrot.lane.b32.xlu1 %v1786_v23, %s7967_s19  ;;  %1747 = vrot.lane.b32.xlu0 %v1743_v47, %s7967_s19  ;;  %v1936_v23 = vmul.f32 %v5856_v60, %v1934_v10  ;;  %v1893_v47 = vmul.f32 %v5894_v49, %v1892_v46 }
 0x2f2   : > { %v5836_v22 = vadd.f32 %v1309_v2, %v1243_v62  ;;  %v1948_v62 = vstv %s5897_s27  ;;  %v1338_v2 = vadd.f32 %v5822_v20, %v5671_v28  ;;  %v1560_v28 = vstv %s5914_s8  ;;  %s6084_s27 = sld [smem:[#allocation3 + $0x10d]] }
 0x2f3   : > { %v5838_v34 = vpop.permute.xlu1 %1347  ;;  %v1252_v59 = vpop.permute.xlu0 %1251  ;;  %s6135_s8 = sld [smem:[#allocation3 + $0x5b]] }
 0x2f4   : > { %v1257_v48 = vadd.f32 %v1252_v59, %v1145_v21  ;;  %v1352_v20 = vadd.f32 %v5838_v34, %v5688_v32  ;;  %v1566_v32 = vstv %s5928_s5  ;;  %s6160_s5 = sld [smem:[#allocation3 + $0xa3]] }
 0x2f5   : > { %1805 = vrot.lane.b32.xlu1 %v1800_v63, %s7967_s19  ;;  %1761 = vrot.lane.b32.xlu0 %v1757_v39, %s7967_s19  ;;  %v1950_v63 = vmul.f32 %v5856_v60, %v1948_v62  ;;  %v1907_v39 = vmul.f32 %v5894_v49, %v1906_v1  ;;  %v1935_v1 = vmul.f32 %v5894_v49, %v1934_v10 }
 0x2f6   : > { %v5850_v18 = vadd.f32 %v1315_v27, %v1257_v48  ;;  %v1556_v27 = vmul.f32 %v5580_v50, %v1554_v35 }
 0x2f7   : > { %v5852_v25 = vpop.permute.xlu1 %1361  ;;  %v1266_v53 = vpop.permute.xlu0 %1265 }
 0x2f8   : > { %v1271_v44 = vadd.f32 %v1266_v53, %v1159_v29  ;;  %v1366_v34 = vadd.f32 %v5852_v25, %v5709_v42  ;;  %v1572_v42 = vstv %s5943_s7  ;;  %s6177_s7 = sld [smem:[#allocation3 + $0xf]] }
 0x2f9   : > { %1819 = vrot.lane.b32.xlu1 %v1814_v36, %s7967_s19  ;;  %1775 = vrot.lane.b32.xlu0 %v1771_v13, %s7967_s19  ;;  %v1964_v13 = vmul.f32 %v5856_v60, %v1962_v45 }
 0x2fa   : > { %v5864_v58 = vadd.f32 %v1321_v6, %v1271_v44  ;;  %v1921_v44 = vmul.f32 %v5894_v49, %v1920_v16  ;;  %v1976_v6 = vstv %s5923_s4  ;;  %v1568_v16 = vmul.f32 %v5580_v50, %v1566_v32  ;;  %s6149_s4 = sld [smem:[#allocation3 + $0x7f]] }
 0x2fb   : > { %v5866_v43 = vpop.permute.xlu1 %1375  ;;  %v5868_v30 = vpop.permute.xlu0 %1331 }
 0x2fc   : > { %v1380_v25 = vadd.f32 %v5866_v43, %v5731_v57  ;;  %v1574_v57 = vmul.f32 %v5580_v50, %v1572_v42  ;;  %v1578_v43 = vstv %s5960_s10  ;;  %s6190_s10 = sld [smem:[#allocation3 + $0x33]] }
 0x2fd   : > { %1885 = vrot.lane.b32.xlu1 %v1880_v15, %s7966_s0  ;;  %1789 = vrot.lane.b32.xlu0 %v1785_v17, %s7967_s19  ;;  %v1562_v15 = vmul.f32 %v5580_v50, %v1560_v28 }
 0x2ff   : > { %v5877_v19 = vpop.permute.xlu1 %1389  ;;  %v5879_v33 = vpop.permute.xlu0 %1345 }
 0x301   : > { %1899 = vrot.lane.b32.xlu1 %v1894_v14, %s7966_s0  ;;  %1803 = vrot.lane.b32.xlu0 %v1799_v0, %s7967_s19  ;;  %v1978_v0 = vmul.f32 %v5856_v60, %v1976_v6 }
 0x303   : > { %v5888_v37 = vpop.permute.xlu1 %1403  ;;  %v5890_v24 = vpop.permute.xlu0 %1359 }
 0x305   : > { %1913 = vrot.lane.b32.xlu1 %v1908_v11, %s7966_s0  ;;  %1817 = vrot.lane.b32.xlu0 %v1813_v40, %s7967_s19  ;;  %v1990_v40 = vstv %s5937_s6  ;;  %s6173_s6 = sld [smem:[#allocation3 + $0xc7]] }
 0x307   : > { %v5903_v12 = vpop.permute.xlu1 %1417  ;;  %v5905_v52 = vpop.permute.xlu0 %1373 }
 0x309   : > { %1927 = vrot.lane.b32.xlu1 %v1922_v8, %s7966_s0  ;;  %1883 = vrot.lane.b32.xlu0 %v1879_v3, %s7966_s0  ;;  %v1337_v8 = vadd.f32 %v5868_v30, %v5733_v56  ;;  %v1555_v56 = vmul.f32 %v5618_v4, %v1554_v35  ;;  %v1394_v30 = vadd.f32 %v5877_v19, %v5755_v9 }
 0x30b   : > { %v5916_v5 = vpop.permute.xlu1 %1431  ;;  %v5918_v41 = vpop.permute.xlu0 %1387 }
 0x30d   : > { %1941 = vrot.lane.b32.xlu1 %v1936_v23, %s7966_s0  ;;  %1897 = vrot.lane.b32.xlu0 %v1893_v47, %s7966_s0  ;;  %v1992_v47 = vmul.f32 %v5856_v60, %v1990_v40 }
 0x30f   : > { %v1446_v21 = vpop.permute.xlu1 %1445  ;;  %v5932_v59 = vpop.permute.xlu0 %1401 }
 0x310   : > { %v1450_v48 = vadd.f32 %v1446_v21, %v1338_v2  ;;  %v1949_v2 = vmul.f32 %v5894_v49, %v1948_v62  ;;  %v2004_v21 = vstv %s5953_s9  ;;  %v1351_v62 = vadd.f32 %v5879_v33, %v5757_v38  ;;  %s6186_s9 = sld [smem:[#allocation3 + $0xeb]] }
 0x311   : > { %1955 = vrot.lane.b32.xlu1 %v1950_v63, %s7966_s0  ;;  %1911 = vrot.lane.b32.xlu0 %v1907_v39, %s7966_s0  ;;  %v1580_v38 = vmul.f32 %v5580_v50, %v1578_v43  ;;  %v1561_v33 = vmul.f32 %v5618_v4, %v1560_v28 }
 0x312   : > { %v5947_v29 = vadd.f32 %v1556_v27, %v1450_v48 }
 0x313   : > { %v1460_v53 = vpop.permute.xlu1 %1459  ;;  %v5949_v36 = vpop.permute.xlu0 %1415 }
 0x314   : > { %v1464_v54 = vadd.f32 %v1460_v53, %v1352_v20  ;;  %v2006_v53 = vmul.f32 %v5856_v60, %v2004_v21 }
 0x315   : > { %1969 = vrot.lane.b32.xlu1 %v1964_v13, %s7966_s0  ;;  %1925 = vrot.lane.b32.xlu0 %v1921_v44, %s7966_s0  ;;  %v1963_v13 = vmul.f32 %v5894_v49, %v1962_v45  ;;  %v2018_v44 = vstv %s5970_s18  ;;  %v1408_v45 = vadd.f32 %v5888_v37, %v5777_v31  ;;  %s6199_s18 = sld [smem:[#allocation3 + $0x10f]] }
 0x316   : > { %v5964_v17 = vadd.f32 %v1562_v15, %v1464_v54  ;;  %v1584_v54 = vstv %s5979_s23  ;;  %v1365_v15 = vadd.f32 %v5890_v24, %v5779_v26  ;;  %v1567_v24 = vmul.f32 %v5618_v4, %v1566_v32  ;;  %s6204_s23 = sld [smem:[#allocation3 + $0x57]] }
 0x317   : > { %v1474_v46 = vpop.permute.xlu1 %1473  ;;  %v5966_v14 = vpop.permute.xlu0 %1429  ;;  %v1586_v26 = vmul.f32 %v5580_v50, %v1584_v54 }
 0x318   : > { %v1478_v11 = vadd.f32 %v1474_v46, %v1366_v34 }
 0x319   : > { %1983 = vrot.lane.b32.xlu1 %v1978_v0, %s7966_s0  ;;  %1939 = vrot.lane.b32.xlu0 %v1935_v1, %s7966_s0  ;;  %v2020_v1 = vmul.f32 %v5856_v60, %v2018_v44 }
 0x31a   : > { %v5985_v3 = vadd.f32 %v1568_v16, %v1478_v11  ;;  %v1977_v11 = vmul.f32 %v5894_v49, %v1976_v6  ;;  %v2032_v16 = vstv %s5992_s26  ;;  %v1422_v6 = vadd.f32 %v5903_v12, %v5799_v61  ;;  %s6213_s26 = sld [smem:[#allocation3 + $0x14]] }
 0x31b   : > { %v1488_v10 = vpop.permute.xlu1 %1487  ;;  %v1444_v23 = vpop.permute.xlu0 %1443  ;;  %v2034_v32 = vmul.f32 %v5856_v60, %v2032_v16  ;;  %v1573_v12 = vmul.f32 %v5618_v4, %v1572_v42 }
 0x31c   : > { %v1492_v63 = vadd.f32 %v1488_v10, %v1380_v25  ;;  %v1449_v39 = vadd.f32 %v1444_v23, %v1337_v8  ;;  %v1590_v25 = vstv %s6001_s11  ;;  %v1379_v8 = vadd.f32 %v5905_v52, %v5801_v51  ;;  %s6219_s11 = sld [smem:[#allocation3 + $0x7b]] }
 0x31d   : > { %1997 = vrot.lane.b32.xlu1 %v1992_v47, %s7967_s19  ;;  %1953 = vrot.lane.b32.xlu0 %v1949_v2, %s7966_s0  ;;  %v1592_v51 = vmul.f32 %v5580_v50, %v1590_v25  ;;  %v1596_v52 = vstv %s6025_s30  ;;  %s6236_s30 = sld [smem:[#allocation3 + $0x9f]] }
 0x31e   : > { %v6007_v48 = vadd.f32 %v1574_v57, %v1492_v63  ;;  %v6009_v27 = vadd.f32 %v1555_v56, %v1449_v39  ;;  %v1991_v63 = vmul.f32 %v5894_v49, %v1990_v40  ;;  %v2046_v39 = vstv %s6016_s21  ;;  %s6229_s21 = sld [smem:[#allocation3 + $0x38]] }
 0x31f   : > { %v1502_v35 = vpop.permute.xlu1 %1501  ;;  %v1458_v20 = vpop.permute.xlu0 %1457  ;;  %v1436_v40 = vadd.f32 %v5916_v5, %v5818_v7  ;;  %v1393_v56 = vadd.f32 %v5918_v41, %v5820_v55  ;;  %v2048_v42 = vmul.f32 %v5856_v60, %v2046_v39  ;;  %v1598_v7 = vmul.f32 %v5580_v50, %v1596_v52 }
 0x320   : > { %v1506_v9 = vadd.f32 %v1502_v35, %v1394_v30  ;;  %v1463_v19 = vadd.f32 %v1458_v20, %v1351_v62  ;;  %v1579_v55 = vmul.f32 %v5618_v4, %v1578_v43  ;;  %v1407_v5 = vadd.f32 %v5932_v59, %v5836_v22 }
 0x321   : > { %2011 = vrot.lane.b32.xlu1 %v2006_v53, %s7967_s19  ;;  %1967 = vrot.lane.b32.xlu0 %v1963_v13, %s7966_s0  ;;  %v2005_v53 = vmul.f32 %v5894_v49, %v2004_v21  ;;  %v2060_v13 = vstv %s6040_s28  ;;  %v2019_v43 = vmul.f32 %v5894_v49, %v2018_v44  ;;  %v1421_v22 = vadd.f32 %v5949_v36, %v5850_v18  ;;  %s6246_s28 = sld [smem:[#allocation3 + $0x5c]] }
 0x322   : > { %v6031_v34 = vadd.f32 %v1580_v38, %v1506_v9  ;;  %v6033_v46 = vadd.f32 %v1561_v33, %v1463_v19  ;;  %v2062_v50 = vmul.f32 %v5856_v60, %v2060_v13  ;;  %v1435_v18 = vadd.f32 %v5966_v14, %v5864_v58 }
 0x323   : > { %v1516_v28 = vpop.permute.xlu1 %1515  ;;  %v1472_v0 = vpop.permute.xlu0 %1471 }
 0x324   : > { %v1520_v31 = vadd.f32 %v1516_v28, %v1408_v45  ;;  %v1477_v37 = vadd.f32 %v1472_v0, %v1365_v15  ;;  %v2074_v15 = vstv %s6062_s2  ;;  %v1585_v28 = vmul.f32 %v5618_v4, %v1584_v54  ;;  %s6255_s2 = sld [smem:[#allocation3 + $0xc3]] }
 0x325   : > { %2025 = vrot.lane.b32.xlu1 %v2020_v1, %s7967_s19  ;;  %1981 = vrot.lane.b32.xlu0 %v1977_v11, %s7966_s0  ;;  %v2076_v44 = vmul.f32 %v5856_v60, %v2074_v15  ;;  %v2033_v11 = vmul.f32 %v5894_v49, %v2032_v16  ;;  %v1591_v54 = vmul.f32 %v5618_v4, %v1590_v25 }
 0x326   : > { %v6053_v10 = vadd.f32 %v1586_v26, %v1520_v31  ;;  %v6055_v23 = vadd.f32 %v1567_v24, %v1477_v37  ;;  %v2088_v37 = vstv %s6084_s27  ;;  %s6268_s27 = sld [smem:[#allocation3 + $0x80]] }
 0x327   : > { %v1530_v47 = vpop.permute.xlu1 %1529  ;;  %v1486_v2 = vpop.permute.xlu0 %1485  ;;  %v2090_v16 = vmul.f32 %v5856_v60, %v2088_v37 }
 0x328   : > { %v1534_v57 = vadd.f32 %v1530_v47, %v1422_v6  ;;  %v1491_v61 = vadd.f32 %v1486_v2, %v1379_v8  ;;  %v2047_v6 = vmul.f32 %v5894_v49, %v2046_v39  ;;  %v6132_v8 = vld [vmem:[#allocation2 + $0x38] sm:$0xff]  ;;  %v2154_v47 = vstv %s6105_s29  ;;  %s6277_s29 = sld [smem:[#allocation3 + $0xe7]] }
 0x329   : > { %2039 = vrot.lane.b32.xlu1 %v2034_v32, %s7967_s19  ;;  %1995 = vrot.lane.b32.xlu0 %v1991_v63, %s7967_s19  ;;  %v1597_v2 = vmul.f32 %v5618_v4, %v1596_v52  ;;  %v2156_v63 = vmul.f32 %v6132_v8, %v2154_v47  ;;  %v2061_v39 = vmul.f32 %v5894_v49, %v2060_v13  ;;  %v2182_v52 = vstv %s6135_s8  ;;  %s6301_s8 = sld [smem:[#allocation3 + $0x10b]] }
 0x32a   : > { %v6075_v30 = vadd.f32 %v1592_v51, %v1534_v57  ;;  %v6077_v62 = vadd.f32 %v1573_v12, %v1491_v61  ;;  %v2168_v57 = vstv %s6119_s1  ;;  %v2075_v12 = vmul.f32 %v5894_v49, %v2074_v15  ;;  %s6292_s1 = sld [smem:[#allocation3 + $0xa4]] }
 0x32b   : > { %v1544_v35 = vpop.permute.xlu1 %1543  ;;  %v1500_v20 = vpop.permute.xlu0 %1499  ;;  %v2170_v51 = vmul.f32 %v6132_v8, %v2168_v57  ;;  %v1830_v15 = vstv %s6177_s7  ;;  %s6386_s7 = sld [smem:[#allocation3 + $0x16]] }
 0x32c   : > { %v1548_v9 = vadd.f32 %v1544_v35, %v1436_v40  ;;  %v1505_v19 = vadd.f32 %v1500_v20, %v1393_v56  ;;  %v2184_v35 = vmul.f32 %v6132_v8, %v2182_v52  ;;  %v2089_v20 = vmul.f32 %v5894_v49, %v2088_v37 }
 0x32d   : > { %2053 = vrot.lane.b32.xlu1 %v2048_v42, %s7967_s19  ;;  %2009 = vrot.lane.b32.xlu0 %v2005_v53, %s7967_s19  ;;  %v6170_v42 = vld [vmem:[#allocation2 + $0x30] sm:$0xff]  ;;  %v2196_v53 = vstv %s6149_s4  ;;  %v2238_v37 = vstv %s6186_s9  ;;  %s6316_s4 = sld [smem:[#allocation3 + $0xc8]] }
 0x32e   : > { %v6094_v41 = vadd.f32 %v1598_v7, %v1548_v9  ;;  %v6096_v21 = vadd.f32 %v1579_v55, %v1505_v19  ;;  %v2198_v19 = vmul.f32 %v6132_v8, %v2196_v53  ;;  %v2155_v7 = vmul.f32 %v6170_v42, %v2154_v47  ;;  %s6400_s9 = sld [smem:[#allocation3 + $0x3a]] }
 0x32f   : > { %v6098_v38 = vpop.permute.xlu1 %1609  ;;  %v1514_v33 = vpop.permute.xlu0 %1513  ;;  %v2210_v55 = vstv %s6160_s5  ;;  %s6338_s5 = sld [smem:[#allocation3 + $0xec]] }
 0x330   : > { %v1519_v45 = vadd.f32 %v1514_v33, %v1407_v5 }
 0x331   : > { %2067 = vrot.lane.b32.xlu1 %v2062_v50, %s7967_s19  ;;  %2023 = vrot.lane.b32.xlu0 %v2019_v43, %s7967_s19  ;;  %v2212_v50 = vmul.f32 %v6132_v8, %v2210_v55  ;;  %v2169_v43 = vmul.f32 %v6170_v42, %v2168_v57 }
 0x332   : > { %v6112_v59 = vadd.f32 %v1585_v28, %v1519_v45  ;;  %v2224_v45 = vstv %s6173_s6  ;;  %v1614_v28 = vadd.f32 %v6098_v38, %v5947_v29  ;;  %v1836_v29 = vstv %s6190_s10  ;;  %s6360_s6 = sld [smem:[#allocation3 + $0x110]] }
 0x333   : > { %v6114_v0 = vpop.permute.xlu1 %1623  ;;  %v1528_v1 = vpop.permute.xlu0 %1527  ;;  %s6414_s10 = sld [smem:[#allocation3 + $0x5e]] }
 0x334   : > { %v1533_v31 = vadd.f32 %v1528_v1, %v1421_v22  ;;  %v1628_v38 = vadd.f32 %v6114_v0, %v5964_v17  ;;  %v1842_v17 = vstv %s6204_s23  ;;  %s6438_s23 = sld [smem:[#allocation3 + $0xa6]] }
 0x335   : > { %2081 = vrot.lane.b32.xlu1 %v2076_v44, %s7967_s19  ;;  %2037 = vrot.lane.b32.xlu0 %v2033_v11, %s7967_s19  ;;  %v2226_v44 = vmul.f32 %v6132_v8, %v2224_v45  ;;  %v2183_v11 = vmul.f32 %v6170_v42, %v2182_v52  ;;  %v2211_v52 = vmul.f32 %v6170_v42, %v2210_v55 }
 0x336   : > { %v6126_v36 = vadd.f32 %v1591_v54, %v1533_v31  ;;  %v1832_v54 = vmul.f32 %v5856_v60, %v1830_v15 }
 0x337   : > { %v6128_v26 = vpop.permute.xlu1 %1637  ;;  %v1542_v24 = vpop.permute.xlu0 %1541 }
 0x338   : > { %v1547_v25 = vadd.f32 %v1542_v24, %v1435_v18  ;;  %v1642_v0 = vadd.f32 %v6128_v26, %v5985_v3  ;;  %v1848_v3 = vstv %s6219_s11  ;;  %s6453_s11 = sld [smem:[#allocation3 + $0xca]] }
 0x339   : > { %2095 = vrot.lane.b32.xlu1 %v2090_v16, %s7967_s19  ;;  %2051 = vrot.lane.b32.xlu0 %v2047_v6, %s7967_s19  ;;  %v2240_v6 = vmul.f32 %v6132_v8, %v2238_v37 }
 0x33a   : > { %v6140_v58 = vadd.f32 %v1597_v2, %v1547_v25  ;;  %v2197_v25 = vmul.f32 %v6170_v42, %v2196_v53  ;;  %v2252_v2 = vstv %s6199_s18  ;;  %v1844_v53 = vmul.f32 %v5856_v60, %v1842_v17  ;;  %s6427_s18 = sld [smem:[#allocation3 + $0x82]] }
 0x33b   : > { %v6142_v14 = vpop.permute.xlu1 %1651  ;;  %v6144_v32 = vpop.permute.xlu0 %1607 }
 0x33c   : > { %v1656_v26 = vadd.f32 %v6142_v14, %v6007_v48  ;;  %v1850_v48 = vmul.f32 %v5856_v60, %v1848_v3  ;;  %v1854_v14 = vstv %s6236_s30  ;;  %s6466_s30 = sld [smem:[#allocation3 + $0xee]] }
 0x33d   : > { %2161 = vrot.lane.b32.xlu1 %v2156_v63, %s7966_s0  ;;  %2065 = vrot.lane.b32.xlu0 %v2061_v39, %s7967_s19  ;;  %v1838_v63 = vmul.f32 %v5856_v60, %v1836_v29 }
 0x33f   : > { %v6153_v4 = vpop.permute.xlu1 %1665  ;;  %v6155_v61 = vpop.permute.xlu0 %1621 }
 0x341   : > { %2175 = vrot.lane.b32.xlu1 %v2170_v51, %s7966_s0  ;;  %2079 = vrot.lane.b32.xlu0 %v2075_v12, %s7967_s19  ;;  %v2254_v12 = vmul.f32 %v6132_v8, %v2252_v2 }
 0x343   : > { %v6164_v40 = vpop.permute.xlu1 %1679  ;;  %v6166_v56 = vpop.permute.xlu0 %1635 }
 0x345   : > { %2189 = vrot.lane.b32.xlu1 %v2184_v35, %s7966_s0  ;;  %2093 = vrot.lane.b32.xlu0 %v2089_v20, %s7967_s19  ;;  %v2266_v20 = vstv %s6213_s26  ;;  %s6450_s26 = sld [smem:[#allocation3 + $0x12]] }
 0x347   : > { %v6179_v13 = vpop.permute.xlu1 %1693  ;;  %v6181_v9 = vpop.permute.xlu0 %1649 }
 0x349   : > { %2203 = vrot.lane.b32.xlu1 %v2198_v19, %s7966_s0  ;;  %2159 = vrot.lane.b32.xlu0 %v2155_v7, %s7966_s0  ;;  %v1613_v19 = vadd.f32 %v6144_v32, %v6009_v27  ;;  %v1831_v27 = vmul.f32 %v5894_v49, %v1830_v15  ;;  %v1670_v32 = vadd.f32 %v6153_v4, %v6031_v34 }
 0x34b   : > { %v6192_v5 = vpop.permute.xlu1 %1707  ;;  %v6194_v33 = vpop.permute.xlu0 %1663 }
 0x34d   : > { %2217 = vrot.lane.b32.xlu1 %v2212_v50, %s7966_s0  ;;  %2173 = vrot.lane.b32.xlu0 %v2169_v43, %s7966_s0  ;;  %v2268_v43 = vmul.f32 %v6132_v8, %v2266_v20 }
 0x34f   : > { %v1722_v22 = vpop.permute.xlu1 %1721  ;;  %v6208_v1 = vpop.permute.xlu0 %1677 }
 0x350   : > { %v1726_v31 = vadd.f32 %v1722_v22, %v1614_v28  ;;  %v2225_v28 = vmul.f32 %v6170_v42, %v2224_v45  ;;  %v2280_v22 = vstv %s6229_s21  ;;  %v1627_v45 = vadd.f32 %v6155_v61, %v6033_v46  ;;  %s6463_s21 = sld [smem:[#allocation3 + $0x36]] }
 0x351   : > { %2231 = vrot.lane.b32.xlu1 %v2226_v44, %s7966_s0  ;;  %2187 = vrot.lane.b32.xlu0 %v2183_v11, %s7966_s0  ;;  %v1856_v46 = vmul.f32 %v5856_v60, %v1854_v14  ;;  %v1837_v61 = vmul.f32 %v5894_v49, %v1836_v29 }
 0x352   : > { %v6223_v18 = vadd.f32 %v1832_v54, %v1726_v31 }
 0x353   : > { %v1736_v24 = vpop.permute.xlu1 %1735  ;;  %v6225_v16 = vpop.permute.xlu0 %1691 }
 0x354   : > { %v1740_v47 = vadd.f32 %v1736_v24, %v1628_v38  ;;  %v2282_v24 = vmul.f32 %v6132_v8, %v2280_v22 }
 0x355   : > { %2245 = vrot.lane.b32.xlu1 %v2240_v6, %s7966_s0  ;;  %2201 = vrot.lane.b32.xlu0 %v2197_v25, %s7966_s0  ;;  %v2239_v6 = vmul.f32 %v6170_v42, %v2238_v37  ;;  %v2294_v25 = vstv %s6246_s28  ;;  %v1684_v37 = vadd.f32 %v6164_v40, %v6053_v10  ;;  %s6477_s28 = sld [smem:[#allocation3 + $0x5a]] }
 0x356   : > { %v6240_v39 = vadd.f32 %v1838_v63, %v1740_v47  ;;  %v1860_v47 = vstv %s6255_s2  ;;  %v1641_v63 = vadd.f32 %v6166_v56, %v6055_v23  ;;  %v1843_v56 = vmul.f32 %v5894_v49, %v1842_v17  ;;  %s6482_s2 = sld [smem:[#allocation3 + $0x112]] }
 0x357   : > { %v1750_v57 = vpop.permute.xlu1 %1749  ;;  %v6242_v51 = vpop.permute.xlu0 %1705  ;;  %v1862_v23 = vmul.f32 %v5856_v60, %v1860_v47 }
 0x358   : > { %v1754_v35 = vadd.f32 %v1750_v57, %v1642_v0 }
 0x359   : > { %2259 = vrot.lane.b32.xlu1 %v2254_v12, %s7966_s0  ;;  %2215 = vrot.lane.b32.xlu0 %v2211_v52, %s7966_s0  ;;  %v2296_v52 = vmul.f32 %v6132_v8, %v2294_v25 }
 0x35a   : > { %v6261_v7 = vadd.f32 %v1844_v53, %v1754_v35  ;;  %v2253_v35 = vmul.f32 %v6170_v42, %v2252_v2  ;;  %v2308_v53 = vstv %s6268_s27  ;;  %v1698_v2 = vadd.f32 %v6179_v13, %v6075_v30  ;;  %s6492_s27 = sld [smem:[#allocation3 + $0x7e]] }
 0x35b   : > { %v1764_v55 = vpop.permute.xlu1 %1763  ;;  %v1720_v50 = vpop.permute.xlu0 %1719  ;;  %v2310_v17 = vmul.f32 %v6132_v8, %v2308_v53  ;;  %v1849_v13 = vmul.f32 %v5894_v49, %v1848_v3 }
 0x35c   : > { %v1768_v44 = vadd.f32 %v1764_v55, %v1656_v26  ;;  %v1725_v11 = vadd.f32 %v1720_v50, %v1613_v19  ;;  %v1866_v26 = vstv %s6277_s29  ;;  %v1655_v19 = vadd.f32 %v6181_v9, %v6077_v62  ;;  %s6497_s29 = sld [smem:[#allocation3 + $0x17]] }
 0x35d   : > { %2273 = vrot.lane.b32.xlu1 %v2268_v43, %s7967_s19  ;;  %2229 = vrot.lane.b32.xlu0 %v2225_v28, %s7966_s0  ;;  %v1868_v62 = vmul.f32 %v5856_v60, %v1866_v26  ;;  %v1872_v9 = vstv %s6301_s8  ;;  %s6511_s8 = sld [smem:[#allocation3 + $0xa2]] }
 0x35e   : > { %v6283_v31 = vadd.f32 %v1850_v48, %v1768_v44  ;;  %v6285_v54 = vadd.f32 %v1831_v27, %v1725_v11  ;;  %v2267_v44 = vmul.f32 %v6170_v42, %v2266_v20  ;;  %v2322_v11 = vstv %s6292_s1  ;;  %s6505_s1 = sld [smem:[#allocation3 + $0x3b]] }
 0x35f   : > { %v1778_v15 = vpop.permute.xlu1 %1777  ;;  %v1734_v38 = vpop.permute.xlu0 %1733  ;;  %v1712_v20 = vadd.f32 %v6192_v5, %v6094_v41  ;;  %v1669_v27 = vadd.f32 %v6194_v33, %v6096_v21  ;;  %v2324_v3 = vmul.f32 %v6132_v8, %v2322_v11  ;;  %v1874_v41 = vmul.f32 %v5856_v60, %v1872_v9 }
 0x360   : > { %v1782_v34 = vadd.f32 %v1778_v15, %v1670_v32  ;;  %v1739_v4 = vadd.f32 %v1734_v38, %v1627_v45  ;;  %v1855_v21 = vmul.f32 %v5894_v49, %v1854_v14  ;;  %v1683_v5 = vadd.f32 %v6208_v1, %v6112_v59 }
 0x361   : > { %2287 = vrot.lane.b32.xlu1 %v2282_v24, %s7967_s19  ;;  %2243 = vrot.lane.b32.xlu0 %v2239_v6, %s7966_s0  ;;  %v2281_v24 = vmul.f32 %v6170_v42, %v2280_v22  ;;  %v2336_v6 = vstv %s6316_s4  ;;  %v2295_v14 = vmul.f32 %v6170_v42, %v2294_v25  ;;  %v1697_v59 = vadd.f32 %v6225_v16, %v6126_v36  ;;  %s6522_s4 = sld [smem:[#allocation3 + $0x5f]] }
 0x362   : > { %v6307_v0 = vadd.f32 %v1856_v46, %v1782_v34  ;;  %v6309_v57 = vadd.f32 %v1837_v61, %v1739_v4  ;;  %v2338_v60 = vmul.f32 %v6132_v8, %v2336_v6  ;;  %v1711_v36 = vadd.f32 %v6242_v51, %v6140_v58 }
 0x363   : > { %v1792_v29 = vpop.permute.xlu1 %1791  ;;  %v1748_v12 = vpop.permute.xlu0 %1747  ;;  %v2430_v58 = vstv %s6386_s7  ;;  %s6551_s7 = sld [smem:[#allocation3 + $0xea]] }
 0x364   : > { %v1796_v10 = vadd.f32 %v1792_v29, %v1684_v37  ;;  %v1753_v40 = vadd.f32 %v1748_v12, %v1641_v63  ;;  %v2350_v63 = vstv %s6338_s5  ;;  %v1861_v29 = vmul.f32 %v5894_v49, %v1860_v47  ;;  %s6530_s5 = sld [smem:[#allocation3 + $0xc6]] }
 0x365   : > { %2301 = vrot.lane.b32.xlu1 %v2296_v52, %s7967_s19  ;;  %2257 = vrot.lane.b32.xlu0 %v2253_v35, %s7966_s0  ;;  %v2352_v25 = vmul.f32 %v6132_v8, %v2350_v63  ;;  %v2309_v35 = vmul.f32 %v6170_v42, %v2308_v53  ;;  %v2364_v47 = vstv %s6360_s6  ;;  %s6541_s6 = sld [smem:[#allocation3 + $0x83]] }
 0x366   : > { %v6329_v55 = vadd.f32 %v1862_v23, %v1796_v10  ;;  %v6331_v50 = vadd.f32 %v1843_v56, %v1753_v40  ;;  %v1867_v40 = vmul.f32 %v5894_v49, %v1866_v26  ;;  %v2366_v53 = vmul.f32 %v6132_v8, %v2364_v47  ;;  %v6408_v26 = vld [vmem:[#allocation2 + $0x39] sm:$0xff] }
 0x367   : > { %v1806_v43 = vpop.permute.xlu1 %1805  ;;  %v1762_v28 = vpop.permute.xlu0 %1761 }
 0x368   : > { %v1810_v48 = vadd.f32 %v1806_v43, %v1698_v2  ;;  %v1767_v30 = vadd.f32 %v1762_v28, %v1655_v19  ;;  %v2323_v2 = vmul.f32 %v6170_v42, %v2322_v11  ;;  %v1873_v43 = vmul.f32 %v5894_v49, %v1872_v9 }
 0x369   : > { %2315 = vrot.lane.b32.xlu1 %v2310_v17, %s7967_s19  ;;  %2271 = vrot.lane.b32.xlu0 %v2267_v44, %s7967_s19  ;;  %v2432_v44 = vmul.f32 %v6408_v26, %v2430_v58  ;;  %v2337_v11 = vmul.f32 %v6170_v42, %v2336_v6  ;;  %v2444_v49 = vstv %s6400_s9  ;;  %v2458_v9 = vstv %s6414_s10  ;;  %s6563_s9 = sld [smem:[#allocation3 + $0xa7]] }
 0x36a   : > { %v6351_v32 = vadd.f32 %v1868_v62, %v1810_v48  ;;  %v6353_v45 = vadd.f32 %v1849_v13, %v1767_v30  ;;  %v2446_v62 = vmul.f32 %v6408_v26, %v2444_v49  ;;  %v2351_v13 = vmul.f32 %v6170_v42, %v2350_v63  ;;  %s6573_s10 = sld [smem:[#allocation3 + $0x10e]] }
 0x36b   : > { %v1820_v15 = vpop.permute.xlu1 %1819  ;;  %v1776_v38 = vpop.permute.xlu0 %1775 }
 0x36c   : > { %v1824_v34 = vadd.f32 %v1820_v15, %v1712_v20  ;;  %v1781_v4 = vadd.f32 %v1776_v38, %v1669_v27  ;;  %v2460_v15 = vmul.f32 %v6408_v26, %v2458_v9  ;;  %v2365_v38 = vmul.f32 %v6170_v42, %v2364_v47 }
 0x36d   : > { %2329 = vrot.lane.b32.xlu1 %v2324_v3, %s7967_s19  ;;  %2285 = vrot.lane.b32.xlu0 %v2281_v24, %s7967_s19  ;;  %v6446_v3 = vld [vmem:[#allocation2 + $0x31] sm:$0xff]  ;;  %v2472_v24 = vstv %s6427_s18  ;;  %s6597_s18 = sld [smem:[#allocation3 + $0xcb]] }
 0x36e   : > { %v6370_v33 = vadd.f32 %v1874_v41, %v1824_v34  ;;  %v6372_v22 = vadd.f32 %v1855_v21, %v1781_v4  ;;  %v2474_v4 = vmul.f32 %v6408_v26, %v2472_v24  ;;  %v2431_v41 = vmul.f32 %v6446_v3, %v2430_v58 }
 0x36f   : > { %v6374_v46 = vpop.permute.xlu1 %1885  ;;  %v1790_v61 = vpop.permute.xlu0 %1789  ;;  %v2486_v21 = vstv %s6438_s23  ;;  %s6617_s23 = sld [smem:[#allocation3 + $0xef]] }
 0x370   : > { %v1795_v37 = vadd.f32 %v1790_v61, %v1683_v5  ;;  %v1890_v63 = vadd.f32 %v6374_v46, %v6223_v18  ;;  %v2514_v46 = vstv %s6466_s30  ;;  %s6678_s30 = sld [smem:[#allocation3 + $0x61]] }
 0x371   : > { %2343 = vrot.lane.b32.xlu1 %v2338_v60, %s7967_s19  ;;  %2299 = vrot.lane.b32.xlu0 %v2295_v14, %s7967_s19  ;;  %v2488_v60 = vmul.f32 %v6408_v26, %v2486_v21  ;;  %v2445_v14 = vmul.f32 %v6446_v3, %v2444_v49 }
 0x372   : > { %v6388_v1 = vadd.f32 %v1861_v29, %v1795_v37  ;;  %v2106_v37 = vstv %s6450_s26  ;;  %v2500_v29 = vstv %s6453_s11  ;;  %s6634_s26 = sld [smem:[#allocation3 + $0x113]] }
 0x373   : > { %v6390_v12 = vpop.permute.xlu1 %1899  ;;  %v1804_v52 = vpop.permute.xlu0 %1803  ;;  %v2108_v47 = vmul.f32 %v6132_v8, %v2106_v37  ;;  %s6650_s11 = sld [smem:[#allocation3 + $0x19]] }
 0x374   : > { %v1809_v10 = vadd.f32 %v1804_v52, %v1697_v59  ;;  %v1904_v18 = vadd.f32 %v6390_v12, %v6240_v39  ;;  %v2118_v39 = vstv %s6477_s28  ;;  %s6691_s28 = sld [smem:[#allocation3 + $0x85]] }
 0x375   : > { %2357 = vrot.lane.b32.xlu1 %v2352_v25, %s7967_s19  ;;  %2313 = vrot.lane.b32.xlu0 %v2309_v35, %s7967_s19  ;;  %v2502_v25 = vmul.f32 %v6408_v26, %v2500_v29  ;;  %v2459_v35 = vmul.f32 %v6446_v3, %v2458_v9  ;;  %v2487_v9 = vmul.f32 %v6446_v3, %v2486_v21 }
 0x376   : > { %v6402_v16 = vadd.f32 %v1867_v40, %v1809_v10  ;;  %v2112_v40 = vstv %s6463_s21  ;;  %s6664_s21 = sld [smem:[#allocation3 + $0x3d]] }
 0x377   : > { %v6404_v23 = vpop.permute.xlu1 %1913  ;;  %v1818_v56 = vpop.permute.xlu0 %1817  ;;  %v2114_v58 = vmul.f32 %v6132_v8, %v2112_v40 }
 0x378   : > { %v1823_v19 = vadd.f32 %v1818_v56, %v1711_v36  ;;  %v1918_v12 = vadd.f32 %v6404_v23, %v6261_v7  ;;  %v2124_v7 = vstv %s6492_s27  ;;  %s6715_s27 = sld [smem:[#allocation3 + $0xcd]] }
 0x379   : > { %2371 = vrot.lane.b32.xlu1 %v2366_v53, %s7967_s19  ;;  %2327 = vrot.lane.b32.xlu0 %v2323_v2, %s7967_s19  ;;  %v2516_v2 = vmul.f32 %v6408_v26, %v2514_v46 }
 0x37a   : > { %v6416_v51 = vadd.f32 %v1873_v43, %v1823_v19  ;;  %v2473_v19 = vmul.f32 %v6446_v3, %v2472_v24 }
 0x37b   : > { %v6418_v28 = vpop.permute.xlu1 %1927  ;;  %v6420_v17 = vpop.permute.xlu0 %1883 }
 0x37c   : > { %v1932_v23 = vadd.f32 %v6418_v28, %v6283_v31  ;;  %v1889_v24 = vadd.f32 %v6420_v17, %v6285_v54  ;;  %v2126_v31 = vmul.f32 %v6132_v8, %v2124_v7  ;;  %v2107_v28 = vmul.f32 %v6170_v42, %v2106_v37 }
 0x37d   : > { %2437 = vrot.lane.b32.xlu1 %v2432_v44, %s7966_s0  ;;  %2341 = vrot.lane.b32.xlu0 %v2337_v11, %s7967_s19  ;;  %v2528_v44 = vstv %s6482_s2  ;;  %v2556_v54 = vstv %s6505_s1  ;;  %s6702_s2 = sld [smem:[#allocation3 + $0xa9]] }
 0x37e   : > { %v2130_v17 = vstv %s6511_s8  ;;  %s6728_s1 = sld [smem:[#allocation3 + $0xf1]] }
 0x37f   : > { %v6429_v48 = vpop.permute.xlu1 %1941  ;;  %v6431_v30 = vpop.permute.xlu0 %1897  ;;  %s6736_s8 = sld [smem:[#allocation3 + $0x39]] }
 0x381   : > { %2451 = vrot.lane.b32.xlu1 %v2446_v62, %s7966_s0  ;;  %2355 = vrot.lane.b32.xlu0 %v2351_v13, %s7967_s19  ;;  %v2530_v13 = vmul.f32 %v6408_v26, %v2528_v44 }
 0x383   : > { %v6440_v20 = vpop.permute.xlu1 %1955  ;;  %v6442_v27 = vpop.permute.xlu0 %1911 }
 0x385   : > { %2465 = vrot.lane.b32.xlu1 %v2460_v15, %s7966_s0  ;;  %2369 = vrot.lane.b32.xlu0 %v2365_v38, %s7967_s19  ;;  %v2120_v38 = vmul.f32 %v6132_v8, %v2118_v39 }
 0x387   : > { %v6455_v6 = vpop.permute.xlu1 %1969  ;;  %v6457_v34 = vpop.permute.xlu0 %1925 }
 0x389   : > { %2479 = vrot.lane.b32.xlu1 %v2474_v4, %s7966_s0  ;;  %2435 = vrot.lane.b32.xlu0 %v2431_v41, %s7966_s0  ;;  %v2542_v4 = vstv %s6497_s29  ;;  %s6723_s29 = sld [smem:[#allocation3 + $0x15]] }
 0x38b   : > { %v6468_v5 = vpop.permute.xlu1 %1983  ;;  %v6470_v61 = vpop.permute.xlu0 %1939 }
 0x38d   : > { %2493 = vrot.lane.b32.xlu1 %v2488_v60, %s7966_s0  ;;  %2449 = vrot.lane.b32.xlu0 %v2445_v14, %s7966_s0  ;;  %v2544_v14 = vmul.f32 %v6408_v26, %v2542_v4 }
 0x38f   : > { %v1998_v59 = vpop.permute.xlu1 %1997  ;;  %v6484_v52 = vpop.permute.xlu0 %1953 }
 0x390   : > { %v2002_v10 = vadd.f32 %v1998_v59, %v1890_v63  ;;  %v2501_v63 = vmul.f32 %v6446_v3, %v2500_v29  ;;  %v1946_v29 = vadd.f32 %v6429_v48, %v6307_v0  ;;  %v2132_v0 = vmul.f32 %v6132_v8, %v2130_v17 }
 0x391   : > { %2507 = vrot.lane.b32.xlu1 %v2502_v25, %s7966_s0  ;;  %2463 = vrot.lane.b32.xlu0 %v2459_v35, %s7966_s0  ;;  %v1903_v35 = vadd.f32 %v6431_v30, %v6309_v57  ;;  %v2113_v48 = vmul.f32 %v6170_v42, %v2112_v40  ;;  %v2570_v57 = vstv %s6522_s4  ;;  %v2136_v30 = vstv %s6530_s5  ;;  %s6743_s4 = sld [smem:[#allocation3 + $0x115]] }
 0x392   : > { %v6499_v36 = vadd.f32 %v2108_v47, %v2002_v10  ;;  %s6750_s5 = sld [smem:[#allocation3 + $0x5d]] }
 0x393   : > { %v2012_v56 = vpop.permute.xlu1 %2011  ;;  %v6501_v53 = vpop.permute.xlu0 %1967 }
 0x394   : > { %v2016_v43 = vadd.f32 %v2012_v56, %v1904_v18  ;;  %v2558_v56 = vmul.f32 %v6408_v26, %v2556_v54 }
 0x395   : > { %2521 = vrot.lane.b32.xlu1 %v2516_v2, %s7966_s0  ;;  %2477 = vrot.lane.b32.xlu0 %v2473_v19, %s7966_s0  ;;  %v2515_v2 = vmul.f32 %v6446_v3, %v2514_v46  ;;  %v1960_v46 = vadd.f32 %v6440_v20, %v6329_v55  ;;  %v2119_v55 = vmul.f32 %v6170_v42, %v2118_v39  ;;  %v2142_v20 = vstv %s6551_s7  ;;  %s6767_s7 = sld [smem:[#allocation3 + $0x81]] }
 0x396   : > { %v6516_v11 = vadd.f32 %v2114_v58, %v2016_v43  ;;  %v1917_v58 = vadd.f32 %v6442_v27, %v6331_v50  ;;  %v2584_v50 = vstv %s6541_s6  ;;  %v1974_v27 = vadd.f32 %v6455_v6, %v6351_v32  ;;  %s6758_s6 = sld [smem:[#allocation3 + $0x1a]] }
 0x397   : > { %v2026_v49 = vpop.permute.xlu1 %2025  ;;  %v6518_v62 = vpop.permute.xlu0 %1981  ;;  %v2144_v32 = vmul.f32 %v6132_v8, %v2142_v20  ;;  %v2125_v6 = vmul.f32 %v6170_v42, %v2124_v7 }
 0x398   : > { %v2030_v15 = vadd.f32 %v2026_v49, %v1918_v12 }
 0x399   : > { %2535 = vrot.lane.b32.xlu1 %v2530_v13, %s7966_s0  ;;  %2491 = vrot.lane.b32.xlu0 %v2487_v9, %s7966_s0  ;;  %v2572_v9 = vmul.f32 %v6408_v26, %v2570_v57 }
 0x39a   : > { %v6537_v41 = vadd.f32 %v2120_v38, %v2030_v15  ;;  %v2529_v15 = vmul.f32 %v6446_v3, %v2528_v44  ;;  %v1931_v44 = vadd.f32 %v6457_v34, %v6353_v45  ;;  %v2598_v45 = vstv %s6563_s9  ;;  %s6772_s9 = sld [smem:[#allocation3 + $0x3e]] }
 0x39b   : > { %v2040_v21 = vpop.permute.xlu1 %2039  ;;  %v1996_v60 = vpop.permute.xlu0 %1995  ;;  %v2148_v34 = vstv %s6573_s10  ;;  %s6784_s10 = sld [smem:[#allocation3 + $0xa5]] }
 0x39c   : > { %v2044_v59 = vadd.f32 %v2040_v21, %v1932_v23  ;;  %v2001_v25 = vadd.f32 %v1996_v60, %v1889_v24  ;;  %v2138_v24 = vmul.f32 %v6132_v8, %v2136_v30 }
 0x39d   : > { %2549 = vrot.lane.b32.xlu1 %v2544_v14, %s7967_s19  ;;  %2505 = vrot.lane.b32.xlu0 %v2501_v63, %s7966_s0  ;;  %v2586_v63 = vmul.f32 %v6408_v26, %v2584_v50 }
 0x39e   : > { %v6557_v10 = vadd.f32 %v2126_v31, %v2044_v59  ;;  %v6559_v37 = vadd.f32 %v2107_v28, %v2001_v25  ;;  %v2543_v59 = vmul.f32 %v6446_v3, %v2542_v4  ;;  %v1988_v28 = vadd.f32 %v6468_v5, %v6370_v33 }
 0x39f   : > { %v2054_v47 = vpop.permute.xlu1 %2053  ;;  %v2010_v18 = vpop.permute.xlu0 %2009  ;;  %v1945_v4 = vadd.f32 %v6470_v61, %v6372_v22  ;;  %v2150_v33 = vmul.f32 %v6132_v8, %v2148_v34  ;;  %v2131_v5 = vmul.f32 %v6170_v42, %v2130_v17  ;;  %v1959_v22 = vadd.f32 %v6484_v52, %v6388_v1 }
 0x3a0   : > { %v2058_v19 = vadd.f32 %v2054_v47, %v1946_v29  ;;  %v2015_v43 = vadd.f32 %v2010_v18, %v1903_v35  ;;  %v2600_v18 = vmul.f32 %v6408_v26, %v2598_v45  ;;  %v2612_v61 = vstv %s6597_s18  ;;  %s6789_s18 = sld [smem:[#allocation3 + $0x62]] }
 0x3a1   : > { %2563 = vrot.lane.b32.xlu1 %v2558_v56, %s7967_s19  ;;  %2519 = vrot.lane.b32.xlu0 %v2515_v2, %s7966_s0  ;;  %v2557_v56 = vmul.f32 %v6446_v3, %v2556_v54  ;;  %v2614_v17 = vmul.f32 %v6408_v26, %v2612_v61  ;;  %v1973_v1 = vadd.f32 %v6501_v53, %v6402_v16  ;;  %v2626_v52 = vstv %s6617_s23  ;;  %s6801_s23 = sld [smem:[#allocation3 + $0xc9]] }
 0x3a2   : > { %v6579_v12 = vadd.f32 %v2132_v0, %v2058_v19  ;;  %v6581_v40 = vadd.f32 %v2113_v48, %v2015_v43  ;;  %v2571_v48 = vmul.f32 %v6446_v3, %v2570_v57  ;;  %v2628_v57 = vmul.f32 %v6408_v26, %v2626_v52 }
 0x3a3   : > { %v2068_v49 = vpop.permute.xlu1 %2067  ;;  %v2024_v13 = vpop.permute.xlu0 %2023  ;;  %v1987_v16 = vadd.f32 %v6518_v62, %v6416_v51  ;;  %v2640_v53 = vstv %s6634_s26  ;;  %v2706_v51 = vstv %s6650_s11  ;;  %s6808_s26 = sld [smem:[#allocation3 + $0x86]] }
 0x3a4   : > { %v2072_v38 = vadd.f32 %v2068_v49, %v1960_v46  ;;  %v2029_v23 = vadd.f32 %v2024_v13, %v1917_v58  ;;  %v2137_v58 = vmul.f32 %v6170_v42, %v2136_v30  ;;  %v2585_v30 = vmul.f32 %v6446_v3, %v2584_v50  ;;  %s6821_s11 = sld [smem:[#allocation3 + $0xed]] }
 0x3a5   : > { %2577 = vrot.lane.b32.xlu1 %v2572_v9, %s7967_s19  ;;  %2533 = vrot.lane.b32.xlu0 %v2529_v15, %s7966_s0  ;;  %v2642_v50 = vmul.f32 %v6408_v26, %v2640_v53 }
 0x3a6   : > { %v6599_v21 = vadd.f32 %v2138_v24, %v2072_v38  ;;  %v6601_v39 = vadd.f32 %v2119_v55, %v2029_v23  ;;  %v2143_v38 = vmul.f32 %v6170_v42, %v2142_v20  ;;  %v2599_v20 = vmul.f32 %v6446_v3, %v2598_v45 }
 0x3a7   : > { %v2082_v60 = vpop.permute.xlu1 %2081  ;;  %v2038_v14 = vpop.permute.xlu0 %2037  ;;  %v2627_v45 = vmul.f32 %v6446_v3, %v2626_v52 }
 0x3a8   : > { %v2086_v25 = vadd.f32 %v2082_v60, %v1974_v27  ;;  %v2043_v31 = vadd.f32 %v2038_v14, %v1931_v44  ;;  %v6672_v27 = vld [vmem:[#allocation2 + $0x3a] sm:$0xff]  ;;  %v2149_v60 = vmul.f32 %v6170_v42, %v2148_v34  ;;  %v2720_v42 = vstv %s6664_s21  ;;  %s6828_s21 = sld [smem:[#allocation3 + $0xaa]] }
 0x3a9   : > { %2591 = vrot.lane.b32.xlu1 %v2586_v63, %s7967_s19  ;;  %2547 = vrot.lane.b32.xlu0 %v2543_v59, %s7967_s19  ;;  %v2708_v59 = vmul.f32 %v6672_v27, %v2706_v51  ;;  %v2734_v34 = vstv %s6678_s30  ;;  %s6841_s30 = sld [smem:[#allocation3 + $0x111]] }
 0x3aa   : > { %v6619_v29 = vadd.f32 %v2144_v32, %v2086_v25  ;;  %v6621_v35 = vadd.f32 %v2125_v6, %v2043_v31  ;;  %v2613_v25 = vmul.f32 %v6446_v3, %v2612_v61  ;;  %v2722_v6 = vmul.f32 %v6672_v27, %v2720_v42 }
 0x3ab   : > { %v2096_v7 = vpop.permute.xlu1 %2095  ;;  %v2052_v47 = vpop.permute.xlu0 %2051 }
 0x3ac   : > { %v2100_v2 = vadd.f32 %v2096_v7, %v1988_v28  ;;  %v2057_v19 = vadd.f32 %v2052_v47, %v1945_v4  ;;  %v2736_v7 = vmul.f32 %v6672_v27, %v2734_v34  ;;  %v2641_v47 = vmul.f32 %v6446_v3, %v2640_v53 }
 0x3ad   : > { %2605 = vrot.lane.b32.xlu1 %v2600_v18, %s7967_s19  ;;  %2561 = vrot.lane.b32.xlu0 %v2557_v56, %s7967_s19  ;;  %v6710_v18 = vld [vmem:[#allocation2 + $0x32] sm:$0xff]  ;;  %v2748_v56 = vstv %s6691_s28  ;;  %s6852_s28 = sld [smem:[#allocation3 + $0xce]] }
 0x3ae   : > { %v6636_v43 = vadd.f32 %v2150_v33, %v2100_v2  ;;  %v6638_v54 = vadd.f32 %v2131_v5, %v2057_v19  ;;  %v2750_v33 = vmul.f32 %v6672_v27, %v2748_v56  ;;  %v2707_v5 = vmul.f32 %v6710_v18, %v2706_v51 }
 0x3af   : > { %v6640_v0 = vpop.permute.xlu1 %2161  ;;  %v2066_v8 = vpop.permute.xlu0 %2065  ;;  %v2804_v51 = vstv %s6743_s4  ;;  %s6943_s4 = sld [smem:[#allocation3 + $0x88]] }
 0x3b0   : > { %v2071_v46 = vadd.f32 %v2066_v8, %v1959_v22  ;;  %v2762_v22 = vstv %s6702_s2  ;;  %s6870_s2 = sld [smem:[#allocation3 + $0xf2]] }
 0x3b1   : > { %2619 = vrot.lane.b32.xlu1 %v2614_v17, %s7967_s19  ;;  %2575 = vrot.lane.b32.xlu0 %v2571_v48, %s7967_s19  ;;  %v2764_v17 = vmul.f32 %v6672_v27, %v2762_v22  ;;  %v2721_v48 = vmul.f32 %v6710_v18, %v2720_v42 }
 0x3b2   : > { %v6652_v49 = vadd.f32 %v2137_v58, %v2071_v46  ;;  %v2166_v46 = vadd.f32 %v6640_v0, %v6499_v36  ;;  %v2776_v58 = vstv %s6715_s27  ;;  %v2790_v0 = vstv %s6728_s1  ;;  %s6886_s27 = sld [smem:[#allocation3 + $0x116]] }
 0x3b3   : > { %v6654_v13 = vpop.permute.xlu1 %2175  ;;  %v2080_v9 = vpop.permute.xlu0 %2079  ;;  %s6916_s1 = sld [smem:[#allocation3 + $0x40]] }
 0x3b4   : > { %v2085_v15 = vadd.f32 %v2080_v9, %v1973_v1  ;;  %v2778_v9 = vmul.f32 %v6672_v27, %v2776_v58  ;;  %v2180_v36 = vadd.f32 %v6654_v13, %v6516_v11 }
 0x3b5   : > { %2633 = vrot.lane.b32.xlu1 %v2628_v57, %s7967_s19  ;;  %2589 = vrot.lane.b32.xlu0 %v2585_v30, %s7967_s19  ;;  %v2735_v57 = vmul.f32 %v6710_v18, %v2734_v34  ;;  %v2382_v30 = vstv %s6723_s29  ;;  %v2394_v34 = vstv %s6750_s5  ;;  %s6902_s29 = sld [smem:[#allocation3 + $0x1c]] }
 0x3b6   : > { %v6666_v23 = vadd.f32 %v2143_v38, %v2085_v15  ;;  %v2384_v38 = vmul.f32 %v6408_v26, %v2382_v30  ;;  %s6954_s5 = sld [smem:[#allocation3 + $0xac]] }
 0x3b7   : > { %v6668_v24 = vpop.permute.xlu1 %2189  ;;  %v2094_v55 = vpop.permute.xlu0 %2093 }
 0x3b8   : > { %v2099_v44 = vadd.f32 %v2094_v55, %v1987_v16  ;;  %v2194_v13 = vadd.f32 %v6668_v24, %v6537_v41 }
 0x3b9   : > { %2647 = vrot.lane.b32.xlu1 %v2642_v50, %s7967_s19  ;;  %2603 = vrot.lane.b32.xlu0 %v2599_v20, %s7967_s19  ;;  %v2792_v50 = vmul.f32 %v6672_v27, %v2790_v0  ;;  %v2749_v20 = vmul.f32 %v6710_v18, %v2748_v56  ;;  %v2818_v56 = vstv %s6758_s6  ;;  %s6967_s6 = sld [smem:[#allocation3 + $0xd0]] }
 0x3ba   : > { %v6680_v62 = vadd.f32 %v2149_v60, %v2099_v44  ;;  %v2388_v44 = vstv %s6736_s8  ;;  %s6930_s8 = sld [smem:[#allocation3 + $0x64]] }
 0x3bb   : > { %v6682_v14 = vpop.permute.xlu1 %2203  ;;  %v6684_v63 = vpop.permute.xlu0 %2159  ;;  %v2390_v11 = vmul.f32 %v6408_v26, %v2388_v44 }
 0x3bc   : > { %v2208_v41 = vadd.f32 %v6682_v14, %v6557_v10  ;;  %v2165_v24 = vadd.f32 %v6684_v63, %v6559_v37  ;;  %v2383_v14 = vmul.f32 %v6446_v3, %v2382_v30  ;;  %v2832_v37 = vstv %s6772_s9  ;;  %s6980_s9 = sld [smem:[#allocation3 + $0xf4]] }
 0x3bd   : > { %2713 = vrot.lane.b32.xlu1 %v2708_v59, %s7966_s0  ;;  %2617 = vrot.lane.b32.xlu0 %v2613_v25, %s7967_s19 }
 0x3bf   : > { %v6693_v31 = vpop.permute.xlu1 %2217  ;;  %v6695_v32 = vpop.permute.xlu0 %2173 }
 0x3c0   : > { %v2222_v63 = vadd.f32 %v6693_v31, %v6579_v12 }
 0x3c1   : > { %2727 = vrot.lane.b32.xlu1 %v2722_v6, %s7966_s0  ;;  %2631 = vrot.lane.b32.xlu0 %v2627_v45, %s7967_s19  ;;  %v2806_v6 = vmul.f32 %v6672_v27, %v2804_v51  ;;  %v2763_v45 = vmul.f32 %v6710_v18, %v2762_v22 }
 0x3c3   : > { %v6704_v28 = vpop.permute.xlu1 %2231  ;;  %v6706_v4 = vpop.permute.xlu0 %2187 }
 0x3c5   : > { %2741 = vrot.lane.b32.xlu1 %v2736_v7, %s7966_s0  ;;  %2645 = vrot.lane.b32.xlu0 %v2641_v47, %s7967_s19  ;;  %v2396_v47 = vmul.f32 %v6408_v26, %v2394_v34 }
 0x3c7   : > { %v6717_v2 = vpop.permute.xlu1 %2245  ;;  %v6719_v19 = vpop.permute.xlu0 %2201 }
 0x3c9   : > { %2755 = vrot.lane.b32.xlu1 %v2750_v33, %s7966_s0  ;;  %2711 = vrot.lane.b32.xlu0 %v2707_v5, %s7966_s0 }
 0x3cb   : > { %v6730_v61 = vpop.permute.xlu1 %2259  ;;  %v6732_v8 = vpop.permute.xlu0 %2215 }
 0x3cd   : > { %2769 = vrot.lane.b32.xlu1 %v2764_v17, %s7966_s0  ;;  %2725 = vrot.lane.b32.xlu0 %v2721_v48, %s7966_s0  ;;  %v2820_v17 = vmul.f32 %v6672_v27, %v2818_v56  ;;  %v2777_v48 = vmul.f32 %v6710_v18, %v2776_v58  ;;  %v2179_v58 = vadd.f32 %v6695_v32, %v6581_v40  ;;  %v2846_v32 = vstv %s6789_s18  ;;  %s6995_s18 = sld [smem:[#allocation3 + $0x118]] }
 0x3ce   : > { %v2389_v40 = vmul.f32 %v6446_v3, %v2388_v44 }
 0x3cf   : > { %v2274_v1 = vpop.permute.xlu1 %2273  ;;  %v6745_v52 = vpop.permute.xlu0 %2229 }
 0x3d0   : > { %v2278_v15 = vadd.f32 %v2274_v1, %v2166_v46  ;;  %v2400_v46 = vstv %s6767_s7  ;;  %s6975_s7 = sld [smem:[#allocation3 + $0x18]] }
 0x3d1   : > { %2783 = vrot.lane.b32.xlu1 %v2778_v9, %s7966_s0  ;;  %2739 = vrot.lane.b32.xlu0 %v2735_v57, %s7966_s0  ;;  %v2402_v10 = vmul.f32 %v6408_v26, %v2400_v46 }
 0x3d2   : > { %v6760_v16 = vadd.f32 %v2384_v38, %v2278_v15 }
 0x3d3   : > { %v2288_v53 = vpop.permute.xlu1 %2287  ;;  %v6762_v55 = vpop.permute.xlu0 %2243 }
 0x3d4   : > { %v2292_v60 = vadd.f32 %v2288_v53, %v2180_v36  ;;  %v2834_v36 = vmul.f32 %v6672_v27, %v2832_v37  ;;  %v2791_v53 = vmul.f32 %v6710_v18, %v2790_v0  ;;  %v2236_v0 = vadd.f32 %v6704_v28, %v6599_v21 }
 0x3d5   : > { %2797 = vrot.lane.b32.xlu1 %v2792_v50, %s7966_s0  ;;  %2753 = vrot.lane.b32.xlu0 %v2749_v20, %s7966_s0  ;;  %v2406_v50 = vstv %s6784_s10  ;;  %s6988_s10 = sld [smem:[#allocation3 + $0x3c]] }
 0x3d6   : > { %v6777_v59 = vadd.f32 %v2390_v11, %v2292_v60  ;;  %v2408_v31 = vmul.f32 %v6408_v26, %v2406_v50  ;;  %v2193_v60 = vadd.f32 %v6706_v4, %v6601_v39  ;;  %v2395_v39 = vmul.f32 %v6446_v3, %v2394_v34 }
 0x3d7   : > { %v2302_v25 = vpop.permute.xlu1 %2301  ;;  %v6779_v42 = vpop.permute.xlu0 %2257  ;;  %v2860_v4 = vstv %s6808_s26  ;;  %s7010_s26 = sld [smem:[#allocation3 + $0x1d]] }
 0x3d8   : > { %v2306_v7 = vadd.f32 %v2302_v25, %v2194_v13 }
 0x3d9   : > { %2811 = vrot.lane.b32.xlu1 %v2806_v6, %s7966_s0  ;;  %2767 = vrot.lane.b32.xlu0 %v2763_v45, %s7966_s0  ;;  %v2848_v6 = vmul.f32 %v6672_v27, %v2846_v32  ;;  %v2805_v45 = vmul.f32 %v6710_v18, %v2804_v51  ;;  %v2207_v51 = vadd.f32 %v6719_v19, %v6621_v35  ;;  %v2874_v19 = vstv %s6828_s21  ;;  %s7024_s21 = sld [smem:[#allocation3 + $0x41]] }
 0x3da   : > { %v6796_v33 = vadd.f32 %v2396_v47, %v2306_v7  ;;  %v2412_v7 = vstv %s6801_s23  ;;  %v2401_v35 = vmul.f32 %v6446_v3, %v2400_v46  ;;  %s7002_s23 = sld [smem:[#allocation3 + $0x60]] }
 0x3db   : > { %v2316_v5 = vpop.permute.xlu1 %2315  ;;  %v2272_v22 = vpop.permute.xlu0 %2271  ;;  %v2414_v28 = vmul.f32 %v6408_v26, %v2412_v7 }
 0x3dc   : > { %v2320_v1 = vadd.f32 %v2316_v5, %v2208_v41  ;;  %v2277_v9 = vadd.f32 %v2272_v22, %v2165_v24  ;;  %v2250_v41 = vadd.f32 %v6717_v2, %v6619_v29 }
 0x3dd   : > { %2825 = vrot.lane.b32.xlu1 %v2820_v17, %s7967_s19  ;;  %2781 = vrot.lane.b32.xlu0 %v2777_v48, %s7966_s0  ;;  %v2862_v17 = vmul.f32 %v6672_v27, %v2860_v4  ;;  %v2819_v48 = vmul.f32 %v6710_v18, %v2818_v56 }
 0x3de   : > { %v6814_v57 = vadd.f32 %v2402_v10, %v2320_v1  ;;  %v6816_v15 = vadd.f32 %v2383_v14, %v2277_v9  ;;  %v2418_v1 = vstv %s6821_s11  ;;  %v2264_v10 = vadd.f32 %v6730_v61, %v6636_v43  ;;  %s7019_s11 = sld [smem:[#allocation3 + $0x84]] }
 0x3df   : > { %v2330_v38 = vpop.permute.xlu1 %2329  ;;  %v2286_v30 = vpop.permute.xlu0 %2285  ;;  %v2420_v2 = vmul.f32 %v6408_v26, %v2418_v1  ;;  %v2221_v14 = vadd.f32 %v6732_v8, %v6638_v54  ;;  %v2407_v54 = vmul.f32 %v6446_v3, %v2406_v50  ;;  %v2235_v61 = vadd.f32 %v6745_v52, %v6652_v49 }
 0x3e0   : > { %v2334_v20 = vadd.f32 %v2330_v38, %v2222_v63  ;;  %v2291_v12 = vadd.f32 %v2286_v30, %v2179_v58  ;;  %v2876_v38 = vmul.f32 %v6672_v27, %v2874_v19  ;;  %v2833_v30 = vmul.f32 %v6710_v18, %v2832_v37 }
 0x3e1   : > { %2839 = vrot.lane.b32.xlu1 %v2834_v36, %s7967_s19  ;;  %2795 = vrot.lane.b32.xlu0 %v2791_v53, %s7966_s0  ;;  %v2424_v36 = vstv %s6841_s30  ;;  %v2888_v8 = vstv %s6852_s28  ;;  %v2249_v49 = vadd.f32 %v6762_v55, %v6666_v23  ;;  %v2263_v23 = vadd.f32 %v6779_v42, %v6680_v62  ;;  %s7036_s30 = sld [smem:[#allocation3 + $0xa8]] }
 0x3e2   : > { %v6834_v11 = vadd.f32 %v2408_v31, %v2334_v20  ;;  %v6836_v13 = vadd.f32 %v2389_v40, %v2291_v12  ;;  %v2426_v43 = vmul.f32 %v6408_v26, %v2424_v36  ;;  %v2890_v50 = vmul.f32 %v6672_v27, %v2888_v8  ;;  %s7041_s28 = sld [smem:[#allocation3 + $0x65]] }
 0x3e3   : > { %v2344_v25 = vpop.permute.xlu1 %2343  ;;  %v2300_v44 = vpop.permute.xlu0 %2299  ;;  %v2847_v40 = vmul.f32 %v6710_v18, %v2846_v32  ;;  %v2902_v52 = vstv %s6870_s2  ;;  %v2916_v55 = vstv %s6886_s27  ;;  %v2982_v62 = vstv %s6902_s29  ;;  %s7053_s2 = sld [smem:[#allocation3 + $0xcc]] }
 0x3e4   : > { %v2348_v47 = vadd.f32 %v2344_v25, %v2236_v0  ;;  %v2305_v21 = vadd.f32 %v2300_v44, %v2193_v60  ;;  %v2413_v60 = vmul.f32 %v6446_v3, %v2412_v7  ;;  %v2904_v32 = vmul.f32 %v6672_v27, %v2902_v52  ;;  %s7060_s27 = sld [smem:[#allocation3 + $0x89]] }
 0x3e5   : > { %2853 = vrot.lane.b32.xlu1 %v2848_v6, %s7967_s19  ;;  %2809 = vrot.lane.b32.xlu0 %v2805_v45, %s7966_s0  ;;  %v2861_v45 = vmul.f32 %v6710_v18, %v2860_v4  ;;  %v2918_v4 = vmul.f32 %v6672_v27, %v2916_v55  ;;  %s7073_s29 = sld [smem:[#allocation3 + $0xf0]] }
 0x3e6   : > { %v6854_v24 = vadd.f32 %v2414_v28, %v2348_v47  ;;  %v6856_v5 = vadd.f32 %v2395_v39, %v2305_v21  ;;  %v2419_v47 = vmul.f32 %v6446_v3, %v2418_v1 }
 0x3e7   : > { %v2358_v22 = vpop.permute.xlu1 %2357  ;;  %v2314_v34 = vpop.permute.xlu0 %2313 }
 0x3e8   : > { %v2362_v9 = vadd.f32 %v2358_v22, %v2250_v41  ;;  %v2319_v29 = vadd.f32 %v2314_v34, %v2207_v51  ;;  %v2875_v41 = vmul.f32 %v6710_v18, %v2874_v19  ;;  %v6924_v51 = vld [vmem:[#allocation2 + $0x50] sm:$0xff]  ;;  %v2425_v34 = vmul.f32 %v6446_v3, %v2424_v36 }
 0x3e9   : > { %2867 = vrot.lane.b32.xlu1 %v2862_v17, %s7967_s19  ;;  %2823 = vrot.lane.b32.xlu0 %v2819_v48, %s7967_s19  ;;  %v2984_v1 = vmul.f32 %v6924_v51, %v2982_v62  ;;  %v2996_v3 = vstv %s6916_s1  ;;  %v2903_v19 = vmul.f32 %v6710_v18, %v2902_v52  ;;  %v3024_v36 = vstv %s6943_s4  ;;  %s7080_s1 = sld [smem:[#allocation3 + $0xad]] }
 0x3ea   : > { %v6872_v56 = vadd.f32 %v2420_v2, %v2362_v9  ;;  %v6874_v63 = vadd.f32 %v2401_v35, %v2319_v29  ;;  %v2889_v9 = vmul.f32 %v6710_v18, %v2888_v8  ;;  %v2998_v35 = vmul.f32 %v6924_v51, %v2996_v3  ;;  %s7104_s4 = sld [smem:[#allocation3 + $0xd1]] }
 0x3eb   : > { %v2372_v58 = vpop.permute.xlu1 %2371  ;;  %v2328_v46 = vpop.permute.xlu0 %2327 }
 0x3ec   : > { %v2376_v53 = vadd.f32 %v2372_v58, %v2264_v10  ;;  %v2333_v20 = vadd.f32 %v2328_v46, %v2221_v14  ;;  %v3010_v10 = vstv %s6930_s8  ;;  %s7093_s8 = sld [smem:[#allocation3 + $0x114]] }
 0x3ed   : > { %2881 = vrot.lane.b32.xlu1 %v2876_v38, %s7967_s19  ;;  %2837 = vrot.lane.b32.xlu0 %v2833_v30, %s7967_s19  ;;  %v3012_v46 = vmul.f32 %v6924_v51, %v3010_v10  ;;  %v2917_v38 = vmul.f32 %v6710_v18, %v2916_v55  ;;  %v6962_v30 = vld [vmem:[#allocation2 + $0x48] sm:$0xff] }
 0x3ee   : > { %v6888_v12 = vadd.f32 %v2426_v43, %v2376_v53  ;;  %v6890_v37 = vadd.f32 %v2407_v54, %v2333_v20  ;;  %v3026_v43 = vmul.f32 %v6924_v51, %v3024_v36  ;;  %v2983_v54 = vmul.f32 %v6962_v30, %v2982_v62 }
 0x3ef   : > { %v6892_v31 = vpop.permute.xlu1 %2437  ;;  %v2342_v26 = vpop.permute.xlu0 %2341  ;;  %v3080_v62 = vstv %s6995_s18  ;;  %s7193_s18 = sld [smem:[#allocation3 + $0x8b]] }
 0x3f0   : > { %v2347_v0 = vadd.f32 %v2342_v26, %v2235_v61  ;;  %v3038_v61 = vstv %s6954_s5  ;;  %s7122_s5 = sld [smem:[#allocation3 + $0xf5]] }
 0x3f1   : > { %2895 = vrot.lane.b32.xlu1 %v2890_v50, %s7967_s19  ;;  %2851 = vrot.lane.b32.xlu0 %v2847_v40, %s7967_s19  ;;  %v3040_v50 = vmul.f32 %v6924_v51, %v3038_v61  ;;  %v2997_v40 = vmul.f32 %v6962_v30, %v2996_v3 }
 0x3f2   : > { %v6904_v25 = vadd.f32 %v2413_v60, %v2347_v0  ;;  %v2442_v0 = vadd.f32 %v6892_v31, %v6760_v16  ;;  %v3052_v60 = vstv %s6967_s6  ;;  %v3066_v31 = vstv %s6980_s9  ;;  %s7138_s6 = sld [smem:[#allocation3 + $0x119]] }
 0x3f3   : > { %v6906_v44 = vpop.permute.xlu1 %2451  ;;  %v2356_v6 = vpop.permute.xlu0 %2355  ;;  %s7162_s9 = sld [smem:[#allocation3 + $0x43]] }
 0x3f4   : > { %v2361_v7 = vadd.f32 %v2356_v6, %v2249_v49  ;;  %v3054_v6 = vmul.f32 %v6924_v51, %v3052_v60  ;;  %v2456_v16 = vadd.f32 %v6906_v44, %v6777_v59 }
 0x3f5   : > { %2909 = vrot.lane.b32.xlu1 %v2904_v32, %s7967_s19  ;;  %2865 = vrot.lane.b32.xlu0 %v2861_v45, %s7967_s19  ;;  %v3011_v32 = vmul.f32 %v6962_v30, %v3010_v10  ;;  %v2658_v45 = vstv %s6975_s7  ;;  %v2670_v10 = vstv %s7002_s23  ;;  %s7148_s7 = sld [smem:[#allocation3 + $0x1f]] }
 0x3f6   : > { %v6918_v21 = vadd.f32 %v2419_v47, %v2361_v7  ;;  %v2660_v47 = vmul.f32 %v6672_v27, %v2658_v45  ;;  %s7204_s23 = sld [smem:[#allocation3 + $0xaf]] }
 0x3f7   : > { %v6920_v28 = vpop.permute.xlu1 %2465  ;;  %v2370_v39 = vpop.permute.xlu0 %2369 }
 0x3f8   : > { %v2375_v22 = vadd.f32 %v2370_v39, %v2263_v23  ;;  %v2470_v44 = vadd.f32 %v6920_v28, %v6796_v33 }
 0x3f9   : > { %2923 = vrot.lane.b32.xlu1 %v2918_v4, %s7967_s19  ;;  %2879 = vrot.lane.b32.xlu0 %v2875_v41, %s7967_s19  ;;  %v3068_v4 = vmul.f32 %v6924_v51, %v3066_v31  ;;  %v3025_v41 = vmul.f32 %v6962_v30, %v3024_v36  ;;  %v3094_v36 = vstv %s7010_s26  ;;  %s7217_s26 = sld [smem:[#allocation3 + $0xd3]] }
 0x3fa   : > { %v6932_v42 = vadd.f32 %v2425_v34, %v2375_v22  ;;  %v2664_v22 = vstv %s6988_s10  ;;  %s7179_s10 = sld [smem:[#allocation3 + $0x67]] }
 0x3fb   : > { %v6934_v17 = vpop.permute.xlu1 %2479  ;;  %v6936_v48 = vpop.permute.xlu0 %2435  ;;  %v2666_v59 = vmul.f32 %v6672_v27, %v2664_v22 }
 0x3fc   : > { %v2484_v33 = vadd.f32 %v6934_v17, %v6814_v57  ;;  %v2441_v28 = vadd.f32 %v6936_v48, %v6816_v15  ;;  %v2659_v17 = vmul.f32 %v6710_v18, %v2658_v45  ;;  %v3108_v15 = vstv %s7024_s21  ;;  %s7230_s21 = sld [smem:[#allocation3 + $0xf7]] }
 0x3fd   : > { %2989 = vrot.lane.b32.xlu1 %v2984_v1, %s7966_s0  ;;  %2893 = vrot.lane.b32.xlu0 %v2889_v9, %s7967_s19 }
 0x3ff   : > { %v6945_v29 = vpop.permute.xlu1 %2493  ;;  %v6947_v2 = vpop.permute.xlu0 %2449 }
 0x400   : > { %v2498_v48 = vadd.f32 %v6945_v29, %v6834_v11 }
 0x401   : > { %3003 = vrot.lane.b32.xlu1 %v2998_v35, %s7966_s0  ;;  %2907 = vrot.lane.b32.xlu0 %v2903_v19, %s7967_s19  ;;  %v3082_v35 = vmul.f32 %v6924_v51, %v3080_v62  ;;  %v3039_v19 = vmul.f32 %v6962_v30, %v3038_v61 }
 0x403   : > { %v6956_v14 = vpop.permute.xlu1 %2507  ;;  %v6958_v58 = vpop.permute.xlu0 %2463 }
 0x405   : > { %3017 = vrot.lane.b32.xlu1 %v3012_v46, %s7966_s0  ;;  %2921 = vrot.lane.b32.xlu0 %v2917_v38, %s7967_s19  ;;  %v2672_v38 = vmul.f32 %v6672_v27, %v2670_v10 }
 0x407   : > { %v6969_v53 = vpop.permute.xlu1 %2521  ;;  %v6971_v20 = vpop.permute.xlu0 %2477 }
 0x409   : > { %3031 = vrot.lane.b32.xlu1 %v3026_v43, %s7966_s0  ;;  %2987 = vrot.lane.b32.xlu0 %v2983_v54, %s7966_s0 }
 0x40b   : > { %v6982_v8 = vpop.permute.xlu1 %2535  ;;  %v6984_v26 = vpop.permute.xlu0 %2491 }
 0x40d   : > { %3045 = vrot.lane.b32.xlu1 %v3040_v50, %s7966_s0  ;;  %3001 = vrot.lane.b32.xlu0 %v2997_v40, %s7966_s0  ;;  %v3096_v50 = vmul.f32 %v6924_v51, %v3094_v36  ;;  %v3053_v40 = vmul.f32 %v6962_v30, %v3052_v60  ;;  %v2455_v60 = vadd.f32 %v6947_v2, %v6836_v13  ;;  %v3122_v2 = vstv %s7041_s28  ;;  %s7243_s28 = sld [smem:[#allocation3 + $0x11b]] }
 0x40e   : > { %v2665_v13 = vmul.f32 %v6710_v18, %v2664_v22 }
 0x40f   : > { %v2550_v49 = vpop.permute.xlu1 %2549  ;;  %v6997_v52 = vpop.permute.xlu0 %2505 }
 0x410   : > { %v2554_v7 = vadd.f32 %v2550_v49, %v2442_v0  ;;  %v2676_v0 = vstv %s7019_s11  ;;  %s7227_s11 = sld [smem:[#allocation3 + $0x1b]] }
 0x411   : > { %3059 = vrot.lane.b32.xlu1 %v3054_v6, %s7966_s0  ;;  %3015 = vrot.lane.b32.xlu0 %v3011_v32, %s7966_s0  ;;  %v2678_v57 = vmul.f32 %v6672_v27, %v2676_v0 }
 0x412   : > { %v7012_v23 = vadd.f32 %v2660_v47, %v2554_v7 }
 0x413   : > { %v2564_v55 = vpop.permute.xlu1 %2563  ;;  %v7014_v39 = vpop.permute.xlu0 %2519 }
 0x414   : > { %v2568_v34 = vadd.f32 %v2564_v55, %v2456_v16  ;;  %v3110_v16 = vmul.f32 %v6924_v51, %v3108_v15  ;;  %v3067_v55 = vmul.f32 %v6962_v30, %v3066_v31  ;;  %v2512_v31 = vadd.f32 %v6956_v14, %v6854_v24 }
 0x415   : > { %3073 = vrot.lane.b32.xlu1 %v3068_v4, %s7966_s0  ;;  %3029 = vrot.lane.b32.xlu0 %v3025_v41, %s7966_s0  ;;  %v2682_v4 = vstv %s7036_s30  ;;  %s7240_s30 = sld [smem:[#allocation3 + $0x3f]] }
 0x416   : > { %v7029_v1 = vadd.f32 %v2666_v59, %v2568_v34  ;;  %v2684_v29 = vmul.f32 %v6672_v27, %v2682_v4  ;;  %v2469_v34 = vadd.f32 %v6958_v58, %v6856_v5  ;;  %v2671_v5 = vmul.f32 %v6710_v18, %v2670_v10 }
 0x417   : > { %v2578_v9 = vpop.permute.xlu1 %2577  ;;  %v7031_v3 = vpop.permute.xlu0 %2533  ;;  %v3136_v58 = vstv %s7060_s27  ;;  %s7257_s27 = sld [smem:[#allocation3 + $0x20]] }
 0x418   : > { %v2582_v46 = vadd.f32 %v2578_v9, %v2470_v44 }
 0x419   : > { %3087 = vrot.lane.b32.xlu1 %v3082_v35, %s7966_s0  ;;  %3043 = vrot.lane.b32.xlu0 %v3039_v19, %s7966_s0  ;;  %v3124_v35 = vmul.f32 %v6924_v51, %v3122_v2  ;;  %v3081_v19 = vmul.f32 %v6962_v30, %v3080_v62  ;;  %v2483_v62 = vadd.f32 %v6971_v20, %v6874_v63  ;;  %v3150_v20 = vstv %s7080_s1  ;;  %s7273_s1 = sld [smem:[#allocation3 + $0x87]] }
 0x41a   : > { %v7048_v43 = vadd.f32 %v2672_v38, %v2582_v46  ;;  %v2688_v46 = vstv %s7053_s2  ;;  %v2677_v63 = vmul.f32 %v6710_v18, %v2676_v0  ;;  %s7254_s2 = sld [smem:[#allocation3 + $0x63]] }
 0x41b   : > { %v2592_v54 = vpop.permute.xlu1 %2591  ;;  %v2548_v61 = vpop.permute.xlu0 %2547  ;;  %v2690_v14 = vmul.f32 %v6672_v27, %v2688_v46 }
 0x41c   : > { %v2596_v49 = vadd.f32 %v2592_v54, %v2484_v33  ;;  %v2553_v6 = vadd.f32 %v2548_v61, %v2441_v28  ;;  %v2526_v33 = vadd.f32 %v6969_v53, %v6872_v56 }
 0x41d   : > { %3101 = vrot.lane.b32.xlu1 %v3096_v50, %s7967_s19  ;;  %3057 = vrot.lane.b32.xlu0 %v3053_v40, %s7966_s0  ;;  %v3138_v50 = vmul.f32 %v6924_v51, %v3136_v58  ;;  %v3095_v40 = vmul.f32 %v6962_v30, %v3094_v36 }
 0x41e   : > { %v7066_v32 = vadd.f32 %v2678_v57, %v2596_v49  ;;  %v7068_v7 = vadd.f32 %v2659_v17, %v2553_v6  ;;  %v2694_v49 = vstv %s7073_s29  ;;  %v2540_v57 = vadd.f32 %v6982_v8, %v6888_v12  ;;  %s7264_s29 = sld [smem:[#allocation3 + $0x44]] }
 0x41f   : > { %v2606_v47 = vpop.permute.xlu1 %2605  ;;  %v2562_v45 = vpop.permute.xlu0 %2561  ;;  %v2696_v53 = vmul.f32 %v6672_v27, %v2694_v49  ;;  %v2497_v17 = vadd.f32 %v6984_v26, %v6890_v37  ;;  %v2683_v37 = vmul.f32 %v6710_v18, %v2682_v4  ;;  %v2511_v8 = vadd.f32 %v6997_v52, %v6904_v25 }
 0x420   : > { %v2610_v41 = vadd.f32 %v2606_v47, %v2498_v48  ;;  %v2567_v11 = vadd.f32 %v2562_v45, %v2455_v60  ;;  %v3152_v47 = vmul.f32 %v6924_v51, %v3150_v20  ;;  %v3109_v45 = vmul.f32 %v6962_v30, %v3108_v15 }
 0x421   : > { %3115 = vrot.lane.b32.xlu1 %v3110_v16, %s7967_s19  ;;  %3071 = vrot.lane.b32.xlu0 %v3067_v55, %s7966_s0  ;;  %v2700_v16 = vstv %s7093_s8  ;;  %v3164_v26 = vstv %s7104_s4  ;;  %v2525_v25 = vadd.f32 %v7014_v39, %v6918_v21  ;;  %v2539_v21 = vadd.f32 %v7031_v3, %v6932_v42  ;;  %s7281_s8 = sld [smem:[#allocation3 + $0x68]] }
 0x422   : > { %v7086_v59 = vadd.f32 %v2684_v29, %v2610_v41  ;;  %v7088_v44 = vadd.f32 %v2665_v13, %v2567_v11  ;;  %v2702_v12 = vmul.f32 %v6672_v27, %v2700_v16  ;;  %v3166_v4 = vmul.f32 %v6924_v51, %v3164_v26  ;;  %s7290_s4 = sld [smem:[#allocation3 + $0xab]] }
 0x423   : > { %v2620_v9 = vpop.permute.xlu1 %2619  ;;  %v2576_v22 = vpop.permute.xlu0 %2575  ;;  %v3123_v13 = vmul.f32 %v6962_v30, %v3122_v2  ;;  %v3178_v52 = vstv %s7122_s5  ;;  %v3192_v39 = vstv %s7138_s6  ;;  %s7300_s5 = sld [smem:[#allocation3 + $0x8c]] }
 0x424   : > { %v2624_v38 = vadd.f32 %v2620_v9, %v2512_v31  ;;  %v2581_v24 = vadd.f32 %v2576_v22, %v2469_v34  ;;  %v2689_v34 = vmul.f32 %v6710_v18, %v2688_v46  ;;  %v3180_v2 = vmul.f32 %v6924_v51, %v3178_v52  ;;  %s7310_s6 = sld [smem:[#allocation3 + $0xcf]] }
 0x425   : > { %3129 = vrot.lane.b32.xlu1 %v3124_v35, %s7967_s19  ;;  %3085 = vrot.lane.b32.xlu0 %v3081_v19, %s7966_s0  ;;  %v3137_v19 = vmul.f32 %v6962_v30, %v3136_v58  ;;  %v3194_v58 = vmul.f32 %v6924_v51, %v3192_v39 }
 0x426   : > { %v7106_v28 = vadd.f32 %v2690_v14, %v2624_v38  ;;  %v7108_v54 = vadd.f32 %v2671_v5, %v2581_v24  ;;  %v2695_v38 = vmul.f32 %v6710_v18, %v2694_v49 }
 0x427   : > { %v2634_v61 = vpop.permute.xlu1 %2633  ;;  %v2590_v10 = vpop.permute.xlu0 %2589 }
 0x428   : > { %v2638_v6 = vadd.f32 %v2634_v61, %v2526_v33  ;;  %v2595_v56 = vadd.f32 %v2590_v10, %v2483_v62  ;;  %v3151_v33 = vmul.f32 %v6962_v30, %v3150_v20  ;;  %v7176_v62 = vld [vmem:[#allocation2 + $0x51] sm:$0xff]  ;;  %v3258_v10 = vstv %s7148_s7  ;;  %s7320_s7 = sld [smem:[#allocation3 + $0xb0]] }
 0x429   : > { %3143 = vrot.lane.b32.xlu1 %v3138_v50, %s7967_s19  ;;  %3099 = vrot.lane.b32.xlu0 %v3095_v40, %s7967_s19  ;;  %v2701_v50 = vmul.f32 %v6710_v18, %v2700_v16  ;;  %v3260_v49 = vmul.f32 %v7176_v62, %v3258_v10  ;;  %v3179_v20 = vmul.f32 %v6962_v30, %v3178_v52  ;;  %v3300_v16 = vstv %s7193_s18  ;;  %s7354_s18 = sld [smem:[#allocation3 + $0x117]] }
 0x42a   : > { %v7124_v36 = vadd.f32 %v2696_v53, %v2638_v6  ;;  %v7126_v48 = vadd.f32 %v2677_v63, %v2595_v56  ;;  %v3165_v6 = vmul.f32 %v6962_v30, %v3164_v26  ;;  %v3272_v56 = vstv %s7162_s9  ;;  %s7332_s9 = sld [smem:[#allocation3 + $0xf3]] }
 0x42b   : > { %v2648_v60 = vpop.permute.xlu1 %2647  ;;  %v2604_v0 = vpop.permute.xlu0 %2603  ;;  %v3274_v63 = vmul.f32 %v7176_v62, %v3272_v56 }
 0x42c   : > { %v2652_v55 = vadd.f32 %v2648_v60, %v2540_v57  ;;  %v2609_v41 = vadd.f32 %v2604_v0, %v2497_v17  ;;  %v3286_v57 = vstv %s7179_s10  ;;  %s7342_s10 = sld [smem:[#allocation3 + $0xd4]] }
 0x42d   : > { %3157 = vrot.lane.b32.xlu1 %v3152_v47, %s7967_s19  ;;  %3113 = vrot.lane.b32.xlu0 %v3109_v45, %s7967_s19  ;;  %v3288_v0 = vmul.f32 %v7176_v62, %v3286_v57  ;;  %v3193_v47 = vmul.f32 %v6962_v30, %v3192_v39  ;;  %v7214_v45 = vld [vmem:[#allocation2 + $0x49] sm:$0xff] }
 0x42e   : > { %v7140_v11 = vadd.f32 %v2702_v12, %v2652_v55  ;;  %v7142_v15 = vadd.f32 %v2683_v37, %v2609_v41  ;;  %v3302_v12 = vmul.f32 %v7176_v62, %v3300_v16  ;;  %v3259_v37 = vmul.f32 %v7214_v45, %v3258_v10 }
 0x42f   : > { %v7144_v29 = vpop.permute.xlu1 %2713  ;;  %v2618_v27 = vpop.permute.xlu0 %2617 }
 0x430   : > { %v2623_v31 = vadd.f32 %v2618_v27, %v2511_v8  ;;  %v3314_v8 = vstv %s7204_s23  ;;  %s7374_s23 = sld [smem:[#allocation3 + $0xf8]] }
 0x431   : > { %3171 = vrot.lane.b32.xlu1 %v3166_v4, %s7967_s19  ;;  %3127 = vrot.lane.b32.xlu0 %v3123_v13, %s7967_s19  ;;  %v3316_v4 = vmul.f32 %v7176_v62, %v3314_v8  ;;  %v3273_v13 = vmul.f32 %v7214_v45, %v3272_v56 }
 0x432   : > { %v7156_v9 = vadd.f32 %v2689_v34, %v2623_v31  ;;  %v3328_v31 = vstv %s7217_s26  ;;  %v2718_v34 = vadd.f32 %v7144_v29, %v7012_v23  ;;  %s7394_s26 = sld [smem:[#allocation3 + $0x11c]] }
 0x433   : > { %v7158_v22 = vpop.permute.xlu1 %2727  ;;  %v2632_v35 = vpop.permute.xlu0 %2631 }
 0x434   : > { %v2637_v46 = vadd.f32 %v2632_v35, %v2525_v25  ;;  %v3330_v35 = vmul.f32 %v7176_v62, %v3328_v31  ;;  %v2732_v23 = vadd.f32 %v7158_v22, %v7029_v1 }
 0x435   : > { %3185 = vrot.lane.b32.xlu1 %v3180_v2, %s7967_s19  ;;  %3141 = vrot.lane.b32.xlu0 %v3137_v19, %s7967_s19  ;;  %v3287_v2 = vmul.f32 %v7214_v45, %v3286_v57  ;;  %v2934_v19 = vstv %s7227_s11  ;;  %v2946_v57 = vstv %s7254_s2  ;;  %s7414_s11 = sld [smem:[#allocation3 + $0x22]] }
 0x436   : > { %v7170_v24 = vadd.f32 %v2695_v38, %v2637_v46  ;;  %v3342_v38 = vstv %s7230_s21  ;;  %s7429_s21 = sld [smem:[#allocation3 + $0x46]] }
 0x437   : > { %v7172_v14 = vpop.permute.xlu1 %2741  ;;  %v2646_v5 = vpop.permute.xlu0 %2645  ;;  %s7475_s2 = sld [smem:[#allocation3 + $0xb2]] }
 0x438   : > { %v2651_v61 = vadd.f32 %v2646_v5, %v2539_v21  ;;  %v2936_v21 = vmul.f32 %v6924_v51, %v2934_v19  ;;  %v2746_v22 = vadd.f32 %v7172_v14, %v7048_v43  ;;  %v2948_v43 = vmul.f32 %v6924_v51, %v2946_v57 }
 0x439   : > { %3199 = vrot.lane.b32.xlu1 %v3194_v58, %s7967_s19  ;;  %3155 = vrot.lane.b32.xlu0 %v3151_v33, %s7967_s19  ;;  %v3344_v58 = vmul.f32 %v7176_v62, %v3342_v38  ;;  %v3301_v33 = vmul.f32 %v7214_v45, %v3300_v16 }
 0x43a   : > { %v7184_v42 = vadd.f32 %v2701_v50, %v2651_v61  ;;  %v2940_v61 = vstv %s7240_s30  ;;  %v3356_v50 = vstv %s7243_s28  ;;  %s7446_s30 = sld [smem:[#allocation3 + $0x6a]] }
 0x43b   : > { %v7186_v3 = vpop.permute.xlu1 %2755  ;;  %v7188_v40 = vpop.permute.xlu0 %2711  ;;  %v2942_v1 = vmul.f32 %v6924_v51, %v2940_v61  ;;  %s7462_s28 = sld [smem:[#allocation3 + $0x8e]] }
 0x43c   : > { %v2760_v14 = vadd.f32 %v7186_v3, %v7066_v32  ;;  %v2717_v16 = vadd.f32 %v7188_v40, %v7068_v7  ;;  %v2935_v40 = vmul.f32 %v6962_v30, %v2934_v19 }
 0x43d   : > { %3265 = vrot.lane.b32.xlu1 %v3260_v49, %s7966_s0  ;;  %3169 = vrot.lane.b32.xlu0 %v3165_v6, %s7967_s19 }
 0x43f   : > { %v7197_v18 = vpop.permute.xlu1 %2769  ;;  %v7199_v53 = vpop.permute.xlu0 %2725 }
 0x441   : > { %3279 = vrot.lane.b32.xlu1 %v3274_v63, %s7966_s0  ;;  %3183 = vrot.lane.b32.xlu0 %v3179_v20, %s7967_s19  ;;  %v3358_v63 = vmul.f32 %v7176_v62, %v3356_v50  ;;  %v3315_v20 = vmul.f32 %v7214_v45, %v3314_v8 }
 0x443   : > { %v7208_v17 = vpop.permute.xlu1 %2783  ;;  %v7210_v60 = vpop.permute.xlu0 %2739 }
 0x445   : > { %3293 = vrot.lane.b32.xlu1 %v3288_v0, %s7966_s0  ;;  %3197 = vrot.lane.b32.xlu0 %v3193_v47, %s7967_s19  ;;  %v3370_v47 = vstv %s7257_s27  ;;  %s7490_s27 = sld [smem:[#allocation3 + $0xd6]] }
 0x447   : > { %v7221_v55 = vpop.permute.xlu1 %2797  ;;  %v7223_v41 = vpop.permute.xlu0 %2753 }
 0x449   : > { %3307 = vrot.lane.b32.xlu1 %v3302_v12, %s7966_s0  ;;  %3263 = vrot.lane.b32.xlu0 %v3259_v37, %s7966_s0 }
 0x44b   : > { %v7234_v26 = vpop.permute.xlu1 %2811  ;;  %v7236_v27 = vpop.permute.xlu0 %2767 }
 0x44d   : > { %3321 = vrot.lane.b32.xlu1 %v3316_v4, %s7966_s0  ;;  %3277 = vrot.lane.b32.xlu0 %v3273_v13, %s7966_s0  ;;  %v3372_v4 = vmul.f32 %v7176_v62, %v3370_v47  ;;  %v3329_v13 = vmul.f32 %v7214_v45, %v3328_v31  ;;  %v2774_v31 = vadd.f32 %v7197_v18, %v7086_v59 }
 0x44f   : > { %v2826_v25 = vpop.permute.xlu1 %2825  ;;  %v7249_v52 = vpop.permute.xlu0 %2781 }
 0x450   : > { %v2830_v46 = vadd.f32 %v2826_v25, %v2718_v34  ;;  %v3384_v34 = vstv %s7264_s29  ;;  %v2952_v25 = vstv %s7273_s1  ;;  %s7494_s29 = sld [smem:[#allocation3 + $0x1e]] }
 0x451   : > { %3335 = vrot.lane.b32.xlu1 %v3330_v35, %s7966_s0  ;;  %3291 = vrot.lane.b32.xlu0 %v3287_v2, %s7966_s0  ;;  %v2954_v3 = vmul.f32 %v6924_v51, %v2952_v25  ;;  %v2731_v35 = vadd.f32 %v7199_v53, %v7088_v44  ;;  %v3386_v19 = vmul.f32 %v7176_v62, %v3384_v34  ;;  %s7505_s1 = sld [smem:[#allocation3 + $0xfa]] }
 0x452   : > { %v7266_v29 = vadd.f32 %v2936_v21, %v2830_v46  ;;  %v2941_v53 = vmul.f32 %v6962_v30, %v2940_v61 }
 0x453   : > { %v2840_v39 = vpop.permute.xlu1 %2839  ;;  %v7268_v5 = vpop.permute.xlu0 %2795 }
 0x454   : > { %v2844_v10 = vadd.f32 %v2840_v39, %v2732_v23  ;;  %v3343_v39 = vmul.f32 %v7214_v45, %v3342_v38  ;;  %v2788_v38 = vadd.f32 %v7208_v17, %v7106_v28 }
 0x455   : > { %3349 = vrot.lane.b32.xlu1 %v3344_v58, %s7966_s0  ;;  %3305 = vrot.lane.b32.xlu0 %v3301_v33, %s7966_s0  ;;  %v3398_v58 = vstv %s7281_s8  ;;  %v2958_v33 = vstv %s7290_s4  ;;  %s7509_s8 = sld [smem:[#allocation3 + $0x42]] }
 0x456   : > { %v7283_v49 = vadd.f32 %v2942_v1, %v2844_v10  ;;  %v2960_v18 = vmul.f32 %v6924_v51, %v2958_v33  ;;  %v2745_v10 = vadd.f32 %v7210_v60, %v7108_v54  ;;  %v3400_v61 = vmul.f32 %v7176_v62, %v3398_v58  ;;  %s7520_s4 = sld [smem:[#allocation3 + $0x11e]] }
 0x457   : > { %v2854_v6 = vpop.permute.xlu1 %2853  ;;  %v7285_v56 = vpop.permute.xlu0 %2809  ;;  %v2947_v60 = vmul.f32 %v6962_v30, %v2946_v57  ;;  %v3371_v57 = vmul.f32 %v7214_v45, %v3370_v47  ;;  %v2773_v47 = vadd.f32 %v7236_v27, %v7142_v15  ;;  %v2787_v27 = vadd.f32 %v7249_v52, %v7156_v9 }
 0x458   : > { %v2858_v0 = vadd.f32 %v2854_v6, %v2746_v22  ;;  %v2801_v52 = vadd.f32 %v7268_v5, %v7170_v24  ;;  %v2815_v24 = vadd.f32 %v7285_v56, %v7184_v42 }
 0x459   : > { %3363 = vrot.lane.b32.xlu1 %v3358_v63, %s7966_s0  ;;  %3319 = vrot.lane.b32.xlu0 %v3315_v20, %s7966_s0  ;;  %v3357_v20 = vmul.f32 %v7214_v45, %v3356_v50  ;;  %v2802_v50 = vadd.f32 %v7221_v55, %v7124_v36  ;;  %v2953_v55 = vmul.f32 %v6962_v30, %v2952_v25 }
 0x45a   : > { %v7302_v12 = vadd.f32 %v2948_v43, %v2858_v0  ;;  %v3412_v0 = vstv %s7300_s5  ;;  %v2964_v43 = vstv %s7310_s6  ;;  %v3385_v25 = vmul.f32 %v7214_v45, %v3384_v34  ;;  %s7525_s5 = sld [smem:[#allocation3 + $0x66]] }
 0x45b   : > { %v2868_v37 = vpop.permute.xlu1 %2867  ;;  %v2824_v8 = vpop.permute.xlu0 %2823  ;;  %v2966_v17 = vmul.f32 %v6924_v51, %v2964_v43  ;;  %v2965_v9 = vmul.f32 %v6962_v30, %v2964_v43  ;;  %s7534_s6 = sld [smem:[#allocation3 + $0x23]] }
 0x45c   : > { %v2872_v32 = vadd.f32 %v2868_v37, %v2760_v14  ;;  %v2829_v7 = vadd.f32 %v2824_v8, %v2717_v16  ;;  %v2759_v14 = vadd.f32 %v7223_v41, %v7126_v48  ;;  %v2816_v41 = vadd.f32 %v7234_v26, %v7140_v11 }
 0x45d   : > { %3377 = vrot.lane.b32.xlu1 %v3372_v4, %s7967_s19  ;;  %3333 = vrot.lane.b32.xlu0 %v3329_v13, %s7966_s0  ;;  %v3414_v13 = vmul.f32 %v7176_v62, %v3412_v0  ;;  %v2959_v26 = vmul.f32 %v6962_v30, %v2958_v33 }
 0x45e   : > { %v7322_v2 = vadd.f32 %v2954_v3, %v2872_v32  ;;  %v7324_v46 = vadd.f32 %v2935_v40, %v2829_v7  ;;  %v3426_v32 = vstv %s7320_s7  ;;  %v2970_v7 = vstv %s7332_s9  ;;  %s7540_s7 = sld [smem:[#allocation3 + $0x8a]] }
 0x45f   : > { %v2882_v21 = vpop.permute.xlu1 %2881  ;;  %v2838_v23 = vpop.permute.xlu0 %2837  ;;  %v2972_v48 = vmul.f32 %v6924_v51, %v2970_v7  ;;  %s7546_s9 = sld [smem:[#allocation3 + $0x47]] }
 0x460   : > { %v2886_v59 = vadd.f32 %v2882_v21, %v2774_v31  ;;  %v2843_v44 = vadd.f32 %v2838_v23, %v2731_v35  ;;  %v3428_v23 = vmul.f32 %v7176_v62, %v3426_v32 }
 0x461   : > { %3391 = vrot.lane.b32.xlu1 %v3386_v19, %s7967_s19  ;;  %3347 = vrot.lane.b32.xlu0 %v3343_v39, %s7966_s0  ;;  %v3440_v19 = vstv %s7342_s10  ;;  %v2976_v39 = vstv %s7354_s18  ;;  %s7557_s10 = sld [smem:[#allocation3 + $0xae]] }
 0x462   : > { %v7344_v1 = vadd.f32 %v2960_v18, %v2886_v59  ;;  %v7346_v22 = vadd.f32 %v2941_v53, %v2843_v44  ;;  %v2978_v15 = vmul.f32 %v6924_v51, %v2976_v39  ;;  %v3399_v51 = vmul.f32 %v7214_v45, %v3398_v58  ;;  %s7563_s18 = sld [smem:[#allocation3 + $0x6b]] }
 0x463   : > { %v2896_v6 = vpop.permute.xlu1 %2895  ;;  %v2852_v63 = vpop.permute.xlu0 %2851  ;;  %v2977_v42 = vmul.f32 %v6962_v30, %v2976_v39  ;;  %v7481_v39 = vld [vmem:[#allocation2 + $0x4a] sm:$0xff] }
 0x464   : > { %v2900_v28 = vadd.f32 %v2896_v6, %v2788_v38  ;;  %v2857_v54 = vadd.f32 %v2852_v63, %v2745_v10  ;;  %v3442_v38 = vmul.f32 %v7176_v62, %v3440_v19  ;;  %v3454_v6 = vstv %s7374_s23  ;;  %s7574_s23 = sld [smem:[#allocation3 + $0xd2]] }
 0x465   : > { %3405 = vrot.lane.b32.xlu1 %v3400_v61, %s7967_s19  ;;  %3361 = vrot.lane.b32.xlu0 %v3357_v20, %s7966_s0  ;;  %v3413_v20 = vmul.f32 %v7214_v45, %v3412_v0 }
 0x466   : > { %v7364_v16 = vadd.f32 %v2966_v17, %v2900_v28  ;;  %v7366_v37 = vadd.f32 %v2947_v60, %v2857_v54  ;;  %v3468_v54 = vstv %s7394_s26  ;;  %v2971_v17 = vmul.f32 %v6962_v30, %v2970_v7  ;;  %s7581_s26 = sld [smem:[#allocation3 + $0x8f]] }
 0x467   : > { %v2910_v8 = vpop.permute.xlu1 %2909  ;;  %v2866_v4 = vpop.permute.xlu0 %2865  ;;  %v3548_v30 = vstv %s7429_s21  ;;  %s7599_s21 = sld [smem:[#allocation3 + $0xb3]] }
 0x468   : > { %v2914_v3 = vadd.f32 %v2910_v8, %v2802_v50  ;;  %v2871_v36 = vadd.f32 %v2866_v4, %v2759_v14  ;;  %v3427_v50 = vmul.f32 %v7214_v45, %v3426_v32  ;;  %v7440_v14 = vld [vmem:[#allocation2 + $0x52] sm:$0xff] }
 0x469   : > { %3419 = vrot.lane.b32.xlu1 %v3414_v13, %s7967_s19  ;;  %3375 = vrot.lane.b32.xlu0 %v3371_v57, %s7967_s19  ;;  %v3534_v13 = vstv %s7414_s11  ;;  %s7590_s11 = sld [smem:[#allocation3 + $0xf6]] }
 0x46a   : > { %v7384_v40 = vadd.f32 %v2972_v48, %v2914_v3  ;;  %v7386_v31 = vadd.f32 %v2953_v55, %v2871_v36  ;;  %v3536_v7 = vmul.f32 %v7440_v14, %v3534_v13 }
 0x46b   : > { %v2924_v35 = vpop.permute.xlu1 %2923  ;;  %v2880_v21 = vpop.permute.xlu0 %2879 }
 0x46c   : > { %v2928_v59 = vadd.f32 %v2924_v35, %v2816_v41  ;;  %v2885_v11 = vadd.f32 %v2880_v21, %v2773_v47  ;;  %v3550_v41 = vmul.f32 %v7440_v14, %v3548_v30  ;;  %v3455_v47 = vmul.f32 %v7214_v45, %v3454_v6 }
 0x46d   : > { %3433 = vrot.lane.b32.xlu1 %v3428_v23, %s7967_s19  ;;  %3389 = vrot.lane.b32.xlu0 %v3385_v25, %s7967_s19  ;;  %v3562_v35 = vstv %s7446_s30  ;;  %s7608_s30 = sld [smem:[#allocation3 + $0x11a]] }
 0x46e   : > { %v7402_v34 = vadd.f32 %v2978_v15, %v2928_v59  ;;  %v7404_v44 = vadd.f32 %v2959_v26, %v2885_v11  ;;  %v3564_v25 = vmul.f32 %v7440_v14, %v3562_v35  ;;  %v3576_v59 = vstv %s7462_s28  ;;  %s7617_s28 = sld [smem:[#allocation3 + $0xd7]] }
 0x46f   : > { %v2990_v18 = vpop.permute.xlu1 %2989  ;;  %v2894_v53 = vpop.permute.xlu0 %2893  ;;  %v3578_v26 = vmul.f32 %v7440_v14, %v3576_v59 }
 0x470   : > { %v7411_v33 = vadd.f32 %v2990_v18, %v7266_v29  ;;  %v2899_v10 = vadd.f32 %v2894_v53, %v2787_v27  ;;  %v3456_v29 = vmul.f32 %v7176_v62, %v3454_v6  ;;  %v3590_v18 = vstv %s7475_s2  ;;  %s7635_s2 = sld [smem:[#allocation3 + $0xfb]] }
 0x471   : > { %3447 = vrot.lane.b32.xlu1 %v3442_v38, %s7967_s19  ;;  %3403 = vrot.lane.b32.xlu0 %v3399_v51, %s7967_s19  ;;  %v3592_v51 = vmul.f32 %v7440_v14, %v3590_v18  ;;  %v3604_v6 = vstv %s7490_s27  ;;  %s7692_s27 = sld [smem:[#allocation3 + $0x21]] }
 0x472   : > { %v7421_v63 = vadd.f32 %v2965_v9, %v2899_v10  ;;  %v3210_v9 = vstv %s7494_s29  ;;  %s7700_s29 = sld [smem:[#allocation3 + $0x45]] }
 0x473   : > { %v3004_v58 = vpop.permute.xlu1 %3003  ;;  %v2908_v61 = vpop.permute.xlu0 %2907 }
 0x474   : > { %v7426_v28 = vadd.f32 %v3004_v58, %v7283_v49  ;;  %v2913_v43 = vadd.f32 %v2908_v61, %v2801_v52  ;;  %v3470_v49 = vmul.f32 %v7176_v62, %v3468_v54  ;;  %v3606_v61 = vmul.f32 %v7440_v14, %v3604_v6 }
 0x475   : > { %3461 = vrot.lane.b32.xlu1 %v3456_v29, %s7967_s19  ;;  %3417 = vrot.lane.b32.xlu0 %v3413_v20, %s7967_s19  ;;  %v3618_v20 = vstv %s7505_s1  ;;  %s7713_s1 = sld [smem:[#allocation3 + $0x8d]] }
 0x476   : > { %v7436_v5 = vadd.f32 %v2971_v17, %v2913_v43  ;;  %v3212_v43 = vmul.f32 %v7176_v62, %v3210_v9 }
 0x477   : > { %v3018_v0 = vpop.permute.xlu1 %3017  ;;  %v2922_v60 = vpop.permute.xlu0 %2921 }
 0x478   : > { %v7443_v8 = vadd.f32 %v3018_v0, %v7302_v12  ;;  %v2927_v4 = vadd.f32 %v2922_v60, %v2815_v24  ;;  %v3441_v12 = vmul.f32 %v7214_v45, %v3440_v19  ;;  %v3469_v19 = vmul.f32 %v7214_v45, %v3468_v54 }
 0x479   : > { %3475 = vrot.lane.b32.xlu1 %v3470_v49, %s7967_s19  ;;  %3431 = vrot.lane.b32.xlu0 %v3427_v50, %s7967_s19  ;;  %v3216_v54 = vstv %s7509_s8  ;;  %v3577_v0 = vmul.f32 %v7481_v39, %v3576_v59  ;;  %v3632_v50 = vstv %s7520_s4  ;;  %v3211_v59 = vmul.f32 %v7214_v45, %v3210_v9  ;;  %s7721_s8 = sld [smem:[#allocation3 + $0xb1]] }
 0x47a   : > { %v7451_v56 = vadd.f32 %v2977_v42, %v2927_v4  ;;  %v3218_v4 = vmul.f32 %v7176_v62, %v3216_v54  ;;  %v3240_v9 = vstv %s7574_s23  ;;  %s7729_s4 = sld [smem:[#allocation3 + $0xd5]] }
 0x47b   : > { %v3032_v57 = vpop.permute.xlu1 %3031  ;;  %v2988_v32 = vpop.permute.xlu0 %2987 }
 0x47c   : > { %v7456_v3 = vadd.f32 %v3032_v57, %v7322_v2  ;;  %v7459_v36 = vadd.f32 %v2988_v32, %v7324_v46 }
 0x47d   : > { %3541 = vrot.lane.b32.xlu1 %v3536_v7, %s7966_s0  ;;  %3445 = vrot.lane.b32.xlu0 %v3441_v12, %s7967_s19 }
 0x47f   : > { %v3046_v48 = vpop.permute.xlu1 %3045  ;;  %v3002_v55 = vpop.permute.xlu0 %3001 }
 0x480   : > { %v7469_v2 = vadd.f32 %v3046_v48, %v7344_v1  ;;  %v7472_v46 = vadd.f32 %v3002_v55, %v7346_v22  ;;  %v3228_v55 = vstv %s7540_s7  ;;  %s7791_s7 = sld [smem:[#allocation6]] }
 0x481   : > { %3555 = vrot.lane.b32.xlu1 %v3550_v41, %s7966_s0  ;;  %3459 = vrot.lane.b32.xlu0 %v3455_v47, %s7967_s19 }
 0x483   : > { %v3060_v21 = vpop.permute.xlu1 %3059  ;;  %v3016_v23 = vpop.permute.xlu0 %3015 }
 0x484   : > { %v7484_v1 = vadd.f32 %v3060_v21, %v7364_v16  ;;  %v7487_v22 = vadd.f32 %v3016_v23, %v7366_v37  ;;  %v3535_v16 = vmul.f32 %v7481_v39, %v3534_v13  ;;  %v3222_v13 = vstv %s7525_s5  ;;  %s7736_s5 = sld [smem:[#allocation3 + $0xf9]] }
 0x485   : > { %3569 = vrot.lane.b32.xlu1 %v3564_v25, %s7966_s0  ;;  %3473 = vrot.lane.b32.xlu0 %v3469_v19, %s7967_s19  ;;  %v3224_v48 = vmul.f32 %v7176_v62, %v3222_v13  ;;  %v3660_v21 = vstv %s7546_s9  ;;  %v3230_v19 = vmul.f32 %v7176_v62, %v3228_v55  ;;  %s7797_s9 = sld [smem:[#allocation6 + $0x1]] }
 0x487   : > { %v3074_v11 = vpop.permute.xlu1 %3073  ;;  %v3030_v15 = vpop.permute.xlu0 %3029 }
 0x488   : > { %v7499_v27 = vadd.f32 %v3074_v11, %v7384_v40  ;;  %v7502_v37 = vadd.f32 %v3030_v15, %v7386_v31  ;;  %v3549_v40 = vmul.f32 %v7481_v39, %v3548_v30  ;;  %v3646_v30 = vstv %s7534_s6  ;;  %s7745_s6 = sld [smem:[#allocation3 + $0x11d]] }
 0x489   : > { %3583 = vrot.lane.b32.xlu1 %v3578_v26, %s7966_s0  ;;  %3539 = vrot.lane.b32.xlu0 %v3535_v16, %s7966_s0  ;;  %v3234_v11 = vstv %s7557_s10  ;;  %s202_s10 = sand.u32 1, %s4504_s13  }
 0x48a   : > { %s3984_s23 = sshll.u32 %s202_s10, 7 }
 0x48b   : > { %v3088_v53 = vpop.permute.xlu1 %3087  ;;  %v3044_v38 = vpop.permute.xlu0 %3043 }
 0x48c   : > { %v7514_v31 = vadd.f32 %v3088_v53, %v7402_v34  ;;  %v7517_v10 = vadd.f32 %v3044_v38, %v7404_v44  ;;  %v3563_v34 = vmul.f32 %v7481_v39, %v3562_v35  ;;  %v3674_v53 = vstv %s7563_s18  ;;  %s7804_s18 = sld [smem:[#allocation6 + $0x2]] }
 0x48d   : > { %3597 = vrot.lane.b32.xlu1 %v3592_v51, %s7966_s0  ;;  %3553 = vrot.lane.b32.xlu0 %v3549_v40, %s7966_s0  ;;  %v3236_v40 = vmul.f32 %v7176_v62, %v3234_v11 }
 0x48f   : > { %v3102_v52 = vpop.permute.xlu1 %3101  ;;  %v3058_v58 = vpop.permute.xlu0 %3057 }
 0x490   : > { %v3106_v44 = vadd.f32 %v3102_v52, %v7411_v33  ;;  %v7531_v29 = vadd.f32 %v3058_v58, %v7421_v63  ;;  %v3620_v63 = vmul.f32 %v7440_v14, %v3618_v20 }
 0x491   : > { %3611 = vrot.lane.b32.xlu1 %v3606_v61, %s7966_s0  ;;  %3567 = vrot.lane.b32.xlu0 %v3563_v34, %s7966_s0  ;;  %v3633_v34 = vmul.f32 %v7481_v39, %v3632_v50 }
 0x492   : > { %v7542_v17 = vadd.f32 %v3212_v43, %v3106_v44  ;;  %v3688_v44 = vstv %s7581_s26  ;;  %s7812_s26 = sld [smem:[#allocation6 + $0x3]] }
 0x493   : > { %v3116_v33 = vpop.permute.xlu1 %3115  ;;  %v3072_v24 = vpop.permute.xlu0 %3071 }
 0x494   : > { %v3120_v60 = vadd.f32 %v3116_v33, %v7426_v28  ;;  %v7550_v49 = vadd.f32 %v3072_v24, %v7436_v5  ;;  %v3634_v28 = vmul.f32 %v7440_v14, %v3632_v50  ;;  %v3591_v5 = vmul.f32 %v7481_v39, %v3590_v18 }
 0x495   : > { %3625 = vrot.lane.b32.xlu1 %v3620_v63, %s7966_s0  ;;  %3581 = vrot.lane.b32.xlu0 %v3577_v0, %s7966_s0  ;;  %v3619_v18 = vmul.f32 %v7481_v39, %v3618_v20  ;;  %v3223_v33 = vmul.f32 %v7214_v45, %v3222_v13  ;;  %v3246_v24 = vstv %s7590_s11  ;;  %s7815_s11 = scalar_lea.vmem [#allocation8], %s3984_s23 }
 0x496   : > { %v7559_v42 = vadd.f32 %v3218_v4, %v3120_v60  ;;  %v3702_v4 = vstv %s7599_s21  ;;  %s7822_s21 = sld [smem:[#allocation6 + $0x4]] }
 0x497   : > { %v3130_v57 = vpop.permute.xlu1 %3129  ;;  %v3086_v32 = vpop.permute.xlu0 %3085 }
 0x498   : > { %v3134_v7 = vadd.f32 %v3130_v57, %v7443_v8  ;;  %v7567_v12 = vadd.f32 %v3086_v32, %v7451_v56  ;;  %v3648_v8 = vmul.f32 %v7440_v14, %v3646_v30  ;;  %v3605_v56 = vmul.f32 %v7481_v39, %v3604_v6 }
 0x499   : > { %3639 = vrot.lane.b32.xlu1 %v3634_v28, %s7966_s0  ;;  %3595 = vrot.lane.b32.xlu0 %v3591_v5, %s7966_s0  ;;  %v3217_v6 = vmul.f32 %v7214_v45, %v3216_v54  ;;  %v3242_v54 = vmul.f32 %v7176_v62, %v3240_v9  ;;  %v3248_v32 = vmul.f32 %v7176_v62, %v3246_v24  ;;  %v3252_v5 = vstv %s7608_s30  ;;  %s7829_s30 = sld [smem:[#allocation6 + $0x5]] }
 0x49a   : > { %v7576_v41 = vadd.f32 %v3224_v48, %v3134_v7  ;;  %v3229_v28 = vmul.f32 %v7214_v45, %v3228_v55 }
 0x49b   : > { %v3144_v47 = vpop.permute.xlu1 %3143  ;;  %v3100_v35 = vpop.permute.xlu0 %3099 }
 0x49c   : > { %v3148_v23 = vadd.f32 %v3144_v47, %v7456_v3  ;;  %v3105_v25 = vadd.f32 %v3100_v35, %v7459_v36  ;;  %v3662_v36 = vmul.f32 %v7440_v14, %v3660_v21  ;;  %v3716_v35 = vstv %s7617_s28  ;;  %s7836_s28 = sld [smem:[#allocation6 + $0x6]] }
 0x49d   : > { %3653 = vrot.lane.b32.xlu1 %v3648_v8, %s7967_s19  ;;  %3609 = vrot.lane.b32.xlu0 %v3605_v56, %s7966_s0  ;;  %v3254_v56 = vmul.f32 %v7176_v62, %v3252_v5  ;;  %v3730_v62 = vstv %s7635_s2  ;;  %s7845_s2 = sld [smem:[#allocation6 + $0x7]] }
 0x49e   : > { %v7592_v15 = vadd.f32 %v3230_v19, %v3148_v23  ;;  %v7594_v26 = vadd.f32 %v3211_v59, %v3105_v25  ;;  %v3235_v23 = vmul.f32 %v7214_v45, %v3234_v11  ;;  %v3241_v11 = vmul.f32 %v7214_v45, %v3240_v9 }
 0x49f   : > { %v3158_v16 = vpop.permute.xlu1 %3157  ;;  %v3114_v3 = vpop.permute.xlu0 %3113 }
 0x4a0   : > { %v3162_v38 = vadd.f32 %v3158_v16, %v7469_v2  ;;  %v3119_v51 = vadd.f32 %v3114_v3, %v7472_v46  ;;  %v3676_v46 = vmul.f32 %v7440_v14, %v3674_v53  ;;  %v3718_v16 = vmul.f32 %v7440_v14, %v3716_v35 }
 0x4a1   : > { %3667 = vrot.lane.b32.xlu1 %v3662_v36, %s7967_s19  ;;  %3623 = vrot.lane.b32.xlu0 %v3619_v18, %s7966_s0 }
 0x4a2   : > { %v7610_v52 = vadd.f32 %v3236_v40, %v3162_v38  ;;  %v7612_v58 = vadd.f32 %v3217_v6, %v3119_v51  ;;  %v3732_v51 = vmul.f32 %v7440_v14, %v3730_v62  ;;  %v3689_v40 = vmul.f32 %v7481_v39, %v3688_v44 }
 0x4a3   : > { %v3172_v61 = vpop.permute.xlu1 %3171  ;;  %v3128_v2 = vpop.permute.xlu0 %3127 }
 0x4a4   : > { %v3176_v20 = vadd.f32 %v3172_v61, %v7484_v1  ;;  %v3133_v43 = vadd.f32 %v3128_v2, %v7487_v22  ;;  %v3690_v1 = vmul.f32 %v7440_v14, %v3688_v44  ;;  %v3647_v22 = vmul.f32 %v7481_v39, %v3646_v30 }
 0x4a5   : > { %3681 = vrot.lane.b32.xlu1 %v3676_v46, %s7967_s19  ;;  %3637 = vrot.lane.b32.xlu0 %v3633_v34, %s7966_s0  ;;  %s7651_s0 = sld [smem:[#allocation3 + $0x11f]]  ;;  %v3703_v34 = vmul.f32 %v7481_v39, %v3702_v4 }
 0x4a6   : > { %v7626_v63 = vadd.f32 %v3242_v54, %v3176_v20  ;;  %v7628_v0 = vadd.f32 %v3223_v33, %v3133_v43  ;;  %v3717_v33 = vmul.f32 %v7481_v39, %v3716_v35  ;;  %v3492_v35 = vstv %s7700_s29 }
 0x4a7   : > { %v3186_v60 = vpop.permute.xlu1 %3185  ;;  %v3142_v50 = vpop.permute.xlu0 %3141 }
 0x4a8   : > { %v3190_v13 = vadd.f32 %v3186_v60, %v7499_v27  ;;  %v3147_v57 = vadd.f32 %v3142_v50, %v7502_v37  ;;  %v3704_v27 = vmul.f32 %v7440_v14, %v3702_v4  ;;  %v3661_v37 = vmul.f32 %v7481_v39, %v3660_v21 }
 0x4a9   : > { %3695 = vrot.lane.b32.xlu1 %v3690_v1, %s7967_s19  ;;  %3651 = vrot.lane.b32.xlu0 %v3647_v22, %s7967_s19 }
 0x4aa   : > { %v7642_v7 = vadd.f32 %v3248_v32, %v3190_v13  ;;  %v7644_v30 = vadd.f32 %v3229_v28, %v3147_v57 }
 0x4ab   : > { %v3200_v48 = vpop.permute.xlu1 %3199  ;;  %v3156_v47 = vpop.permute.xlu0 %3155  ;;  %v3744_v6 = vstv %s7651_s0  ;;  %s4323_s0 = sshll.u32 %s4512_s15, 11 }
 0x4ac   : > { %v3204_v8 = vadd.f32 %v3200_v48, %v7514_v31  ;;  %v3161_v55 = vadd.f32 %v3156_v47, %v7517_v10  ;;  %v3675_v31 = vmul.f32 %v7481_v39, %v3674_v53  ;;  %v3746_v46 = vmul.f32 %v7440_v14, %v3744_v6 }
 0x4ad   : > { %3709 = vrot.lane.b32.xlu1 %v3704_v27, %s7967_s19  ;;  %3665 = vrot.lane.b32.xlu0 %v3661_v37, %s7967_s19  ;;  %v3745_v13 = vmul.f32 %v7481_v39, %v3744_v6  ;;  %v3486_v48 = vstv %s7692_s27  ;;  %v3510_v6 = vstv %s7721_s8  ;;  %s3845_s27 = sshll.u32 %s7815_s11, 4  ;;  %s7896_s8 = scalar_lea.sflag [#allocation4], %s202_s10  ;;  %s7890_s27 = int_to_ptr.vmem [resolvable:$true] %s3845_s27 }
 0x4ae   : > { %v3256_v25 = vadd.f32 %v3254_v56, %v3204_v8  ;;  %v3237_v19 = vadd.f32 %v3235_v23, %v3161_v55  ;;  %s4436_s15 = scalar_lea.vmem %s7890_s27, 2048 }
 0x4af   : > { %v3266_v59 = vpop.permute.xlu1 %3265  ;;  %v3170_v21 = vpop.permute.xlu0 %3169  ;;  %p4437_p8 = scmp.ne.s32.totalorder %s7890_s27, %s4436_s15 }
 0x4b0   : > { %v3270_v10 = vadd.f32 %v3266_v59, %v7542_v17  ;;  %v3175_v3 = vadd.f32 %v3170_v21, %v7531_v29  ;;  %v3247_v29 = vmul.f32 %v7214_v45, %v3246_v24 }
 0x4b1   : > { %3723 = vrot.lane.b32.xlu1 %v3718_v16, %s7967_s19  ;;  %3679 = vrot.lane.b32.xlu0 %v3675_v31, %s7967_s19  ;;  %p4438_p11 = pnand %p4437_p8, %p7968_p10 }
 0x4b2   : > { %v3243_v36 = vadd.f32 %v3241_v11, %v3175_v3  ;;  %v3504_v11 = vstv %s7713_s1  ;;  %s7888_s1 = scalar_lea.hbm %s7944_s3, %s4323_s0 }
 0x4b3   : > { %v3280_v18 = vpop.permute.xlu1 %3279  ;;  %v3184_v38 = vpop.permute.xlu0 %3183  ;;  %p4439_p13 = pneg %p4438_p11 }
 0x4b4   : > { %v3284_v53 = vadd.f32 %v3280_v18, %v7559_v42  ;;  %v3189_v17 = vadd.f32 %v3184_v38, %v7550_v49  ;;  %v3253_v49 = vmul.f32 %v7214_v45, %v3252_v5 }
 0x4b5   : > { %3737 = vrot.lane.b32.xlu1 %v3732_v51, %s7967_s19  ;;  %3693 = vrot.lane.b32.xlu0 %v3689_v40, %s7967_s19 }
 0x4b6   : > { %v3249_v9 = vadd.f32 %v3247_v29, %v3189_v17  ;;  %v3487_v17 = vmul.f32 %v7481_v39, %v3486_v48 }
 0x4b7   : > { %v3294_v61 = vpop.permute.xlu1 %3293  ;;  %v3198_v2 = vpop.permute.xlu0 %3197 }
 0x4b8   : > { %v3298_v44 = vadd.f32 %v3294_v61, %v7576_v41  ;;  %v3203_v42 = vadd.f32 %v3198_v2, %v7567_v12  ;;  %v3731_v12 = vmul.f32 %v7481_v39, %v3730_v62 }
 0x4b9   : > { %3751 = vrot.lane.b32.xlu1 %v3746_v46, %s7967_s19  ;;  %3707 = vrot.lane.b32.xlu0 %v3703_v34, %s7967_s19 }
 0x4ba   : > { %v3255_v20 = vadd.f32 %v3253_v49, %v3203_v42  ;;  %v3493_v42 = vmul.f32 %v7481_v39, %v3492_v35  ;;  %v3516_v49 = vstv %s7729_s4  ;;  %s4528_s4 = smov [#allocation8]  }
 0x4bb   : > { %v3308_v43 = vpop.permute.xlu1 %3307  ;;  %v3264_v54 = vpop.permute.xlu0 %3263 }
 0x4bc   : > { %v3312_v24 = vadd.f32 %v3308_v43, %v7592_v15  ;;  %v3269_v60 = vadd.f32 %v3264_v54, %v7594_v26 }
 0x4bd   : > { %3721 = vrot.lane.b32.xlu0 %v3717_v33, %s7967_s19 }
 0x4bf   : > { %v3322_v41 = vpop.permute.xlu1 %3321  ;;  %v3278_v50 = vpop.permute.xlu0 %3277 }
 0x4c0   : > { %v3326_v45 = vadd.f32 %v3322_v41, %v7610_v52  ;;  %v3283_v1 = vadd.f32 %v3278_v50, %v7612_v58  ;;  %v3518_v41 = vmul.f32 %v7440_v14, %v3516_v49 }
 0x4c1   : > { %3735 = vrot.lane.b32.xlu0 %v3731_v12, %s7967_s19  ;;  %v3522_v12 = vstv %s7736_s5  ;;  %s4440_s5 = sshll.u32 %s4528_s4, 4  ;;  %s4441_s5 = int_to_ptr.vmem [resolvable:$false] %s4440_s5 }
 0x4c2   : > { %p4443_p1 = scmp.lt.s32.totalorder %s7890_s27, %s4441_s5 }
 0x4c3   : > { %v3336_v22 = vpop.permute.xlu1 %3335  ;;  %v3292_v4 = vpop.permute.xlu0 %3291 }
 0x4c4   : > { %v3340_v15 = vadd.f32 %v3336_v22, %v7626_v63  ;;  %v3297_v26 = vadd.f32 %v3292_v4, %v7628_v0 }
 0x4c5   : > { %3749 = vrot.lane.b32.xlu0 %v3745_v13, %s7967_s19  ;;  %s7707_s19 = sld [smem:[#allocation3 + $0x69]] }
 0x4c7   : > { %v3350_v57 = vpop.permute.xlu1 %3349  ;;  %v3306_v32 = vpop.permute.xlu0 %3305 }
 0x4c8   : > { %v7695_v52 = vadd.f32 %v3350_v57, %v7642_v7  ;;  %v7698_v58 = vadd.f32 %v3306_v32, %v7644_v30  ;;  %v3488_v30 = vmul.f32 %v7440_v14, %v3486_v48  ;;  %v3524_v32 = vmul.f32 %v7440_v14, %v3522_v12 }
 0x4cb   : > { %v3364_v28 = vpop.permute.xlu1 %3363  ;;  %v3320_v63 = vpop.permute.xlu0 %3319  ;;  %v3498_v59 = vstv %s7707_s19 }
 0x4cc   : > { %v7702_v5 = vadd.f32 %v3364_v28, %v3256_v25  ;;  %v7704_v0 = vadd.f32 %v3320_v63, %v3237_v19  ;;  %v3494_v19 = vmul.f32 %v7440_v14, %v3492_v35  ;;  %v3500_v62 = vmul.f32 %v7440_v14, %v3498_v59 }
 0x4cd   : > { %v3499_v50 = vmul.f32 %v7481_v39, %v3498_v59 }
 0x4cf   : > { %v3378_v47 = vpop.permute.xlu1 %3377  ;;  %v3334_v27 = vpop.permute.xlu0 %3333 }
 0x4d0   : > { %v3382_v7 = vadd.f32 %v3378_v47, %v3270_v10  ;;  %v7709_v37 = vadd.f32 %v3334_v27, %v3243_v36 }
 0x4d2   : > { %v7715_v8 = vadd.f32 %v3488_v30, %v3382_v7 }
 0x4d3   : > { %v3392_v55 = vpop.permute.xlu1 %3391  ;;  %v3348_v56 = vpop.permute.xlu0 %3347 }
 0x4d4   : > { %v3396_v23 = vadd.f32 %v3392_v55, %v3284_v53  ;;  %v7717_v25 = vadd.f32 %v3348_v56, %v3249_v9  ;;  %v3506_v53 = vmul.f32 %v7440_v14, %v3504_v11 }
 0x4d6   : > { %v7723_v21 = vadd.f32 %v3494_v19, %v3396_v23  ;;  %v3517_v19 = vmul.f32 %v7481_v39, %v3516_v49 }
 0x4d7   : > { %v3406_v16 = vpop.permute.xlu1 %3405  ;;  %v3362_v31 = vpop.permute.xlu0 %3361 }
 0x4d8   : > { %v3410_v10 = vadd.f32 %v3406_v16, %v3298_v44  ;;  %v7725_v3 = vadd.f32 %v3362_v31, %v3255_v20  ;;  %v3512_v44 = vmul.f32 %v7440_v14, %v3510_v6 }
 0x4da   : > { %v7731_v36 = vadd.f32 %v3500_v62, %v3410_v10 }
 0x4db   : > { %v3420_v18 = vpop.permute.xlu1 %3419  ;;  %v3376_v38 = vpop.permute.xlu0 %3375 }
 0x4dc   : > { %v3424_v51 = vadd.f32 %v3420_v18, %v3312_v24  ;;  %v3381_v40 = vadd.f32 %v3376_v38, %v3269_v60 }
 0x4de   : > { %v7738_v29 = vadd.f32 %v3506_v53, %v3424_v51  ;;  %v7740_v9 = vadd.f32 %v3487_v17, %v3381_v40 }
 0x4df   : > { %v3434_v61 = vpop.permute.xlu1 %3433  ;;  %v3390_v2 = vpop.permute.xlu0 %3389 }
 0x4e0   : > { %v3438_v46 = vadd.f32 %v3434_v61, %v3326_v45  ;;  %v3395_v34 = vadd.f32 %v3390_v2, %v3283_v1 }
 0x4e2   : > { %v7747_v20 = vadd.f32 %v3512_v44, %v3438_v46  ;;  %v7749_v43 = vadd.f32 %v3493_v42, %v3395_v34  ;;  %v3758_v46 = vstv %s7791_s7 }
 0x4e3   : > { %v3448_v54 = vpop.permute.xlu1 %3447  ;;  %v3404_v33 = vpop.permute.xlu0 %3403 }
 0x4e4   : > { %v3452_v24 = vadd.f32 %v3448_v54, %v3340_v15  ;;  %v3409_v60 = vadd.f32 %v3404_v33, %v3297_v26  ;;  %v3505_v15 = vmul.f32 %v7481_v39, %v3504_v11  ;;  %v3528_v26 = vstv %s7745_s6  ;;  %s4442_s6 = scalar_lea.vmem %s4441_s5, 4096 }
 0x4e5   : > { %v3530_v30 = vmul.f32 %v7440_v14, %v3528_v26  ;;  %v3523_v14 = vmul.f32 %v7481_v39, %v3522_v12  ;;  %v3529_v18 = vmul.f32 %v7481_v39, %v3528_v26  ;;  %v3767_v33 = vstv %s7797_s9  ;;  %p4444_p6 = scmp.lt.s32.totalorder %s4442_s6, %s4436_s15 }
 0x4e6   : > { %v7754_v45 = vadd.f32 %v3518_v41, %v3452_v24  ;;  %v7756_v1 = vadd.f32 %v3499_v50, %v3409_v60  ;;  %v3776_v12 = vstv %s7804_s18  ;;  %v3785_v26 = vstv %s7812_s26 }
 0x4e7   : > { %v3462_v22 = vpop.permute.xlu1 %3461  ;;  %v3418_v4 = vpop.permute.xlu0 %3417  ;;  %p4445_p7 = por %p4444_p6, %p4443_p1 }
 0x4e8   : > { %v3466_v13 = vadd.f32 %v3462_v22, %v7695_v52  ;;  %v3423_v57 = vadd.f32 %v3418_v4, %v7698_v58  ;;  %v3511_v52 = vmul.f32 %v7481_v39, %v3510_v6 }
 0x4e9   : > { %p4446_p9 = pnand %p4445_p7, %p4439_p13 }
 0x4ea   : > { %v7763_v28 = vadd.f32 %v3524_v32, %v3466_v13  ;;  %v7765_v63 = vadd.f32 %v3505_v15, %v3423_v57 }
 0x4eb   : > { %v3476_v48 = vpop.permute.xlu1 %3475  ;;  %v3432_v47 = vpop.permute.xlu0 %3431 }
 0x4ec   : > { %v3480_v27 = vadd.f32 %v3476_v48, %v7702_v5  ;;  %v3437_v7 = vadd.f32 %v3432_v47, %v7704_v0 }
 0x4ee   : > { %v7771_v58 = vadd.f32 %v3530_v30, %v3480_v27  ;;  %v7773_v35 = vadd.f32 %v3511_v52, %v3437_v7 }
 0x4ef   : > { %v3542_v55 = vpop.permute.xlu1 %3541  ;;  %v3446_v56 = vpop.permute.xlu0 %3445 }
 0x4f0   : > { %v3451_v23 = vadd.f32 %v3446_v56, %v7709_v37  ;;  %v3546_v39 = vadd.f32 %v3542_v55, %v7715_v8  ;;  %v3794_v56 = vstv %s7822_s21 }
 0x4f2   : > { %v7777_v59 = vadd.f32 %v3517_v19, %v3451_v23 }
 0x4f3   : > { %v3556_v16 = vpop.permute.xlu1 %3555  ;;  %v3460_v5 = vpop.permute.xlu0 %3459 }
 0x4f4   : > { %v3465_v0 = vadd.f32 %v3460_v5, %v7717_v25  ;;  %v3560_v49 = vadd.f32 %v3556_v16, %v7723_v21 }
 0x4f6   : > { %v7781_v31 = vadd.f32 %v3523_v14, %v3465_v0 }
 0x4f7   : > { %v3570_v10 = vpop.permute.xlu1 %3569  ;;  %v3474_v62 = vpop.permute.xlu0 %3473 }
 0x4f8   : > { %v3479_v11 = vadd.f32 %v3474_v62, %v7725_v3  ;;  %v3574_v50 = vadd.f32 %v3570_v10, %v7731_v36 }
 0x4fa   : > { %v7785_v37 = vadd.f32 %v3529_v18, %v3479_v11  ;;  %v3803_v11 = vstv %s7829_s30 }
 0x4fb   : > { %v3584_v38 = vpop.permute.xlu1 %3583  ;;  %v3540_v51 = vpop.permute.xlu0 %3539 }
 0x4fc   : > { %v3588_v32 = vadd.f32 %v3584_v38, %v7738_v29  ;;  %v3545_v36 = vadd.f32 %v3540_v51, %v7740_v9 }
 0x4ff   : > { %v3598_v40 = vpop.permute.xlu1 %3597  ;;  %v3554_v53 = vpop.permute.xlu0 %3553 }
 0x500   : > { %v3602_v52 = vadd.f32 %v3598_v40, %v7747_v20  ;;  %v3559_v29 = vadd.f32 %v3554_v53, %v7749_v43 }
 0x503   : > { %v3612_v17 = vpop.permute.xlu1 %3611  ;;  %v3568_v25 = vpop.permute.xlu0 %3567 }
 0x504   : > { %v3616_v10 = vadd.f32 %v3612_v17, %v7754_v45  ;;  %v3573_v20 = vadd.f32 %v3568_v25, %v7756_v1 }
 0x507   : > { %v7787_v6 = vpop.permute.xlu1 %3625  ;;  %v7789_v61 = vpop.permute.xlu0 %3581 }
 0x508   : > { %v3630_v1 = vadd.f32 %v7787_v6, %v7763_v28  ;;  %v3587_v17 = vadd.f32 %v7789_v61, %v7765_v63 }
 0x50b   : > { %v7793_v2 = vpop.permute.xlu1 %3639  ;;  %v7795_v3 = vpop.permute.xlu0 %3595 }
 0x50c   : > { %v3644_v28 = vadd.f32 %v7793_v2, %v7771_v58  ;;  %v3601_v63 = vadd.f32 %v7795_v3, %v7773_v35 }
 0x50f   : > { %v3654_v34 = vpop.permute.xlu1 %3653  ;;  %v7802_v44 = vpop.permute.xlu0 %3609 }
 0x510   : > { %v3658_v42 = vadd.f32 %v3654_v34, %v3546_v39  ;;  %v3615_v58 = vadd.f32 %v7802_v44, %v7777_v59 }
 0x512   : > { %v3760_v54 = vadd.f32 %v3758_v46, %v3658_v42 }
 0x513   : > { %v3668_v24 = vpop.permute.xlu1 %3667  ;;  %v7810_v60 = vpop.permute.xlu0 %3623 }
 0x514   : > { %v3762_v8 = vmax.f32 %v3760_v54, 0.0  ;;  %v3672_v41 = vadd.f32 %v3668_v24, %v3560_v49 }
 0x516   : > { %3765 = vst.msk [vmem:[%s7815_s11 + $0x8] sm:$0xff] %vm3763_vm6, %v3762_v8  ;;  %v3769_v21 = vadd.f32 %v3767_v33, %v3672_v41  ;;  %v3821_v8 = vstv %s7845_s2 }
 0x517   : > { %v3682_v22 = vpop.permute.xlu1 %3681  ;;  %v7820_v4 = vpop.permute.xlu0 %3637 }
 0x518   : > { %v3771_v13 = vmax.f32 %v3769_v21, 0.0  ;;  %v3686_v57 = vadd.f32 %v3682_v22, %v3574_v50 }
 0x51a   : > { %4298 = vst.msk [vmem:[%s7815_s11 + $0x18] sm:$0xff] %vm3763_vm6, %v3771_v13  ;;  %v3778_v15 = vadd.f32 %v3776_v12, %v3686_v57 }
 0x51b   : > { %v3696_v48 = vpop.permute.xlu1 %3695  ;;  %v3652_v47 = vpop.permute.xlu0 %3651 }
 0x51c   : > { %v3780_v27 = vmax.f32 %v3778_v15, 0.0  ;;  %v3700_v7 = vadd.f32 %v3696_v48, %v3588_v32  ;;  %v3657_v30 = vadd.f32 %v3652_v47, %v3545_v36  ;;  %v3629_v15 = vadd.f32 %v7810_v60, %v7781_v31 }
 0x51d   : > { %v3643_v47 = vadd.f32 %v7820_v4, %v7785_v37 }
 0x51e   : > { %4301 = vst.msk [vmem:[%s7815_s11 + $0x28] sm:$0xff] %vm3763_vm6, %v3780_v27  ;;  %v3787_v9 = vadd.f32 %v3785_v26, %v3700_v7  ;;  %v3759_v55 = vadd.f32 %v3758_v46, %v3657_v30  ;;  %v3812_v46 = vstv %s7836_s28 }
 0x51f   : > { %v3710_v23 = vpop.permute.xlu1 %3709  ;;  %v3666_v19 = vpop.permute.xlu0 %3665 }
 0x520   : > { %v3789_v16 = vmax.f32 %v3787_v9, 0.0  ;;  %v3761_v5 = vmax.f32 %v3759_v55, 0.0  ;;  %v3714_v0 = vadd.f32 %v3710_v23, %v3602_v52  ;;  %v3671_v14 = vadd.f32 %v3666_v19, %v3559_v29 }
 0x522   : > { %4304 = vst.msk [vmem:[%s7815_s11 + $0x38] sm:$0xff] %vm3763_vm6, %v3789_v16  ;;  %3764 = vst.msk [vmem:[%s7815_s11] sm:$0xff] %vm3763_vm6, %v3761_v5  ;;  %v3796_v43 = vadd.f32 %v3794_v56, %v3714_v0  ;;  %v3768_v62 = vadd.f32 %v3767_v33, %v3671_v14 }
 0x523   : > { %v3724_v18 = vpop.permute.xlu1 %3723  ;;  %v3680_v38 = vpop.permute.xlu0 %3679 }
 0x524   : > { %v3798_v51 = vmax.f32 %v3796_v43, 0.0  ;;  %v3770_v40 = vmax.f32 %v3768_v62, 0.0  ;;  %v3728_v53 = vadd.f32 %v3724_v18, %v3616_v10  ;;  %v3685_v45 = vadd.f32 %v3680_v38, %v3573_v20 }
 0x526   : > { %4307 = vst.msk [vmem:[%s7815_s11 + $0x48] sm:$0xff] %vm3763_vm6, %v3798_v51  ;;  %4297 = vst.msk [vmem:[%s7815_s11 + $0x10] sm:$0xff] %vm3763_vm6, %v3770_v40  ;;  %v3805_v25 = vadd.f32 %v3803_v11, %v3728_v53  ;;  %v3777_v39 = vadd.f32 %v3776_v12, %v3685_v45 }
 0x527   : > { %v3738_v34 = vpop.permute.xlu1 %3737  ;;  %v3694_v42 = vpop.permute.xlu0 %3693 }
 0x528   : > { %v3807_v49 = vmax.f32 %v3805_v25, 0.0  ;;  %v3779_v54 = vmax.f32 %v3777_v39, 0.0  ;;  %v3742_v33 = vadd.f32 %v3738_v34, %v3630_v1  ;;  %v3699_v24 = vadd.f32 %v3694_v42, %v3587_v17 }
 0x52a   : > { %4310 = vst.msk [vmem:[%s7815_s11 + $0x58] sm:$0xff] %vm3763_vm6, %v3807_v49  ;;  %4300 = vst.msk [vmem:[%s7815_s11 + $0x20] sm:$0xff] %vm3763_vm6, %v3779_v54  ;;  %v3814_v6 = vadd.f32 %v3812_v46, %v3742_v33  ;;  %v3786_v61 = vadd.f32 %v3785_v26, %v3699_v24 }
 0x52b   : > { %v3752_v41 = vpop.permute.xlu1 %3751  ;;  %v3708_v50 = vpop.permute.xlu0 %3707 }
 0x52c   : > { %v3816_v21 = vmax.f32 %v3814_v6, 0.0  ;;  %v3788_v12 = vmax.f32 %v3786_v61, 0.0  ;;  %v3756_v22 = vadd.f32 %v3752_v41, %v3644_v28  ;;  %v3713_v13 = vadd.f32 %v3708_v50, %v3601_v63 }
 0x52e   : > { %4313 = vst.msk [vmem:[%s7815_s11 + $0x68] sm:$0xff] %vm3763_vm6, %v3816_v21  ;;  %4303 = vst.msk [vmem:[%s7815_s11 + $0x30] sm:$0xff] %vm3763_vm6, %v3788_v12  ;;  %v3823_v35 = vadd.f32 %v3821_v8, %v3756_v22  ;;  %v3795_v2 = vadd.f32 %v3794_v56, %v3713_v13 }
 0x52f   : > { %v3722_v3 = vpop.permute.xlu0 %3721 }
 0x530   : > { %v3825_v57 = vmax.f32 %v3823_v35, 0.0  ;;  %v3797_v32 = vmax.f32 %v3795_v2, 0.0  ;;  %v3727_v36 = vadd.f32 %v3722_v3, %v3615_v58 }
 0x532   : > { %4316 = vst.msk [vmem:[%s7815_s11 + $0x78] sm:$0xff] %vm3763_vm6, %v3825_v57  ;;  %4306 = vst.msk [vmem:[%s7815_s11 + $0x40] sm:$0xff] %vm3763_vm6, %v3797_v32  ;;  %v3804_v59 = vadd.f32 %v3803_v11, %v3727_v36 }
 0x533   : > { %v3736_v44 = vpop.permute.xlu0 %3735 }
 0x534   : > { %v3806_v26 = vmax.f32 %v3804_v59, 0.0  ;;  %v3741_v48 = vadd.f32 %v3736_v44, %v3629_v15 }
 0x536   : > { %4309 = vst.msk [vmem:[%s7815_s11 + $0x50] sm:$0xff] %vm3763_vm6, %v3806_v26  ;;  %v3813_v27 = vadd.f32 %v3812_v46, %v3741_v48 }
 0x537   : > { %v3750_v7 = vpop.permute.xlu0 %3749 }
 0x538   : > { %v3815_v30 = vmax.f32 %v3813_v27, 0.0  ;;  %v3755_v31 = vadd.f32 %v3750_v7, %v3643_v47 }
 0x53a   : > { %4312 = vst.msk [vmem:[%s7815_s11 + $0x60] sm:$0xff] %vm3763_vm6, %v3815_v30  ;;  %v3822_v60 = vadd.f32 %v3821_v8, %v3755_v31 }
 0x53c   : > { %v3824_v37 = vmax.f32 %v3822_v60, 0.0 }
 0x53e   : > { %4315 = vst.msk [vmem:[%s7815_s11 + $0x70] sm:$0xff] %vm3763_vm6, %v3824_v37 }
 0x53f   : > { %4449 = shalt.err (!%p4446_p9)
}
 0x540   : > { %s4450_s7 = scalar_lea.hbm %s7888_s1, 2048  ;;  %s4454_s18 = scalar_lea.hbm %s7944_s3, 4096 }
 0x541   : > { %p4451_p12 = scmp.ne.s32.totalorder %s7888_s1, %s4450_s7  ;;  %p4455_p3 = scmp.lt.s32.totalorder %s7888_s1, %s7944_s3 }
 0x542   : > { %p4456_p5 = scmp.lt.s32.totalorder %s4454_s18, %s4450_s7 }
 0x543   : > { %p4452_p0 = pnand %p4451_p12, %p7968_p10 }
 0x544   : > { %p4457_p4 = por %p4456_p5, %p4455_p3 }
 0x545   : > { %p4453_p2 = pneg %p4452_p0 }
 0x547   : > { %p4458_p8 = pnand %p4457_p4, %p4453_p2 }
 0x549   : > { %4461 = shalt.err (!%p4458_p8)
}
 0x54a   : > { %s4529_s11 = smov 128   ;;  %s4530_s21 = smov 8  }
 0x54b   : > { %4332 = dma.vmem_to_hbm [thread:$0]  (%p7968_p10), %s7890_s27, 2048, %s7888_s1, %s7896_s8, %s4529_s11, %s4529_s11, %s4530_s21  }
 0x54c PF: > { %p4349_p11 = scmp.ge.s32.totalorder %s4520_s17, 2  ;;  %s3860_s30 = sand.u32 1, %s4500_s12  }
 0x54d   : > { %p7969_p13 = scmp.ne.s32.totalorder %s7957_s24, 0  ;;  %s3861_s28 = scalar_lea.sflag [#allocation4], %s3860_s30 }
 0x54f   : > { %p4342_p1 = pnand %p4349_p11, %p7969_p13 }
 0x551   : > { %p4343_p6 = pneg %p4342_p1 }
 0x553   : > { %4495 = dma.done.wait (%p4343_p6), %s3861_s28, 2048  }
 0x554   : > { %4497 = vsyncadd (%p4343_p6), %s3861_s28, 4294965248  ;;  %s18_s17 = sadd.s32 1, %s4520_s17   ;;  %s7970_s12 = smov %s4504_s13 }
 0x555   : > { %p15_p7 = scmp.ge.s32.totalorder %s18_s17, 4   ;;  %s7971_s13 = smov %s4508_s14 }
 0x556   : > { %s7972_s14 = smov %s4604_s25  ;;  %s7973_s15 = smov %s4516_s16 }
 0x557   : > { %s7974_s16 = smov %s7976_s20  ;;  %17 = sbr.rel (!%p15_p7) target bundleno = 10 (0xa), region = 99 }
 0x55c   :  { %3866 = vsyncpa [#allocation4], 1 }
 0x55d   :  { %3868 = vsyncpa [#allocation4 + $0x1], 1 }
 0x55e   :  { %3869 = vsyncpa [#allocation5], 1 }
 0x55f   :  { %3871 = vsyncpa [#allocation5 + $0x1], 1 }
 0x560   :  { %3872 = vsyncpa [#allocation7], 1 }

</bundles_post_ra>
